<compile_context>
chip_gen: v6e
topology: v6e:2x2x1
jax: 0.10.0
libtpu: 0.0.40
codegen_flags: <defaults>
</compile_context>

<pallas_src>
from collections import OrderedDict
import functools

import jax
import jax.numpy as jnp
from jax import lax
from jax.experimental import pallas as pl
from jax.experimental.pallas import tpu as pltpu


def _round_up(x, m):
    return ((x + m - 1) // m) * m


_ROW_TARGET = 1024      # target output rows (TH*WOP) per kernel invocation
_EPS = 1e-5

# kh (or kw) -> (parity plane index a/b, +row/+col offset inside the plane)
#   padded index 2*o + k :  k=0 -> even plane, off 0 ; k=1 -> odd plane, off 0 ;
#                           k=2 -> even plane, off 1
_TAP = ((0, 0), (1, 0), (0, 1))


# -----------------------------------------------------------------------------
# Pallas kernel: fused 3x3 stride-2 conv + folded frozen-BN bias + ReLU
# -----------------------------------------------------------------------------
def _conv3x3s2_kernel(pm_ref, ph_ref, w_ref, b_ref, o_ref, acc_ref, *, TH, WOP):
    """One (image, output-row tile, Cout tile, Cin tile) grid step.

    pm_ref : (4, TH, WP, tcin) bf16  main plane window (output rows [i*TH, (i+1)*TH))
    ph_ref : (4, 1,  WP, tcin) bf16  halo row (plane row (i+1)*TH)
    w_ref  : (3, 3, tcin, tn)  bf16  folded conv weights (kh, kw, cin, cout)
    b_ref  : (1, tn)           f32   folded BN bias
    o_ref  : (TH*WOP, tn)      bf16  output rows (row = oy*WOP + ox)
    acc_ref: (TH*WOP, tn)      f32   accumulator across the Cin grid axis
    """
    kc = pl.program_id(3)
    tcin = w_ref.shape[2]

    @pl.when(kc == 0)
    def _init():
        acc_ref[...] = jnp.zeros_like(acc_ref)

    # Load the 4 space-to-depth planes of this window once; the 9 taps slice
    # shifted views out of them, so the im2col never touches HBM.
    pm = [pm_ref[p] for p in range(4)]       # each (TH, WP, tcin)
    ph = [ph_ref[p] for p in range(4)]       # each (1,  WP, tcin)

    acc = acc_ref[...]
    for kh in range(3):
        a, ro = _TAP[kh]
        for kw in range(3):
            b, co = _TAP[kw]
            p = 2 * a + b
            if ro == 0:
                xt = pm[p][:, co:co + WOP, :]
            elif TH == 1:
                xt = ph[p][:, co:co + WOP, :]
            else:
                xt = jnp.concatenate(
                    [pm[p][1:, co:co + WOP, :], ph[p][:, co:co + WOP, :]],
                    axis=0)
            acc = acc + jnp.dot(xt.reshape(TH * WOP, tcin), w_ref[kh, kw],
                                preferred_element_type=jnp.float32)
    acc_ref[...] = acc

    @pl.when(kc == pl.num_programs(3) - 1)
    def _finalize():
        o_ref[...] = jnp.maximum(acc + b_ref[...], 0.0).astype(o_ref.dtype)


def _build_grid_spec(order, N, R, n_j, n_kc, TH, WP, WOP, tcin, tn):
    """Two grid orders: 'A' keeps the activation window resident across Cout
    tiles (early layers); 'B' keeps the weight tile resident across row tiles
    (deep layers, small M) so weights stream once."""
    if order == "A":
        grid = (N, R, n_j, n_kc)
        pm_map = lambda n, i, j, kc: (n, i, 0, kc)
        ph_map = lambda n, i, j, kc: (n, (i + 1) * TH, 0, kc)
        w_map = lambda n, i, j, kc: (0, 0, kc, j)
        b_map = lambda n, i, j, kc: (0, j)
        o_map = lambda n, i, j, kc: (n * R + i, j)
    else:
        grid = (n_j, N, R, n_kc)
        pm_map = lambda j, n, i, kc: (n, i, 0, kc)
        ph_map = lambda j, n, i, kc: (n, (i + 1) * TH, 0, kc)
        w_map = lambda j, n, i, kc: (0, 0, kc, j)
        b_map = lambda j, n, i, kc: (0, j)
        o_map = lambda j, n, i, kc: (n * R + i, j)

    in_specs = [
        pl.BlockSpec((4, TH, WP, tcin), pm_map),   # main plane window
        pl.BlockSpec((4, 1, WP, tcin), ph_map),    # +1 halo row
        pl.BlockSpec((3, 3, tcin, tn), w_map),     # folded weights
        pl.BlockSpec((1, tn), b_map),              # folded BN bias
    ]
    out_specs = pl.BlockSpec((TH * WOP, tn), o_map)
    return grid, in_specs, out_specs


def _conv3x3s2_bn_relu_stage(x_nhwc, w_pad, bias):
    """One backbone stage.

    x_nhwc: (N, H, W, C) activations (C may already equal the padded Cin).
    w_pad : (3, 3, Cinp, Coutp) bf16 folded weights (zero padded).
    bias  : (Cout,) f32 folded BN bias (unpadded => Cout is static).
    Returns ((N, Ho, Wo, Coutp) bf16 channel-padded feature map, Cout).
    """
    N, H, W, C = x_nhwc.shape
    Cinp, Coutp = int(w_pad.shape[2]), int(w_pad.shape[3])
    Cout = int(bias.shape[0])
    assert C <= Cinp

    Ho = (H - 1) // 2 + 1
    Wo = (W - 1) // 2 + 1
    WOP = _round_up(Wo, 16)                       # lane-dense / bf16-sublane friendly
    TH = max(1, min(Ho, _ROW_TARGET // WOP))      # output rows per tile
    R = -(-Ho // TH)                              # row tiles per image
    HP = R * TH + 1                               # plane rows incl. halo
    WP = WOP + 1                                  # plane cols incl. halo

    # Space-to-depth planes of the pad-1 input (1x activation cost, bf16).
    xb = x_nhwc.astype(jnp.bfloat16)
    xp = jnp.pad(xb, ((0, 0), (1, 2 * HP - H - 1),
                      (1, 2 * WP - W - 1), (0, Cinp - C)))
    planes = jnp.stack([xp[:, a::2, b::2, :] for a in (0, 1) for b in (0, 1)],
                       axis=1).reshape(N * 4, HP, WP, Cinp)

    # Tile sizes (lane-aligned).
    if Cinp <= 512:
        tcin = Cinp
    elif Cinp % 512 == 0:
        tcin = 512
    elif Cinp % 256 == 0:
        tcin = 256
    else:
        tcin = 128
    n_kc = Cinp // tcin
    tn = 256 if Coutp % 256 == 0 else 128
    tn = min(tn, Coutp)
    n_j = Coutp // tn

    bias_p = jnp.pad(bias.astype(jnp.float32), (0, Coutp - Cout)).reshape(1, Coutp)

    # Residency heuristic: stream the cheaper operand.
    act_bytes = N * 4 * HP * WP * Cinp * 2
    wt_bytes = 9 * Cinp * Coutp * 2
    order = "B" if act_bytes * (n_j - 1) < wt_bytes * (N * R - 1) else "A"

    grid, in_specs, out_specs = _build_grid_spec(
        order, N, R, n_j, n_kc, TH, WP, WOP, tcin, tn)

    Mtile = TH * WOP
    blk = (2 * (4 * TH * WP * tcin * 2) + 2 * (4 * WP * tcin * 2)
           + 2 * (9 * tcin * tn * 2) + 2 * (tn * 4)
           + 2 * (Mtile * tn * 2) + Mtile * tn * 4)
    vmem_limit = int(min(40 * 2 ** 20, max(24 * 2 ** 20, 2 * blk)))

    kernel = functools.partial(_conv3x3s2_kernel, TH=TH, WOP=WOP)
    out2d = pl.pallas_call(
        kernel,
        out_shape=jax.ShapeDtypeStruct((N * R * Mtile, Coutp), jnp.bfloat16),
        grid_spec=pltpu.PrefetchScalarGridSpec(
            num_scalar_prefetch=0,
            grid=grid,
            in_specs=in_specs,
            out_specs=out_specs,
            scratch_shapes=[pltpu.VMEM((Mtile, tn), jnp.float32)],
        ),
        compiler_params=pltpu.CompilerParams(
            dimension_semantics=("parallel", "parallel", "parallel", "arbitrary"),
            vmem_limit_bytes=vmem_limit,
        ),
    )(planes, planes, w_pad, bias_p)

    feat = out2d.reshape(N, R * TH, WOP, Coutp)[:, :Ho, :Wo, :]
    return feat, Cout


# -----------------------------------------------------------------------------
# Synthetic backbone parameters + one-time preparation (BN folding hoisted)
# -----------------------------------------------------------------------------
def make_backbone_params(key, in_channels, stage_channels):
    """Deterministic per-stage conv + frozen-BN parameters (ResNet-lite)."""
    params = []
    cin = in_channels
    for cout in stage_channels:
        key, kw_, kg, kb, km, kv = jax.random.split(key, 6)
        w = jax.random.normal(kw_, (cout, cin, 3, 3), jnp.float32) * 0.1
        gamma = 1.0 + 0.1 * jax.random.normal(kg, (cout,), jnp.float32)
        beta = 0.1 * jax.random.normal(kb, (cout,), jnp.float32)
        mean = 0.05 * jax.random.normal(km, (cout,), jnp.float32)
        var = jnp.abs(jax.random.normal(kv, (cout,), jnp.float32)) + 0.5
        params.append(dict(w=w, gamma=gamma, beta=beta, mean=mean, var=var))
        cin = cout
    return params


def prepare_backbone_params(params, eps=_EPS):
    """Fold frozen BN into conv weights once (hoisted out of the forward)."""
    prepared = []
    for p in params:
        w = p["w"]                                  # (Cout, Cin, 3, 3) OIHW
        cout, cin = int(w.shape[0]), int(w.shape[1])
        scale = p["gamma"] / jnp.sqrt(p["var"] + eps)
        bias = (p["beta"] - p["mean"] * scale).astype(jnp.float32)
        w_hwio = jnp.transpose(w * scale[:, None, None, None], (2, 3, 1, 0))
        cinp, coutp = _round_up(cin, 128), _round_up(cout, 128)
        w_pad = jnp.pad(w_hwio, ((0, 0), (0, 0),
                                 (0, cinp - cin), (0, coutp - cout)))
        prepared.append({"w": w_pad.astype(jnp.bfloat16), "b": bias})
    return prepared


# -----------------------------------------------------------------------------
# BackboneBase.forward equivalent
# -----------------------------------------------------------------------------
@functools.partial(jax.jit, static_argnames=("return_interm_layers",))
def backbone_base_forward(tensor_nchw, prepared_params, return_interm_layers=False):
    """Returns an OrderedDict of NCHW float32 feature maps like BackboneBase."""
    x = jnp.transpose(tensor_nchw, (0, 2, 3, 1)).astype(jnp.bfloat16)

    feats = []
    for prep in prepared_params:
        x, cout = _conv3x3s2_bn_relu_stage(x, prep["w"], prep["b"])
        feats.append((x, cout))           # channel-padded bf16, fed directly onward

    def to_nchw(f, cout):
        return jnp.transpose(f[..., :cout].astype(jnp.float32), (0, 3, 1, 2))

    xs = OrderedDict()
    if return_interm_layers:
        # {'layer1': '0', 'layer2': '1', 'layer3': '2', 'layer4': '3'}
        for i, (f, cout) in enumerate(feats):
            xs[str(i)] = to_nchw(f, cout)
    else:
        # {'layer4': '0'}
        f, cout = feats[-1]
        xs["0"] = to_nchw(f, cout)
    return xs


# -----------------------------------------------------------------------------
# Pure-JAX reference (same bf16 recipe) for a numerical sanity check
# -----------------------------------------------------------------------------
def _reference_forward(tensor_nchw, params, return_interm_layers, eps=_EPS):
    x = jnp.transpose(tensor_nchw, (0, 2, 3, 1)).astype(jnp.bfloat16)
    feats = []
    for p in params:
        scale = p["gamma"] / jnp.sqrt(p["var"] + eps)
        bias = (p["beta"] - p["mean"] * scale).astype(jnp.float32)
        w_hwio = jnp.transpose(p["w"] * scale[:, None, None, None],
                               (2, 3, 1, 0)).astype(jnp.bfloat16)
        y = lax.conv_general_dilated(
            x, w_hwio, window_strides=(2, 2), padding=((1, 1), (1, 1)),
            dimension_numbers=("NHWC", "HWIO", "NHWC"),
            preferred_element_type=jnp.float32)
        x = jnp.maximum(y + bias, 0.0).astype(jnp.bfloat16)
        feats.append(x)

    xs = OrderedDict()
    if return_interm_layers:
        for i, f in enumerate(feats):
            xs[str(i)] = jnp.transpose(f.astype(jnp.float32), (0, 3, 1, 2))
    else:
        xs["0"] = jnp.transpose(feats[-1].astype(jnp.float32), (0, 3, 1, 2))
    return xs


if __name__ == "__main__":
    key = jax.random.PRNGKey(0)
    k_in, k_params = jax.random.split(key)

    # Small shapes: batch=2, in_channels=4, spatial=16x16 (NCHW like PyTorch).
    x = jax.random.normal(k_in, (2, 4, 16, 16), jnp.float32)
    stage_channels = (8, 16, 16, 32)       # num_channels of the last stage = 32
    params = make_backbone_params(k_params, in_channels=4,
                                  stage_channels=stage_channels)
    prepared = prepare_backbone_params(params)

    # return_interm_layers=False path.
    xs = backbone_base_forward(x, prepared, return_interm_layers=False)
    jax.block_until_ready(xs["0"])
    assert xs["0"].shape == (2, 32, 1, 1), xs["0"].shape

    # return_interm_layers=True path: 16 -> 8 -> 4 -> 2 -> 1 spatially.
    xs_all = backbone_base_forward(x, prepared, return_interm_layers=True)
    jax.block_until_ready(xs_all["3"])
    assert xs_all["0"].shape == (2, 8, 8, 8)
    assert xs_all["1"].shape == (2, 16, 4, 4)
    assert xs_all["2"].shape == (2, 16, 2, 2)
    assert xs_all["3"].shape == (2, 32, 1, 1)

    # Numerical check against a pure-JAX reference using the same bf16 recipe.
    ref = _reference_forward(x, params, return_interm_layers=True)
    for k in xs_all:
        ok = jnp.allclose(xs_all[k], ref[k], atol=5e-2, rtol=5e-2)
        assert bool(ok), f"stage {k} mismatch: max err " \
                         f"{float(jnp.max(jnp.abs(xs_all[k] - ref[k])))}"

    print("KERNEL_OK")
</pallas_src>

<mosaic_0001>
module attributes {stable_mosaic.version = 11 : i64} {
  func.func @_conv3x3s2_kernel(%arg0: i32, %arg1: i32, %arg2: i32, %arg3: i32, %arg4: memref<4x8x17x128xbf16, #tpu.memory_space<vmem>>, %arg5: memref<4x1x17x128xbf16, #tpu.memory_space<vmem>>, %arg6: memref<3x3x128x128xbf16, #tpu.memory_space<vmem>>, %arg7: memref<1x128xf32, #tpu.memory_space<vmem>>, %arg8: memref<128x128xbf16, #tpu.memory_space<vmem>>, %arg9: memref<128x128xf32, #tpu.memory_space<vmem>>) attributes {dimension_semantics = [#tpu.dimension_semantics<parallel>, #tpu.dimension_semantics<parallel>, #tpu.dimension_semantics<parallel>, #tpu.dimension_semantics<arbitrary>], iteration_bounds = array<i64: 1, 2, 1, 1>, scalar_prefetch = 0 : i64, scratch_operands = 1 : i64, tpu.core_type = #tpu.core_type<tc>, window_params = [{transform_indices = @transform_0, window_bounds = array<i64: 4, 8, 17, 128>}, {transform_indices = @transform_1, window_bounds = array<i64: 4, 1, 17, 128>}, {transform_indices = @transform_2, window_bounds = array<i64: 3, 3, 128, 128>}, {transform_indices = @transform_3, window_bounds = array<i64: 1, 128>}, {transform_indices = @transform_4, window_bounds = array<i64: 128, 128>}]} {
    %c0_i32 = arith.constant 0 : i32
    %0 = arith.cmpi eq, %arg3, %c0_i32 : i32
    %1 = arith.extui %0 : i1 to i32
    %c0_i32_0 = arith.constant 0 : i32
    %2 = arith.cmpi ne, %1, %c0_i32_0 : i32
    scf.if %2 {
      %cst_71 = arith.constant 0.000000e+00 : f32
      %80 = vector.broadcast %cst_71 : f32 to vector<128x128xf32>
      %c0_72 = arith.constant 0 : index
      %c0_73 = arith.constant 0 : index
      %81 = vector.load %arg9[%c0_72, %c0_73] : memref<128x128xf32, #tpu.memory_space<vmem>>, vector<128x128xf32>
      tpu.vector_store %arg9[%c0_72, %c0_73], %80 {strides = array<i32>} : memref<128x128xf32, #tpu.memory_space<vmem>>, vector<128x128xf32>,
    } else {
    }
    %c0 = arith.constant 0 : index
    %c0_1 = arith.constant 0 : index
    %c0_2 = arith.constant 0 : index
    %c0_3 = arith.constant 0 : index
    %3 = vector.load %arg4[%c0, %c0_1, %c0_2, %c0_3] : memref<4x8x17x128xbf16, #tpu.memory_space<vmem>>, vector<1x8x17x128xbf16>
    %4 = vector.shape_cast %3 : vector<1x8x17x128xbf16> to vector<8x17x128xbf16>
    %c1 = arith.constant 1 : index
    %c0_4 = arith.constant 0 : index
    %c0_5 = arith.constant 0 : index
    %c0_6 = arith.constant 0 : index
    %5 = vector.load %arg4[%c1, %c0_4, %c0_5, %c0_6] : memref<4x8x17x128xbf16, #tpu.memory_space<vmem>>, vector<1x8x17x128xbf16>
    %6 = vector.shape_cast %5 : vector<1x8x17x128xbf16> to vector<8x17x128xbf16>
    %c2 = arith.constant 2 : index
    %c0_7 = arith.constant 0 : index
    %c0_8 = arith.constant 0 : index
    %c0_9 = arith.constant 0 : index
    %7 = vector.load %arg4[%c2, %c0_7, %c0_8, %c0_9] : memref<4x8x17x128xbf16, #tpu.memory_space<vmem>>, vector<1x8x17x128xbf16>
    %8 = vector.shape_cast %7 : vector<1x8x17x128xbf16> to vector<8x17x128xbf16>
    %c3 = arith.constant 3 : index
    %c0_10 = arith.constant 0 : index
    %c0_11 = arith.constant 0 : index
    %c0_12 = arith.constant 0 : index
    %9 = vector.load %arg4[%c3, %c0_10, %c0_11, %c0_12] : memref<4x8x17x128xbf16, #tpu.memory_space<vmem>>, vector<1x8x17x128xbf16>
    %10 = vector.shape_cast %9 : vector<1x8x17x128xbf16> to vector<8x17x128xbf16>
    %c0_13 = arith.constant 0 : index
    %c0_14 = arith.constant 0 : index
    %c0_15 = arith.constant 0 : index
    %c0_16 = arith.constant 0 : index
    %11 = vector.load %arg5[%c0_13, %c0_14, %c0_15, %c0_16] : memref<4x1x17x128xbf16, #tpu.memory_space<vmem>>, vector<1x1x17x128xbf16>
    %12 = vector.shape_cast %11 : vector<1x1x17x128xbf16> to vector<1x17x128xbf16>
    %c1_17 = arith.constant 1 : index
    %c0_18 = arith.constant 0 : index
    %c0_19 = arith.constant 0 : index
    %c0_20 = arith.constant 0 : index
    %13 = vector.load %arg5[%c1_17, %c0_18, %c0_19, %c0_20] : memref<4x1x17x128xbf16, #tpu.memory_space<vmem>>, vector<1x1x17x128xbf16>
    %14 = vector.shape_cast %13 : vector<1x1x17x128xbf16> to vector<1x17x128xbf16>
    %c0_21 = arith.constant 0 : index
    %c0_22 = arith.constant 0 : index
    %15 = vector.load %arg9[%c0_21, %c0_22] : memref<128x128xf32, #tpu.memory_space<vmem>>, vector<128x128xf32>
    %16 = vector.extract_strided_slice %4 {offsets = [0, 0, 0], sizes = [8, 16, 128], strides = [1, 1, 1]} : vector<8x17x128xbf16> to vector<8x16x128xbf16>
    %17 = vector.shape_cast %16 : vector<8x16x128xbf16> to vector<128x128xbf16>
    %c0_23 = arith.constant 0 : index
    %c0_24 = arith.constant 0 : index
    %c0_25 = arith.constant 0 : index
    %c0_26 = arith.constant 0 : index
    %18 = vector.load %arg6[%c0_23, %c0_24, %c0_25, %c0_26] : memref<3x3x128x128xbf16, #tpu.memory_space<vmem>>, vector<1x1x128x128xbf16>
    %19 = vector.shape_cast %18 : vector<1x1x128x128xbf16> to vector<128x128xbf16>
    %cst = arith.constant dense<0.000000e+00> : vector<128x128xf32>
    %20 = tpu.matmul %17, %19, %cst {dimension_numbers = #tpu.dot_dimension_numbers<[1], [0], [0], [1], [0, 0, 1, 1], [], []>} : vector<128x128xbf16>, vector<128x128xbf16>, vector<128x128xf32> -> vector<128x128xf32>
    %21 = arith.addf %15, %20 : vector<128x128xf32>
    %22 = vector.extract_strided_slice %6 {offsets = [0, 0, 0], sizes = [8, 16, 128], strides = [1, 1, 1]} : vector<8x17x128xbf16> to vector<8x16x128xbf16>
    %23 = vector.shape_cast %22 : vector<8x16x128xbf16> to vector<128x128xbf16>
    %c0_27 = arith.constant 0 : index
    %c1_28 = arith.constant 1 : index
    %c0_29 = arith.constant 0 : index
    %c0_30 = arith.constant 0 : index
    %24 = vector.load %arg6[%c0_27, %c1_28, %c0_29, %c0_30] : memref<3x3x128x128xbf16, #tpu.memory_space<vmem>>, vector<1x1x128x128xbf16>
    %25 = vector.shape_cast %24 : vector<1x1x128x128xbf16> to vector<128x128xbf16>
    %cst_31 = arith.constant dense<0.000000e+00> : vector<128x128xf32>
    %26 = tpu.matmul %23, %25, %cst_31 {dimension_numbers = #tpu.dot_dimension_numbers<[1], [0], [0], [1], [0, 0, 1, 1], [], []>} : vector<128x128xbf16>, vector<128x128xbf16>, vector<128x128xf32> -> vector<128x128xf32>
    %27 = arith.addf %21, %26 : vector<128x128xf32>
    %28 = vector.extract_strided_slice %4 {offsets = [0, 1, 0], sizes = [8, 16, 128], strides = [1, 1, 1]} : vector<8x17x128xbf16> to vector<8x16x128xbf16>
    %29 = vector.shape_cast %28 : vector<8x16x128xbf16> to vector<128x128xbf16>
    %c0_32 = arith.constant 0 : index
    %c2_33 = arith.constant 2 : index
    %c0_34 = arith.constant 0 : index
    %c0_35 = arith.constant 0 : index
    %30 = vector.load %arg6[%c0_32, %c2_33, %c0_34, %c0_35] : memref<3x3x128x128xbf16, #tpu.memory_space<vmem>>, vector<1x1x128x128xbf16>
    %31 = vector.shape_cast %30 : vector<1x1x128x128xbf16> to vector<128x128xbf16>
    %cst_36 = arith.constant dense<0.000000e+00> : vector<128x128xf32>
    %32 = tpu.matmul %29, %31, %cst_36 {dimension_numbers = #tpu.dot_dimension_numbers<[1], [0], [0], [1], [0, 0, 1, 1], [], []>} : vector<128x128xbf16>, vector<128x128xbf16>, vector<128x128xf32> -> vector<128x128xf32>
    %33 = arith.addf %27, %32 : vector<128x128xf32>
    %34 = vector.extract_strided_slice %8 {offsets = [0, 0, 0], sizes = [8, 16, 128], strides = [1, 1, 1]} : vector<8x17x128xbf16> to vector<8x16x128xbf16>
    %35 = vector.shape_cast %34 : vector<8x16x128xbf16> to vector<128x128xbf16>
    %c1_37 = arith.constant 1 : index
    %c0_38 = arith.constant 0 : index
    %c0_39 = arith.constant 0 : index
    %c0_40 = arith.constant 0 : index
    %36 = vector.load %arg6[%c1_37, %c0_38, %c0_39, %c0_40] : memref<3x3x128x128xbf16, #tpu.memory_space<vmem>>, vector<1x1x128x128xbf16>
    %37 = vector.shape_cast %36 : vector<1x1x128x128xbf16> to vector<128x128xbf16>
    %cst_41 = arith.constant dense<0.000000e+00> : vector<128x128xf32>
    %38 = tpu.matmul %35, %37, %cst_41 {dimension_numbers = #tpu.dot_dimension_numbers<[1], [0], [0], [1], [0, 0, 1, 1], [], []>} : vector<128x128xbf16>, vector<128x128xbf16>, vector<128x128xf32> -> vector<128x128xf32>
    %39 = arith.addf %33, %38 : vector<128x128xf32>
    %40 = vector.extract_strided_slice %10 {offsets = [0, 0, 0], sizes = [8, 16, 128], strides = [1, 1, 1]} : vector<8x17x128xbf16> to vector<8x16x128xbf16>
    %41 = vector.shape_cast %40 : vector<8x16x128xbf16> to vector<128x128xbf16>
    %c1_42 = arith.constant 1 : index
    %c1_43 = arith.constant 1 : index
    %c0_44 = arith.constant 0 : index
    %c0_45 = arith.constant 0 : index
    %42 = vector.load %arg6[%c1_42, %c1_43, %c0_44, %c0_45] : memref<3x3x128x128xbf16, #tpu.memory_space<vmem>>, vector<1x1x128x128xbf16>
    %43 = vector.shape_cast %42 : vector<1x1x128x128xbf16> to vector<128x128xbf16>
    %cst_46 = arith.constant dense<0.000000e+00> : vector<128x128xf32>
    %44 = tpu.matmul %41, %43, %cst_46 {dimension_numbers = #tpu.dot_dimension_numbers<[1], [0], [0], [1], [0, 0, 1, 1], [], []>} : vector<128x128xbf16>, vector<128x128xbf16>, vector<128x128xf32> -> vector<128x128xf32>
    %45 = arith.addf %39, %44 : vector<128x128xf32>
    %46 = vector.extract_strided_slice %8 {offsets = [0, 1, 0], sizes = [8, 16, 128], strides = [1, 1, 1]} : vector<8x17x128xbf16> to vector<8x16x128xbf16>
    %47 = vector.shape_cast %46 : vector<8x16x128xbf16> to vector<128x128xbf16>
    %c1_47 = arith.constant 1 : index
    %c2_48 = arith.constant 2 : index
    %c0_49 = arith.constant 0 : index
    %c0_50 = arith.constant 0 : index
    %48 = vector.load %arg6[%c1_47, %c2_48, %c0_49, %c0_50] : memref<3x3x128x128xbf16, #tpu.memory_space<vmem>>, vector<1x1x128x128xbf16>
    %49 = vector.shape_cast %48 : vector<1x1x128x128xbf16> to vector<128x128xbf16>
    %cst_51 = arith.constant dense<0.000000e+00> : vector<128x128xf32>
    %50 = tpu.matmul %47, %49, %cst_51 {dimension_numbers = #tpu.dot_dimension_numbers<[1], [0], [0], [1], [0, 0, 1, 1], [], []>} : vector<128x128xbf16>, vector<128x128xbf16>, vector<128x128xf32> -> vector<128x128xf32>
    %51 = arith.addf %45, %50 : vector<128x128xf32>
    %52 = vector.extract_strided_slice %4 {offsets = [1, 0, 0], sizes = [7, 16, 128], strides = [1, 1, 1]} : vector<8x17x128xbf16> to vector<7x16x128xbf16>
    %53 = vector.extract_strided_slice %12 {offsets = [0, 0, 0], sizes = [1, 16, 128], strides = [1, 1, 1]} : vector<1x17x128xbf16> to vector<1x16x128xbf16>
    %54 = tpu.concatenate %52, %53 in 0 : vector<7x16x128xbf16>, vector<1x16x128xbf16> -> vector<8x16x128xbf16>
    %55 = vector.shape_cast %54 : vector<8x16x128xbf16> to vector<128x128xbf16>
    %c2_52 = arith.constant 2 : index
    %c0_53 = arith.constant 0 : index
    %c0_54 = arith.constant 0 : index
    %c0_55 = arith.constant 0 : index
    %56 = vector.load %arg6[%c2_52, %c0_53, %c0_54, %c0_55] : memref<3x3x128x128xbf16, #tpu.memory_space<vmem>>, vector<1x1x128x128xbf16>
    %57 = vector.shape_cast %56 : vector<1x1x128x128xbf16> to vector<128x128xbf16>
    %cst_56 = arith.constant dense<0.000000e+00> : vector<128x128xf32>
    %58 = tpu.matmul %55, %57, %cst_56 {dimension_numbers = #tpu.dot_dimension_numbers<[1], [0], [0], [1], [0, 0, 1, 1], [], []>} : vector<128x128xbf16>, vector<128x128xbf16>, vector<128x128xf32> -> vector<128x128xf32>
    %59 = arith.addf %51, %58 : vector<128x128xf32>
    %60 = vector.extract_strided_slice %6 {offsets = [1, 0, 0], sizes = [7, 16, 128], strides = [1, 1, 1]} : vector<8x17x128xbf16> to vector<7x16x128xbf16>
    %61 = vector.extract_strided_slice %14 {offsets = [0, 0, 0], sizes = [1, 16, 128], strides = [1, 1, 1]} : vector<1x17x128xbf16> to vector<1x16x128xbf16>
    %62 = tpu.concatenate %60, %61 in 0 : vector<7x16x128xbf16>, vector<1x16x128xbf16> -> vector<8x16x128xbf16>
    %63 = vector.shape_cast %62 : vector<8x16x128xbf16> to vector<128x128xbf16>
    %c2_57 = arith.constant 2 : index
    %c1_58 = arith.constant 1 : index
    %c0_59 = arith.constant 0 : index
    %c0_60 = arith.constant 0 : index
    %64 = vector.load %arg6[%c2_57, %c1_58, %c0_59, %c0_60] : memref<3x3x128x128xbf16, #tpu.memory_space<vmem>>, vector<1x1x128x128xbf16>
    %65 = vector.shape_cast %64 : vector<1x1x128x128xbf16> to vector<128x128xbf16>
    %cst_61 = arith.constant dense<0.000000e+00> : vector<128x128xf32>
    %66 = tpu.matmul %63, %65, %cst_61 {dimension_numbers = #tpu.dot_dimension_numbers<[1], [0], [0], [1], [0, 0, 1, 1], [], []>} : vector<128x128xbf16>, vector<128x128xbf16>, vector<128x128xf32> -> vector<128x128xf32>
    %67 = arith.addf %59, %66 : vector<128x128xf32>
    %68 = vector.extract_strided_slice %4 {offsets = [1, 1, 0], sizes = [7, 16, 128], strides = [1, 1, 1]} : vector<8x17x128xbf16> to vector<7x16x128xbf16>
    %69 = vector.extract_strided_slice %12 {offsets = [0, 1, 0], sizes = [1, 16, 128], strides = [1, 1, 1]} : vector<1x17x128xbf16> to vector<1x16x128xbf16>
    %70 = tpu.concatenate %68, %69 in 0 : vector<7x16x128xbf16>, vector<1x16x128xbf16> -> vector<8x16x128xbf16>
    %71 = vector.shape_cast %70 : vector<8x16x128xbf16> to vector<128x128xbf16>
    %c2_62 = arith.constant 2 : index
    %c2_63 = arith.constant 2 : index
    %c0_64 = arith.constant 0 : index
    %c0_65 = arith.constant 0 : index
    %72 = vector.load %arg6[%c2_62, %c2_63, %c0_64, %c0_65] : memref<3x3x128x128xbf16, #tpu.memory_space<vmem>>, vector<1x1x128x128xbf16>
    %73 = vector.shape_cast %72 : vector<1x1x128x128xbf16> to vector<128x128xbf16>
    %cst_66 = arith.constant dense<0.000000e+00> : vector<128x128xf32>
    %74 = tpu.matmul %71, %73, %cst_66 {dimension_numbers = #tpu.dot_dimension_numbers<[1], [0], [0], [1], [0, 0, 1, 1], [], []>} : vector<128x128xbf16>, vector<128x128xbf16>, vector<128x128xf32> -> vector<128x128xf32>
    %75 = arith.addf %67, %74 : vector<128x128xf32>
    %c0_67 = arith.constant 0 : index
    %c0_68 = arith.constant 0 : index
    %76 = vector.load %arg9[%c0_67, %c0_68] : memref<128x128xf32, #tpu.memory_space<vmem>>, vector<128x128xf32>
    tpu.vector_store %arg9[%c0_67, %c0_68], %75 {strides = array<i32>} : memref<128x128xf32, #tpu.memory_space<vmem>>, vector<128x128xf32>,
    %c0_i32_69 = arith.constant 0 : i32
    %77 = arith.cmpi eq, %arg3, %c0_i32_69 : i32
    %78 = arith.extui %77 : i1 to i32
    %c0_i32_70 = arith.constant 0 : i32
    %79 = arith.cmpi ne, %78, %c0_i32_70 : i32
    scf.if %79 {
      %c0_71 = arith.constant 0 : index
      %c0_72 = arith.constant 0 : index
      %80 = vector.load %arg7[%c0_71, %c0_72] : memref<1x128xf32, #tpu.memory_space<vmem>>, vector<1x128xf32>
      %81 = vector.broadcast %80 : vector<1x128xf32> to vector<128x128xf32>
      %82 = arith.addf %75, %81 : vector<128x128xf32>
      %cst_73 = arith.constant 0.000000e+00 : f32
      %83 = vector.broadcast %cst_73 : f32 to vector<128x128xf32>
      %84 = arith.maximumf %82, %83 : vector<128x128xf32>
      %85 = arith.truncf %84 : vector<128x128xf32> to vector<128x128xbf16>
      %c0_74 = arith.constant 0 : index
      %c0_75 = arith.constant 0 : index
      %86 = vector.load %arg8[%c0_74, %c0_75] : memref<128x128xbf16, #tpu.memory_space<vmem>>, vector<128x128xbf16>
      tpu.vector_store %arg8[%c0_74, %c0_75], %85 {strides = array<i32>} : memref<128x128xbf16, #tpu.memory_space<vmem>>, vector<128x128xbf16>,
    } else {
    }
    return
  }
  func.func @transform_0(%arg0: i32, %arg1: i32, %arg2: i32, %arg3: i32) -> (i32, i32, i32, i32) {
    %c0_i32 = arith.constant 0 : i32
    %c0_i32_0 = arith.constant 0 : i32
    return %arg1, %arg2, %c0_i32, %arg3 : i32, i32, i32, i32
  }
  func.func @transform_1(%arg0: i32, %arg1: i32, %arg2: i32, %arg3: i32) -> (i32, i32, i32, i32) {
    %c1_i32 = arith.constant 1 : i32
    %0 = arith.addi %arg2, %c1_i32 : i32
    %c8_i32 = arith.constant 8 : i32
    %1 = arith.muli %0, %c8_i32 : i32
    %c0_i32 = arith.constant 0 : i32
    %c0_i32_0 = arith.constant 0 : i32
    return %arg1, %1, %c0_i32, %arg3 : i32, i32, i32, i32
  }
  func.func @transform_2(%arg0: i32, %arg1: i32, %arg2: i32, %arg3: i32) -> (i32, i32, i32, i32) {
    %c0_i32 = arith.constant 0 : i32
    %c0_i32_0 = arith.constant 0 : i32
    %c0_i32_1 = arith.constant 0 : i32
    return %c0_i32, %c0_i32_0, %arg3, %arg0 : i32, i32, i32, i32
  }
  func.func @transform_3(%arg0: i32, %arg1: i32, %arg2: i32, %arg3: i32) -> (i32, i32) {
    %c0_i32 = arith.constant 0 : i32
    %c0_i32_0 = arith.constant 0 : i32
    return %c0_i32, %arg0 : i32, i32
  }
  func.func @transform_4(%arg0: i32, %arg1: i32, %arg2: i32, %arg3: i32) -> (i32, i32) {
    %c1_i32 = arith.constant 1 : i32
    %0 = arith.muli %arg1, %c1_i32 : i32
    %1 = arith.addi %0, %arg2 : i32
    %c0_i32 = arith.constant 0 : i32
    return %1, %arg0 : i32, i32
  }
}

module attributes {stable_mosaic.version = 11 : i64} {
  func.func @_conv3x3s2_kernel(%arg0: i32, %arg1: i32, %arg2: i32, %arg3: i32, %arg4: memref<4x4x17x128xbf16, #tpu.memory_space<vmem>>, %arg5: memref<4x1x17x128xbf16, #tpu.memory_space<vmem>>, %arg6: memref<3x3x128x128xbf16, #tpu.memory_space<vmem>>, %arg7: memref<1x128xf32, #tpu.memory_space<vmem>>, %arg8: memref<64x128xbf16, #tpu.memory_space<vmem>>, %arg9: memref<64x128xf32, #tpu.memory_space<vmem>>) attributes {dimension_semantics = [#tpu.dimension_semantics<parallel>, #tpu.dimension_semantics<parallel>, #tpu.dimension_semantics<parallel>, #tpu.dimension_semantics<arbitrary>], iteration_bounds = array<i64: 1, 2, 1, 1>, scalar_prefetch = 0 : i64, scratch_operands = 1 : i64, tpu.core_type = #tpu.core_type<tc>, window_params = [{transform_indices = @transform_0, window_bounds = array<i64: 4, 4, 17, 128>}, {transform_indices = @transform_1, window_bounds = array<i64: 4, 1, 17, 128>}, {transform_indices = @transform_2, window_bounds = array<i64: 3, 3, 128, 128>}, {transform_indices = @transform_3, window_bounds = array<i64: 1, 128>}, {transform_indices = @transform_4, window_bounds = array<i64: 64, 128>}]} {
    %c0_i32 = arith.constant 0 : i32
    %0 = arith.cmpi eq, %arg3, %c0_i32 : i32
    %1 = arith.extui %0 : i1 to i32
    %c0_i32_0 = arith.constant 0 : i32
    %2 = arith.cmpi ne, %1, %c0_i32_0 : i32
    scf.if %2 {
      %cst_71 = arith.constant 0.000000e+00 : f32
      %80 = vector.broadcast %cst_71 : f32 to vector<64x128xf32>
      %c0_72 = arith.constant 0 : index
      %c0_73 = arith.constant 0 : index
      %81 = vector.load %arg9[%c0_72, %c0_73] : memref<64x128xf32, #tpu.memory_space<vmem>>, vector<64x128xf32>
      tpu.vector_store %arg9[%c0_72, %c0_73], %80 {strides = array<i32>} : memref<64x128xf32, #tpu.memory_space<vmem>>, vector<64x128xf32>,
    } else {
    }
    %c0 = arith.constant 0 : index
    %c0_1 = arith.constant 0 : index
    %c0_2 = arith.constant 0 : index
    %c0_3 = arith.constant 0 : index
    %3 = vector.load %arg4[%c0, %c0_1, %c0_2, %c0_3] : memref<4x4x17x128xbf16, #tpu.memory_space<vmem>>, vector<1x4x17x128xbf16>
    %4 = vector.shape_cast %3 : vector<1x4x17x128xbf16> to vector<4x17x128xbf16>
    %c1 = arith.constant 1 : index
    %c0_4 = arith.constant 0 : index
    %c0_5 = arith.constant 0 : index
    %c0_6 = arith.constant 0 : index
    %5 = vector.load %arg4[%c1, %c0_4, %c0_5, %c0_6] : memref<4x4x17x128xbf16, #tpu.memory_space<vmem>>, vector<1x4x17x128xbf16>
    %6 = vector.shape_cast %5 : vector<1x4x17x128xbf16> to vector<4x17x128xbf16>
    %c2 = arith.constant 2 : index
    %c0_7 = arith.constant 0 : index
    %c0_8 = arith.constant 0 : index
    %c0_9 = arith.constant 0 : index
    %7 = vector.load %arg4[%c2, %c0_7, %c0_8, %c0_9] : memref<4x4x17x128xbf16, #tpu.memory_space<vmem>>, vector<1x4x17x128xbf16>
    %8 = vector.shape_cast %7 : vector<1x4x17x128xbf16> to vector<4x17x128xbf16>
    %c3 = arith.constant 3 : index
    %c0_10 = arith.constant 0 : index
    %c0_11 = arith.constant 0 : index
    %c0_12 = arith.constant 0 : index
    %9 = vector.load %arg4[%c3, %c0_10, %c0_11, %c0_12] : memref<4x4x17x128xbf16, #tpu.memory_space<vmem>>, vector<1x4x17x128xbf16>
    %10 = vector.shape_cast %9 : vector<1x4x17x128xbf16> to vector<4x17x128xbf16>
    %c0_13 = arith.constant 0 : index
    %c0_14 = arith.constant 0 : index
    %c0_15 = arith.constant 0 : index
    %c0_16 = arith.constant 0 : index
    %11 = vector.load %arg5[%c0_13, %c0_14, %c0_15, %c0_16] : memref<4x1x17x128xbf16, #tpu.memory_space<vmem>>, vector<1x1x17x128xbf16>
    %12 = vector.shape_cast %11 : vector<1x1x17x128xbf16> to vector<1x17x128xbf16>
    %c1_17 = arith.constant 1 : index
    %c0_18 = arith.constant 0 : index
    %c0_19 = arith.constant 0 : index
    %c0_20 = arith.constant 0 : index
    %13 = vector.load %arg5[%c1_17, %c0_18, %c0_19, %c0_20] : memref<4x1x17x128xbf16, #tpu.memory_space<vmem>>, vector<1x1x17x128xbf16>
    %14 = vector.shape_cast %13 : vector<1x1x17x128xbf16> to vector<1x17x128xbf16>
    %c0_21 = arith.constant 0 : index
    %c0_22 = arith.constant 0 : index
    %15 = vector.load %arg9[%c0_21, %c0_22] : memref<64x128xf32, #tpu.memory_space<vmem>>, vector<64x128xf32>
    %16 = vector.extract_strided_slice %4 {offsets = [0, 0, 0], sizes = [4, 16, 128], strides = [1, 1, 1]} : vector<4x17x128xbf16> to vector<4x16x128xbf16>
    %17 = vector.shape_cast %16 : vector<4x16x128xbf16> to vector<64x128xbf16>
    %c0_23 = arith.constant 0 : index
    %c0_24 = arith.constant 0 : index
    %c0_25 = arith.constant 0 : index
    %c0_26 = arith.constant 0 : index
    %18 = vector.load %arg6[%c0_23, %c0_24, %c0_25, %c0_26] : memref<3x3x128x128xbf16, #tpu.memory_space<vmem>>, vector<1x1x128x128xbf16>
    %19 = vector.shape_cast %18 : vector<1x1x128x128xbf16> to vector<128x128xbf16>
    %cst = arith.constant dense<0.000000e+00> : vector<64x128xf32>
    %20 = tpu.matmul %17, %19, %cst {dimension_numbers = #tpu.dot_dimension_numbers<[1], [0], [0], [1], [0, 0, 1, 1], [], []>} : vector<64x128xbf16>, vector<128x128xbf16>, vector<64x128xf32> -> vector<64x128xf32>
    %21 = arith.addf %15, %20 : vector<64x128xf32>
    %22 = vector.extract_strided_slice %6 {offsets = [0, 0, 0], sizes = [4, 16, 128], strides = [1, 1, 1]} : vector<4x17x128xbf16> to vector<4x16x128xbf16>
    %23 = vector.shape_cast %22 : vector<4x16x128xbf16> to vector<64x128xbf16>
    %c0_27 = arith.constant 0 : index
    %c1_28 = arith.constant 1 : index
    %c0_29 = arith.constant 0 : index
    %c0_30 = arith.constant 0 : index
    %24 = vector.load %arg6[%c0_27, %c1_28, %c0_29, %c0_30] : memref<3x3x128x128xbf16, #tpu.memory_space<vmem>>, vector<1x1x128x128xbf16>
    %25 = vector.shape_cast %24 : vector<1x1x128x128xbf16> to vector<128x128xbf16>
    %cst_31 = arith.constant dense<0.000000e+00> : vector<64x128xf32>
    %26 = tpu.matmul %23, %25, %cst_31 {dimension_numbers = #tpu.dot_dimension_numbers<[1], [0], [0], [1], [0, 0, 1, 1], [], []>} : vector<64x128xbf16>, vector<128x128xbf16>, vector<64x128xf32> -> vector<64x128xf32>
    %27 = arith.addf %21, %26 : vector<64x128xf32>
    %28 = vector.extract_strided_slice %4 {offsets = [0, 1, 0], sizes = [4, 16, 128], strides = [1, 1, 1]} : vector<4x17x128xbf16> to vector<4x16x128xbf16>
    %29 = vector.shape_cast %28 : vector<4x16x128xbf16> to vector<64x128xbf16>
    %c0_32 = arith.constant 0 : index
    %c2_33 = arith.constant 2 : index
    %c0_34 = arith.constant 0 : index
    %c0_35 = arith.constant 0 : index
    %30 = vector.load %arg6[%c0_32, %c2_33, %c0_34, %c0_35] : memref<3x3x128x128xbf16, #tpu.memory_space<vmem>>, vector<1x1x128x128xbf16>
    %31 = vector.shape_cast %30 : vector<1x1x128x128xbf16> to vector<128x128xbf16>
    %cst_36 = arith.constant dense<0.000000e+00> : vector<64x128xf32>
    %32 = tpu.matmul %29, %31, %cst_36 {dimension_numbers = #tpu.dot_dimension_numbers<[1], [0], [0], [1], [0, 0, 1, 1], [], []>} : vector<64x128xbf16>, vector<128x128xbf16>, vector<64x128xf32> -> vector<64x128xf32>
    %33 = arith.addf %27, %32 : vector<64x128xf32>
    %34 = vector.extract_strided_slice %8 {offsets = [0, 0, 0], sizes = [4, 16, 128], strides = [1, 1, 1]} : vector<4x17x128xbf16> to vector<4x16x128xbf16>
    %35 = vector.shape_cast %34 : vector<4x16x128xbf16> to vector<64x128xbf16>
    %c1_37 = arith.constant 1 : index
    %c0_38 = arith.constant 0 : index
    %c0_39 = arith.constant 0 : index
    %c0_40 = arith.constant 0 : index
    %36 = vector.load %arg6[%c1_37, %c0_38, %c0_39, %c0_40] : memref<3x3x128x128xbf16, #tpu.memory_space<vmem>>, vector<1x1x128x128xbf16>
    %37 = vector.shape_cast %36 : vector<1x1x128x128xbf16> to vector<128x128xbf16>
    %cst_41 = arith.constant dense<0.000000e+00> : vector<64x128xf32>
    %38 = tpu.matmul %35, %37, %cst_41 {dimension_numbers = #tpu.dot_dimension_numbers<[1], [0], [0], [1], [0, 0, 1, 1], [], []>} : vector<64x128xbf16>, vector<128x128xbf16>, vector<64x128xf32> -> vector<64x128xf32>
    %39 = arith.addf %33, %38 : vector<64x128xf32>
    %40 = vector.extract_strided_slice %10 {offsets = [0, 0, 0], sizes = [4, 16, 128], strides = [1, 1, 1]} : vector<4x17x128xbf16> to vector<4x16x128xbf16>
    %41 = vector.shape_cast %40 : vector<4x16x128xbf16> to vector<64x128xbf16>
    %c1_42 = arith.constant 1 : index
    %c1_43 = arith.constant 1 : index
    %c0_44 = arith.constant 0 : index
    %c0_45 = arith.constant 0 : index
    %42 = vector.load %arg6[%c1_42, %c1_43, %c0_44, %c0_45] : memref<3x3x128x128xbf16, #tpu.memory_space<vmem>>, vector<1x1x128x128xbf16>
    %43 = vector.shape_cast %42 : vector<1x1x128x128xbf16> to vector<128x128xbf16>
    %cst_46 = arith.constant dense<0.000000e+00> : vector<64x128xf32>
    %44 = tpu.matmul %41, %43, %cst_46 {dimension_numbers = #tpu.dot_dimension_numbers<[1], [0], [0], [1], [0, 0, 1, 1], [], []>} : vector<64x128xbf16>, vector<128x128xbf16>, vector<64x128xf32> -> vector<64x128xf32>
    %45 = arith.addf %39, %44 : vector<64x128xf32>
    %46 = vector.extract_strided_slice %8 {offsets = [0, 1, 0], sizes = [4, 16, 128], strides = [1, 1, 1]} : vector<4x17x128xbf16> to vector<4x16x128xbf16>
    %47 = vector.shape_cast %46 : vector<4x16x128xbf16> to vector<64x128xbf16>
    %c1_47 = arith.constant 1 : index
    %c2_48 = arith.constant 2 : index
    %c0_49 = arith.constant 0 : index
    %c0_50 = arith.constant 0 : index
    %48 = vector.load %arg6[%c1_47, %c2_48, %c0_49, %c0_50] : memref<3x3x128x128xbf16, #tpu.memory_space<vmem>>, vector<1x1x128x128xbf16>
    %49 = vector.shape_cast %48 : vector<1x1x128x128xbf16> to vector<128x128xbf16>
    %cst_51 = arith.constant dense<0.000000e+00> : vector<64x128xf32>
    %50 = tpu.matmul %47, %49, %cst_51 {dimension_numbers = #tpu.dot_dimension_numbers<[1], [0], [0], [1], [0, 0, 1, 1], [], []>} : vector<64x128xbf16>, vector<128x128xbf16>, vector<64x128xf32> -> vector<64x128xf32>
    %51 = arith.addf %45, %50 : vector<64x128xf32>
    %52 = vector.extract_strided_slice %4 {offsets = [1, 0, 0], sizes = [3, 16, 128], strides = [1, 1, 1]} : vector<4x17x128xbf16> to vector<3x16x128xbf16>
    %53 = vector.extract_strided_slice %12 {offsets = [0, 0, 0], sizes = [1, 16, 128], strides = [1, 1, 1]} : vector<1x17x128xbf16> to vector<1x16x128xbf16>
    %54 = tpu.concatenate %52, %53 in 0 : vector<3x16x128xbf16>, vector<1x16x128xbf16> -> vector<4x16x128xbf16>
    %55 = vector.shape_cast %54 : vector<4x16x128xbf16> to vector<64x128xbf16>
    %c2_52 = arith.constant 2 : index
    %c0_53 = arith.constant 0 : index
    %c0_54 = arith.constant 0 : index
    %c0_55 = arith.constant 0 : index
    %56 = vector.load %arg6[%c2_52, %c0_53, %c0_54, %c0_55] : memref<3x3x128x128xbf16, #tpu.memory_space<vmem>>, vector<1x1x128x128xbf16>
    %57 = vector.shape_cast %56 : vector<1x1x128x128xbf16> to vector<128x128xbf16>
    %cst_56 = arith.constant dense<0.000000e+00> : vector<64x128xf32>
    %58 = tpu.matmul %55, %57, %cst_56 {dimension_numbers = #tpu.dot_dimension_numbers<[1], [0], [0], [1], [0, 0, 1, 1], [], []>} : vector<64x128xbf16>, vector<128x128xbf16>, vector<64x128xf32> -> vector<64x128xf32>
    %59 = arith.addf %51, %58 : vector<64x128xf32>
    %60 = vector.extract_strided_slice %6 {offsets = [1, 0, 0], sizes = [3, 16, 128], strides = [1, 1, 1]} : vector<4x17x128xbf16> to vector<3x16x128xbf16>
    %61 = vector.extract_strided_slice %14 {offsets = [0, 0, 0], sizes = [1, 16, 128], strides = [1, 1, 1]} : vector<1x17x128xbf16> to vector<1x16x128xbf16>
    %62 = tpu.concatenate %60, %61 in 0 : vector<3x16x128xbf16>, vector<1x16x128xbf16> -> vector<4x16x128xbf16>
    %63 = vector.shape_cast %62 : vector<4x16x128xbf16> to vector<64x128xbf16>
    %c2_57 = arith.constant 2 : index
    %c1_58 = arith.constant 1 : index
    %c0_59 = arith.constant 0 : index
    %c0_60 = arith.constant 0 : index
    %64 = vector.load %arg6[%c2_57, %c1_58, %c0_59, %c0_60] : memref<3x3x128x128xbf16, #tpu.memory_space<vmem>>, vector<1x1x128x128xbf16>
    %65 = vector.shape_cast %64 : vector<1x1x128x128xbf16> to vector<128x128xbf16>
    %cst_61 = arith.constant dense<0.000000e+00> : vector<64x128xf32>
    %66 = tpu.matmul %63, %65, %cst_61 {dimension_numbers = #tpu.dot_dimension_numbers<[1], [0], [0], [1], [0, 0, 1, 1], [], []>} : vector<64x128xbf16>, vector<128x128xbf16>, vector<64x128xf32> -> vector<64x128xf32>
    %67 = arith.addf %59, %66 : vector<64x128xf32>
    %68 = vector.extract_strided_slice %4 {offsets = [1, 1, 0], sizes = [3, 16, 128], strides = [1, 1, 1]} : vector<4x17x128xbf16> to vector<3x16x128xbf16>
    %69 = vector.extract_strided_slice %12 {offsets = [0, 1, 0], sizes = [1, 16, 128], strides = [1, 1, 1]} : vector<1x17x128xbf16> to vector<1x16x128xbf16>
    %70 = tpu.concatenate %68, %69 in 0 : vector<3x16x128xbf16>, vector<1x16x128xbf16> -> vector<4x16x128xbf16>
    %71 = vector.shape_cast %70 : vector<4x16x128xbf16> to vector<64x128xbf16>
    %c2_62 = arith.constant 2 : index
    %c2_63 = arith.constant 2 : index
    %c0_64 = arith.constant 0 : index
    %c0_65 = arith.constant 0 : index
    %72 = vector.load %arg6[%c2_62, %c2_63, %c0_64, %c0_65] : memref<3x3x128x128xbf16, #tpu.memory_space<vmem>>, vector<1x1x128x128xbf16>
    %73 = vector.shape_cast %72 : vector<1x1x128x128xbf16> to vector<128x128xbf16>
    %cst_66 = arith.constant dense<0.000000e+00> : vector<64x128xf32>
    %74 = tpu.matmul %71, %73, %cst_66 {dimension_numbers = #tpu.dot_dimension_numbers<[1], [0], [0], [1], [0, 0, 1, 1], [], []>} : vector<64x128xbf16>, vector<128x128xbf16>, vector<64x128xf32> -> vector<64x128xf32>
    %75 = arith.addf %67, %74 : vector<64x128xf32>
    %c0_67 = arith.constant 0 : index
    %c0_68 = arith.constant 0 : index
    %76 = vector.load %arg9[%c0_67, %c0_68] : memref<64x128xf32, #tpu.memory_space<vmem>>, vector<64x128xf32>
    tpu.vector_store %arg9[%c0_67, %c0_68], %75 {strides = array<i32>} : memref<64x128xf32, #tpu.memory_space<vmem>>, vector<64x128xf32>,
    %c0_i32_69 = arith.constant 0 : i32
    %77 = arith.cmpi eq, %arg3, %c0_i32_69 : i32
    %78 = arith.extui %77 : i1 to i32
    %c0_i32_70 = arith.constant 0 : i32
    %79 = arith.cmpi ne, %78, %c0_i32_70 : i32
    scf.if %79 {
      %c0_71 = arith.constant 0 : index
      %c0_72 = arith.constant 0 : index
      %80 = vector.load %arg7[%c0_71, %c0_72] : memref<1x128xf32, #tpu.memory_space<vmem>>, vector<1x128xf32>
      %81 = vector.broadcast %80 : vector<1x128xf32> to vector<64x128xf32>
      %82 = arith.addf %75, %81 : vector<64x128xf32>
      %cst_73 = arith.constant 0.000000e+00 : f32
      %83 = vector.broadcast %cst_73 : f32 to vector<64x128xf32>
      %84 = arith.maximumf %82, %83 : vector<64x128xf32>
      %85 = arith.truncf %84 : vector<64x128xf32> to vector<64x128xbf16>
      %c0_74 = arith.constant 0 : index
      %c0_75 = arith.constant 0 : index
      %86 = vector.load %arg8[%c0_74, %c0_75] : memref<64x128xbf16, #tpu.memory_space<vmem>>, vector<64x128xbf16>
      tpu.vector_store %arg8[%c0_74, %c0_75], %85 {strides = array<i32>} : memref<64x128xbf16, #tpu.memory_space<vmem>>, vector<64x128xbf16>,
    } else {
    }
    return
  }
  func.func @transform_0(%arg0: i32, %arg1: i32, %arg2: i32, %arg3: i32) -> (i32, i32, i32, i32) {
    %c0_i32 = arith.constant 0 : i32
    %c0_i32_0 = arith.constant 0 : i32
    return %arg1, %arg2, %c0_i32, %arg3 : i32, i32, i32, i32
  }
  func.func @transform_1(%arg0: i32, %arg1: i32, %arg2: i32, %arg3: i32) -> (i32, i32, i32, i32) {
    %c1_i32 = arith.constant 1 : i32
    %0 = arith.addi %arg2, %c1_i32 : i32
    %c4_i32 = arith.constant 4 : i32
    %1 = arith.muli %0, %c4_i32 : i32
    %c0_i32 = arith.constant 0 : i32
    %c0_i32_0 = arith.constant 0 : i32
    return %arg1, %1, %c0_i32, %arg3 : i32, i32, i32, i32
  }
  func.func @transform_2(%arg0: i32, %arg1: i32, %arg2: i32, %arg3: i32) -> (i32, i32, i32, i32) {
    %c0_i32 = arith.constant 0 : i32
    %c0_i32_0 = arith.constant 0 : i32
    %c0_i32_1 = arith.constant 0 : i32
    return %c0_i32, %c0_i32_0, %arg3, %arg0 : i32, i32, i32, i32
  }
  func.func @transform_3(%arg0: i32, %arg1: i32, %arg2: i32, %arg3: i32) -> (i32, i32) {
    %c0_i32 = arith.constant 0 : i32
    %c0_i32_0 = arith.constant 0 : i32
    return %c0_i32, %arg0 : i32, i32
  }
  func.func @transform_4(%arg0: i32, %arg1: i32, %arg2: i32, %arg3: i32) -> (i32, i32) {
    %c1_i32 = arith.constant 1 : i32
    %0 = arith.muli %arg1, %c1_i32 : i32
    %1 = arith.addi %0, %arg2 : i32
    %c0_i32 = arith.constant 0 : i32
    return %1, %arg0 : i32, i32
  }
}

module attributes {stable_mosaic.version = 11 : i64} {
  func.func @_conv3x3s2_kernel(%arg0: i32, %arg1: i32, %arg2: i32, %arg3: i32, %arg4: memref<4x2x17x128xbf16, #tpu.memory_space<vmem>>, %arg5: memref<4x1x17x128xbf16, #tpu.memory_space<vmem>>, %arg6: memref<3x3x128x128xbf16, #tpu.memory_space<vmem>>, %arg7: memref<1x128xf32, #tpu.memory_space<vmem>>, %arg8: memref<32x128xbf16, #tpu.memory_space<vmem>>, %arg9: memref<32x128xf32, #tpu.memory_space<vmem>>) attributes {dimension_semantics = [#tpu.dimension_semantics<parallel>, #tpu.dimension_semantics<parallel>, #tpu.dimension_semantics<parallel>, #tpu.dimension_semantics<arbitrary>], iteration_bounds = array<i64: 1, 2, 1, 1>, scalar_prefetch = 0 : i64, scratch_operands = 1 : i64, tpu.core_type = #tpu.core_type<tc>, window_params = [{transform_indices = @transform_0, window_bounds = array<i64: 4, 2, 17, 128>}, {transform_indices = @transform_1, window_bounds = array<i64: 4, 1, 17, 128>}, {transform_indices = @transform_2, window_bounds = array<i64: 3, 3, 128, 128>}, {transform_indices = @transform_3, window_bounds = array<i64: 1, 128>}, {transform_indices = @transform_4, window_bounds = array<i64: 32, 128>}]} {
    %c0_i32 = arith.constant 0 : i32
    %0 = arith.cmpi eq, %arg3, %c0_i32 : i32
    %1 = arith.extui %0 : i1 to i32
    %c0_i32_0 = arith.constant 0 : i32
    %2 = arith.cmpi ne, %1, %c0_i32_0 : i32
    scf.if %2 {
      %cst_71 = arith.constant 0.000000e+00 : f32
      %80 = vector.broadcast %cst_71 : f32 to vector<32x128xf32>
      %c0_72 = arith.constant 0 : index
      %c0_73 = arith.constant 0 : index
      %81 = vector.load %arg9[%c0_72, %c0_73] : memref<32x128xf32, #tpu.memory_space<vmem>>, vector<32x128xf32>
      tpu.vector_store %arg9[%c0_72, %c0_73], %80 {strides = array<i32>} : memref<32x128xf32, #tpu.memory_space<vmem>>, vector<32x128xf32>,
    } else {
    }
    %c0 = arith.constant 0 : index
    %c0_1 = arith.constant 0 : index
    %c0_2 = arith.constant 0 : index
    %c0_3 = arith.constant 0 : index
    %3 = vector.load %arg4[%c0, %c0_1, %c0_2, %c0_3] : memref<4x2x17x128xbf16, #tpu.memory_space<vmem>>, vector<1x2x17x128xbf16>
    %4 = vector.shape_cast %3 : vector<1x2x17x128xbf16> to vector<2x17x128xbf16>
    %c1 = arith.constant 1 : index
    %c0_4 = arith.constant 0 : index
    %c0_5 = arith.constant 0 : index
    %c0_6 = arith.constant 0 : index
    %5 = vector.load %arg4[%c1, %c0_4, %c0_5, %c0_6] : memref<4x2x17x128xbf16, #tpu.memory_space<vmem>>, vector<1x2x17x128xbf16>
    %6 = vector.shape_cast %5 : vector<1x2x17x128xbf16> to vector<2x17x128xbf16>
    %c2 = arith.constant 2 : index
    %c0_7 = arith.constant 0 : index
    %c0_8 = arith.constant 0 : index
    %c0_9 = arith.constant 0 : index
    %7 = vector.load %arg4[%c2, %c0_7, %c0_8, %c0_9] : memref<4x2x17x128xbf16, #tpu.memory_space<vmem>>, vector<1x2x17x128xbf16>
    %8 = vector.shape_cast %7 : vector<1x2x17x128xbf16> to vector<2x17x128xbf16>
    %c3 = arith.constant 3 : index
    %c0_10 = arith.constant 0 : index
    %c0_11 = arith.constant 0 : index
    %c0_12 = arith.constant 0 : index
    %9 = vector.load %arg4[%c3, %c0_10, %c0_11, %c0_12] : memref<4x2x17x128xbf16, #tpu.memory_space<vmem>>, vector<1x2x17x128xbf16>
    %10 = vector.shape_cast %9 : vector<1x2x17x128xbf16> to vector<2x17x128xbf16>
    %c0_13 = arith.constant 0 : index
    %c0_14 = arith.constant 0 : index
    %c0_15 = arith.constant 0 : index
    %c0_16 = arith.constant 0 : index
    %11 = vector.load %arg5[%c0_13, %c0_14, %c0_15, %c0_16] : memref<4x1x17x128xbf16, #tpu.memory_space<vmem>>, vector<1x1x17x128xbf16>
    %12 = vector.shape_cast %11 : vector<1x1x17x128xbf16> to vector<1x17x128xbf16>
    %c1_17 = arith.constant 1 : index
    %c0_18 = arith.constant 0 : index
    %c0_19 = arith.constant 0 : index
    %c0_20 = arith.constant 0 : index
    %13 = vector.load %arg5[%c1_17, %c0_18, %c0_19, %c0_20] : memref<4x1x17x128xbf16, #tpu.memory_space<vmem>>, vector<1x1x17x128xbf16>
    %14 = vector.shape_cast %13 : vector<1x1x17x128xbf16> to vector<1x17x128xbf16>
    %c0_21 = arith.constant 0 : index
    %c0_22 = arith.constant 0 : index
    %15 = vector.load %arg9[%c0_21, %c0_22] : memref<32x128xf32, #tpu.memory_space<vmem>>, vector<32x128xf32>
    %16 = vector.extract_strided_slice %4 {offsets = [0, 0, 0], sizes = [2, 16, 128], strides = [1, 1, 1]} : vector<2x17x128xbf16> to vector<2x16x128xbf16>
    %17 = vector.shape_cast %16 : vector<2x16x128xbf16> to vector<32x128xbf16>
    %c0_23 = arith.constant 0 : index
    %c0_24 = arith.constant 0 : index
    %c0_25 = arith.constant 0 : index
    %c0_26 = arith.constant 0 : index
    %18 = vector.load %arg6[%c0_23, %c0_24, %c0_25, %c0_26] : memref<3x3x128x128xbf16, #tpu.memory_space<vmem>>, vector<1x1x128x128xbf16>
    %19 = vector.shape_cast %18 : vector<1x1x128x128xbf16> to vector<128x128xbf16>
    %cst = arith.constant dense<0.000000e+00> : vector<32x128xf32>
    %20 = tpu.matmul %17, %19, %cst {dimension_numbers = #tpu.dot_dimension_numbers<[1], [0], [0], [1], [0, 0, 1, 1], [], []>} : vector<32x128xbf16>, vector<128x128xbf16>, vector<32x128xf32> -> vector<32x128xf32>
    %21 = arith.addf %15, %20 : vector<32x128xf32>
    %22 = vector.extract_strided_slice %6 {offsets = [0, 0, 0], sizes = [2, 16, 128], strides = [1, 1, 1]} : vector<2x17x128xbf16> to vector<2x16x128xbf16>
    %23 = vector.shape_cast %22 : vector<2x16x128xbf16> to vector<32x128xbf16>
    %c0_27 = arith.constant 0 : index
    %c1_28 = arith.constant 1 : index
    %c0_29 = arith.constant 0 : index
    %c0_30 = arith.constant 0 : index
    %24 = vector.load %arg6[%c0_27, %c1_28, %c0_29, %c0_30] : memref<3x3x128x128xbf16, #tpu.memory_space<vmem>>, vector<1x1x128x128xbf16>
    %25 = vector.shape_cast %24 : vector<1x1x128x128xbf16> to vector<128x128xbf16>
    %cst_31 = arith.constant dense<0.000000e+00> : vector<32x128xf32>
    %26 = tpu.matmul %23, %25, %cst_31 {dimension_numbers = #tpu.dot_dimension_numbers<[1], [0], [0], [1], [0, 0, 1, 1], [], []>} : vector<32x128xbf16>, vector<128x128xbf16>, vector<32x128xf32> -> vector<32x128xf32>
    %27 = arith.addf %21, %26 : vector<32x128xf32>
    %28 = vector.extract_strided_slice %4 {offsets = [0, 1, 0], sizes = [2, 16, 128], strides = [1, 1, 1]} : vector<2x17x128xbf16> to vector<2x16x128xbf16>
    %29 = vector.shape_cast %28 : vector<2x16x128xbf16> to vector<32x128xbf16>
    %c0_32 = arith.constant 0 : index
    %c2_33 = arith.constant 2 : index
    %c0_34 = arith.constant 0 : index
    %c0_35 = arith.constant 0 : index
    %30 = vector.load %arg6[%c0_32, %c2_33, %c0_34, %c0_35] : memref<3x3x128x128xbf16, #tpu.memory_space<vmem>>, vector<1x1x128x128xbf16>
    %31 = vector.shape_cast %30 : vector<1x1x128x128xbf16> to vector<128x128xbf16>
    %cst_36 = arith.constant dense<0.000000e+00> : vector<32x128xf32>
    %32 = tpu.matmul %29, %31, %cst_36 {dimension_numbers = #tpu.dot_dimension_numbers<[1], [0], [0], [1], [0, 0, 1, 1], [], []>} : vector<32x128xbf16>, vector<128x128xbf16>, vector<32x128xf32> -> vector<32x128xf32>
    %33 = arith.addf %27, %32 : vector<32x128xf32>
    %34 = vector.extract_strided_slice %8 {offsets = [0, 0, 0], sizes = [2, 16, 128], strides = [1, 1, 1]} : vector<2x17x128xbf16> to vector<2x16x128xbf16>
    %35 = vector.shape_cast %34 : vector<2x16x128xbf16> to vector<32x128xbf16>
    %c1_37 = arith.constant 1 : index
    %c0_38 = arith.constant 0 : index
    %c0_39 = arith.constant 0 : index
    %c0_40 = arith.constant 0 : index
    %36 = vector.load %arg6[%c1_37, %c0_38, %c0_39, %c0_40] : memref<3x3x128x128xbf16, #tpu.memory_space<vmem>>, vector<1x1x128x128xbf16>
    %37 = vector.shape_cast %36 : vector<1x1x128x128xbf16> to vector<128x128xbf16>
    %cst_41 = arith.constant dense<0.000000e+00> : vector<32x128xf32>
    %38 = tpu.matmul %35, %37, %cst_41 {dimension_numbers = #tpu.dot_dimension_numbers<[1], [0], [0], [1], [0, 0, 1, 1], [], []>} : vector<32x128xbf16>, vector<128x128xbf16>, vector<32x128xf32> -> vector<32x128xf32>
    %39 = arith.addf %33, %38 : vector<32x128xf32>
    %40 = vector.extract_strided_slice %10 {offsets = [0, 0, 0], sizes = [2, 16, 128], strides = [1, 1, 1]} : vector<2x17x128xbf16> to vector<2x16x128xbf16>
    %41 = vector.shape_cast %40 : vector<2x16x128xbf16> to vector<32x128xbf16>
    %c1_42 = arith.constant 1 : index
    %c1_43 = arith.constant 1 : index
    %c0_44 = arith.constant 0 : index
    %c0_45 = arith.constant 0 : index
    %42 = vector.load %arg6[%c1_42, %c1_43, %c0_44, %c0_45] : memref<3x3x128x128xbf16, #tpu.memory_space<vmem>>, vector<1x1x128x128xbf16>
    %43 = vector.shape_cast %42 : vector<1x1x128x128xbf16> to vector<128x128xbf16>
    %cst_46 = arith.constant dense<0.000000e+00> : vector<32x128xf32>
    %44 = tpu.matmul %41, %43, %cst_46 {dimension_numbers = #tpu.dot_dimension_numbers<[1], [0], [0], [1], [0, 0, 1, 1], [], []>} : vector<32x128xbf16>, vector<128x128xbf16>, vector<32x128xf32> -> vector<32x128xf32>
    %45 = arith.addf %39, %44 : vector<32x128xf32>
    %46 = vector.extract_strided_slice %8 {offsets = [0, 1, 0], sizes = [2, 16, 128], strides = [1, 1, 1]} : vector<2x17x128xbf16> to vector<2x16x128xbf16>
    %47 = vector.shape_cast %46 : vector<2x16x128xbf16> to vector<32x128xbf16>
    %c1_47 = arith.constant 1 : index
    %c2_48 = arith.constant 2 : index
    %c0_49 = arith.constant 0 : index
    %c0_50 = arith.constant 0 : index
    %48 = vector.load %arg6[%c1_47, %c2_48, %c0_49, %c0_50] : memref<3x3x128x128xbf16, #tpu.memory_space<vmem>>, vector<1x1x128x128xbf16>
    %49 = vector.shape_cast %48 : vector<1x1x128x128xbf16> to vector<128x128xbf16>
    %cst_51 = arith.constant dense<0.000000e+00> : vector<32x128xf32>
    %50 = tpu.matmul %47, %49, %cst_51 {dimension_numbers = #tpu.dot_dimension_numbers<[1], [0], [0], [1], [0, 0, 1, 1], [], []>} : vector<32x128xbf16>, vector<128x128xbf16>, vector<32x128xf32> -> vector<32x128xf32>
    %51 = arith.addf %45, %50 : vector<32x128xf32>
    %52 = vector.extract_strided_slice %4 {offsets = [1, 0, 0], sizes = [1, 16, 128], strides = [1, 1, 1]} : vector<2x17x128xbf16> to vector<1x16x128xbf16>
    %53 = vector.extract_strided_slice %12 {offsets = [0, 0, 0], sizes = [1, 16, 128], strides = [1, 1, 1]} : vector<1x17x128xbf16> to vector<1x16x128xbf16>
    %54 = tpu.concatenate %52, %53 in 0 : vector<1x16x128xbf16>, vector<1x16x128xbf16> -> vector<2x16x128xbf16>
    %55 = vector.shape_cast %54 : vector<2x16x128xbf16> to vector<32x128xbf16>
    %c2_52 = arith.constant 2 : index
    %c0_53 = arith.constant 0 : index
    %c0_54 = arith.constant 0 : index
    %c0_55 = arith.constant 0 : index
    %56 = vector.load %arg6[%c2_52, %c0_53, %c0_54, %c0_55] : memref<3x3x128x128xbf16, #tpu.memory_space<vmem>>, vector<1x1x128x128xbf16>
    %57 = vector.shape_cast %56 : vector<1x1x128x128xbf16> to vector<128x128xbf16>
    %cst_56 = arith.constant dense<0.000000e+00> : vector<32x128xf32>
    %58 = tpu.matmul %55, %57, %cst_56 {dimension_numbers = #tpu.dot_dimension_numbers<[1], [0], [0], [1], [0, 0, 1, 1], [], []>} : vector<32x128xbf16>, vector<128x128xbf16>, vector<32x128xf32> -> vector<32x128xf32>
    %59 = arith.addf %51, %58 : vector<32x128xf32>
    %60 = vector.extract_strided_slice %6 {offsets = [1, 0, 0], sizes = [1, 16, 128], strides = [1, 1, 1]} : vector<2x17x128xbf16> to vector<1x16x128xbf16>
    %61 = vector.extract_strided_slice %14 {offsets = [0, 0, 0], sizes = [1, 16, 128], strides = [1, 1, 1]} : vector<1x17x128xbf16> to vector<1x16x128xbf16>
    %62 = tpu.concatenate %60, %61 in 0 : vector<1x16x128xbf16>, vector<1x16x128xbf16> -> vector<2x16x128xbf16>
    %63 = vector.shape_cast %62 : vector<2x16x128xbf16> to vector<32x128xbf16>
    %c2_57 = arith.constant 2 : index
    %c1_58 = arith.constant 1 : index
    %c0_59 = arith.constant 0 : index
    %c0_60 = arith.constant 0 : index
    %64 = vector.load %arg6[%c2_57, %c1_58, %c0_59, %c0_60] : memref<3x3x128x128xbf16, #tpu.memory_space<vmem>>, vector<1x1x128x128xbf16>
    %65 = vector.shape_cast %64 : vector<1x1x128x128xbf16> to vector<128x128xbf16>
    %cst_61 = arith.constant dense<0.000000e+00> : vector<32x128xf32>
    %66 = tpu.matmul %63, %65, %cst_61 {dimension_numbers = #tpu.dot_dimension_numbers<[1], [0], [0], [1], [0, 0, 1, 1], [], []>} : vector<32x128xbf16>, vector<128x128xbf16>, vector<32x128xf32> -> vector<32x128xf32>
    %67 = arith.addf %59, %66 : vector<32x128xf32>
    %68 = vector.extract_strided_slice %4 {offsets = [1, 1, 0], sizes = [1, 16, 128], strides = [1, 1, 1]} : vector<2x17x128xbf16> to vector<1x16x128xbf16>
    %69 = vector.extract_strided_slice %12 {offsets = [0, 1, 0], sizes = [1, 16, 128], strides = [1, 1, 1]} : vector<1x17x128xbf16> to vector<1x16x128xbf16>
    %70 = tpu.concatenate %68, %69 in 0 : vector<1x16x128xbf16>, vector<1x16x128xbf16> -> vector<2x16x128xbf16>
    %71 = vector.shape_cast %70 : vector<2x16x128xbf16> to vector<32x128xbf16>
    %c2_62 = arith.constant 2 : index
    %c2_63 = arith.constant 2 : index
    %c0_64 = arith.constant 0 : index
    %c0_65 = arith.constant 0 : index
    %72 = vector.load %arg6[%c2_62, %c2_63, %c0_64, %c0_65] : memref<3x3x128x128xbf16, #tpu.memory_space<vmem>>, vector<1x1x128x128xbf16>
    %73 = vector.shape_cast %72 : vector<1x1x128x128xbf16> to vector<128x128xbf16>
    %cst_66 = arith.constant dense<0.000000e+00> : vector<32x128xf32>
    %74 = tpu.matmul %71, %73, %cst_66 {dimension_numbers = #tpu.dot_dimension_numbers<[1], [0], [0], [1], [0, 0, 1, 1], [], []>} : vector<32x128xbf16>, vector<128x128xbf16>, vector<32x128xf32> -> vector<32x128xf32>
    %75 = arith.addf %67, %74 : vector<32x128xf32>
    %c0_67 = arith.constant 0 : index
    %c0_68 = arith.constant 0 : index
    %76 = vector.load %arg9[%c0_67, %c0_68] : memref<32x128xf32, #tpu.memory_space<vmem>>, vector<32x128xf32>
    tpu.vector_store %arg9[%c0_67, %c0_68], %75 {strides = array<i32>} : memref<32x128xf32, #tpu.memory_space<vmem>>, vector<32x128xf32>,
    %c0_i32_69 = arith.constant 0 : i32
    %77 = arith.cmpi eq, %arg3, %c0_i32_69 : i32
    %78 = arith.extui %77 : i1 to i32
    %c0_i32_70 = arith.constant 0 : i32
    %79 = arith.cmpi ne, %78, %c0_i32_70 : i32
    scf.if %79 {
      %c0_71 = arith.constant 0 : index
      %c0_72 = arith.constant 0 : index
      %80 = vector.load %arg7[%c0_71, %c0_72] : memref<1x128xf32, #tpu.memory_space<vmem>>, vector<1x128xf32>
      %81 = vector.broadcast %80 : vector<1x128xf32> to vector<32x128xf32>
      %82 = arith.addf %75, %81 : vector<32x128xf32>
      %cst_73 = arith.constant 0.000000e+00 : f32
      %83 = vector.broadcast %cst_73 : f32 to vector<32x128xf32>
      %84 = arith.maximumf %82, %83 : vector<32x128xf32>
      %85 = arith.truncf %84 : vector<32x128xf32> to vector<32x128xbf16>
      %c0_74 = arith.constant 0 : index
      %c0_75 = arith.constant 0 : index
      %86 = vector.load %arg8[%c0_74, %c0_75] : memref<32x128xbf16, #tpu.memory_space<vmem>>, vector<32x128xbf16>
      tpu.vector_store %arg8[%c0_74, %c0_75], %85 {strides = array<i32>} : memref<32x128xbf16, #tpu.memory_space<vmem>>, vector<32x128xbf16>,
    } else {
    }
    return
  }
  func.func @transform_0(%arg0: i32, %arg1: i32, %arg2: i32, %arg3: i32) -> (i32, i32, i32, i32) {
    %c0_i32 = arith.constant 0 : i32
    %c0_i32_0 = arith.constant 0 : i32
    return %arg1, %arg2, %c0_i32, %arg3 : i32, i32, i32, i32
  }
  func.func @transform_1(%arg0: i32, %arg1: i32, %arg2: i32, %arg3: i32) -> (i32, i32, i32, i32) {
    %c1_i32 = arith.constant 1 : i32
    %0 = arith.addi %arg2, %c1_i32 : i32
    %c2_i32 = arith.constant 2 : i32
    %1 = arith.muli %0, %c2_i32 : i32
    %c0_i32 = arith.constant 0 : i32
    %c0_i32_0 = arith.constant 0 : i32
    return %arg1, %1, %c0_i32, %arg3 : i32, i32, i32, i32
  }
  func.func @transform_2(%arg0: i32, %arg1: i32, %arg2: i32, %arg3: i32) -> (i32, i32, i32, i32) {
    %c0_i32 = arith.constant 0 : i32
    %c0_i32_0 = arith.constant 0 : i32
    %c0_i32_1 = arith.constant 0 : i32
    return %c0_i32, %c0_i32_0, %arg3, %arg0 : i32, i32, i32, i32
  }
  func.func @transform_3(%arg0: i32, %arg1: i32, %arg2: i32, %arg3: i32) -> (i32, i32) {
    %c0_i32 = arith.constant 0 : i32
    %c0_i32_0 = arith.constant 0 : i32
    return %c0_i32, %arg0 : i32, i32
  }
  func.func @transform_4(%arg0: i32, %arg1: i32, %arg2: i32, %arg3: i32) -> (i32, i32) {
    %c1_i32 = arith.constant 1 : i32
    %0 = arith.muli %arg1, %c1_i32 : i32
    %1 = arith.addi %0, %arg2 : i32
    %c0_i32 = arith.constant 0 : i32
    return %1, %arg0 : i32, i32
  }
}

module attributes {stable_mosaic.version = 11 : i64} {
  func.func @_conv3x3s2_kernel(%arg0: i32, %arg1: i32, %arg2: i32, %arg3: i32, %arg4: memref<4x1x17x128xbf16, #tpu.memory_space<vmem>>, %arg5: memref<4x1x17x128xbf16, #tpu.memory_space<vmem>>, %arg6: memref<3x3x128x128xbf16, #tpu.memory_space<vmem>>, %arg7: memref<1x128xf32, #tpu.memory_space<vmem>>, %arg8: memref<16x128xbf16, #tpu.memory_space<vmem>>, %arg9: memref<16x128xf32, #tpu.memory_space<vmem>>) attributes {dimension_semantics = [#tpu.dimension_semantics<parallel>, #tpu.dimension_semantics<parallel>, #tpu.dimension_semantics<parallel>, #tpu.dimension_semantics<arbitrary>], iteration_bounds = array<i64: 1, 2, 1, 1>, scalar_prefetch = 0 : i64, scratch_operands = 1 : i64, tpu.core_type = #tpu.core_type<tc>, window_params = [{transform_indices = @transform_0, window_bounds = array<i64: 4, 1, 17, 128>}, {transform_indices = @transform_1, window_bounds = array<i64: 4, 1, 17, 128>}, {transform_indices = @transform_2, window_bounds = array<i64: 3, 3, 128, 128>}, {transform_indices = @transform_3, window_bounds = array<i64: 1, 128>}, {transform_indices = @transform_4, window_bounds = array<i64: 16, 128>}]} {
    %c0_i32 = arith.constant 0 : i32
    %0 = arith.cmpi eq, %arg3, %c0_i32 : i32
    %1 = arith.extui %0 : i1 to i32
    %c0_i32_0 = arith.constant 0 : i32
    %2 = arith.cmpi ne, %1, %c0_i32_0 : i32
    scf.if %2 {
      %cst_71 = arith.constant 0.000000e+00 : f32
      %74 = vector.broadcast %cst_71 : f32 to vector<16x128xf32>
      %c0_72 = arith.constant 0 : index
      %c0_73 = arith.constant 0 : index
      %75 = vector.load %arg9[%c0_72, %c0_73] : memref<16x128xf32, #tpu.memory_space<vmem>>, vector<16x128xf32>
      tpu.vector_store %arg9[%c0_72, %c0_73], %74 {strides = array<i32>} : memref<16x128xf32, #tpu.memory_space<vmem>>, vector<16x128xf32>,
    } else {
    }
    %c0 = arith.constant 0 : index
    %c0_1 = arith.constant 0 : index
    %c0_2 = arith.constant 0 : index
    %c0_3 = arith.constant 0 : index
    %3 = vector.load %arg4[%c0, %c0_1, %c0_2, %c0_3] : memref<4x1x17x128xbf16, #tpu.memory_space<vmem>>, vector<1x1x17x128xbf16>
    %4 = vector.shape_cast %3 : vector<1x1x17x128xbf16> to vector<1x17x128xbf16>
    %c1 = arith.constant 1 : index
    %c0_4 = arith.constant 0 : index
    %c0_5 = arith.constant 0 : index
    %c0_6 = arith.constant 0 : index
    %5 = vector.load %arg4[%c1, %c0_4, %c0_5, %c0_6] : memref<4x1x17x128xbf16, #tpu.memory_space<vmem>>, vector<1x1x17x128xbf16>
    %6 = vector.shape_cast %5 : vector<1x1x17x128xbf16> to vector<1x17x128xbf16>
    %c2 = arith.constant 2 : index
    %c0_7 = arith.constant 0 : index
    %c0_8 = arith.constant 0 : index
    %c0_9 = arith.constant 0 : index
    %7 = vector.load %arg4[%c2, %c0_7, %c0_8, %c0_9] : memref<4x1x17x128xbf16, #tpu.memory_space<vmem>>, vector<1x1x17x128xbf16>
    %8 = vector.shape_cast %7 : vector<1x1x17x128xbf16> to vector<1x17x128xbf16>
    %c3 = arith.constant 3 : index
    %c0_10 = arith.constant 0 : index
    %c0_11 = arith.constant 0 : index
    %c0_12 = arith.constant 0 : index
    %9 = vector.load %arg4[%c3, %c0_10, %c0_11, %c0_12] : memref<4x1x17x128xbf16, #tpu.memory_space<vmem>>, vector<1x1x17x128xbf16>
    %10 = vector.shape_cast %9 : vector<1x1x17x128xbf16> to vector<1x17x128xbf16>
    %c0_13 = arith.constant 0 : index
    %c0_14 = arith.constant 0 : index
    %c0_15 = arith.constant 0 : index
    %c0_16 = arith.constant 0 : index
    %11 = vector.load %arg5[%c0_13, %c0_14, %c0_15, %c0_16] : memref<4x1x17x128xbf16, #tpu.memory_space<vmem>>, vector<1x1x17x128xbf16>
    %12 = vector.shape_cast %11 : vector<1x1x17x128xbf16> to vector<1x17x128xbf16>
    %c1_17 = arith.constant 1 : index
    %c0_18 = arith.constant 0 : index
    %c0_19 = arith.constant 0 : index
    %c0_20 = arith.constant 0 : index
    %13 = vector.load %arg5[%c1_17, %c0_18, %c0_19, %c0_20] : memref<4x1x17x128xbf16, #tpu.memory_space<vmem>>, vector<1x1x17x128xbf16>
    %14 = vector.shape_cast %13 : vector<1x1x17x128xbf16> to vector<1x17x128xbf16>
    %c0_21 = arith.constant 0 : index
    %c0_22 = arith.constant 0 : index
    %15 = vector.load %arg9[%c0_21, %c0_22] : memref<16x128xf32, #tpu.memory_space<vmem>>, vector<16x128xf32>
    %16 = vector.extract_strided_slice %4 {offsets = [0, 0, 0], sizes = [1, 16, 128], strides = [1, 1, 1]} : vector<1x17x128xbf16> to vector<1x16x128xbf16>
    %17 = vector.shape_cast %16 : vector<1x16x128xbf16> to vector<16x128xbf16>
    %c0_23 = arith.constant 0 : index
    %c0_24 = arith.constant 0 : index
    %c0_25 = arith.constant 0 : index
    %c0_26 = arith.constant 0 : index
    %18 = vector.load %arg6[%c0_23, %c0_24, %c0_25, %c0_26] : memref<3x3x128x128xbf16, #tpu.memory_space<vmem>>, vector<1x1x128x128xbf16>
    %19 = vector.shape_cast %18 : vector<1x1x128x128xbf16> to vector<128x128xbf16>
    %cst = arith.constant dense<0.000000e+00> : vector<16x128xf32>
    %20 = tpu.matmul %17, %19, %cst {dimension_numbers = #tpu.dot_dimension_numbers<[1], [0], [0], [1], [0, 0, 1, 1], [], []>} : vector<16x128xbf16>, vector<128x128xbf16>, vector<16x128xf32> -> vector<16x128xf32>
    %21 = arith.addf %15, %20 : vector<16x128xf32>
    %22 = vector.extract_strided_slice %6 {offsets = [0, 0, 0], sizes = [1, 16, 128], strides = [1, 1, 1]} : vector<1x17x128xbf16> to vector<1x16x128xbf16>
    %23 = vector.shape_cast %22 : vector<1x16x128xbf16> to vector<16x128xbf16>
    %c0_27 = arith.constant 0 : index
    %c1_28 = arith.constant 1 : index
    %c0_29 = arith.constant 0 : index
    %c0_30 = arith.constant 0 : index
    %24 = vector.load %arg6[%c0_27, %c1_28, %c0_29, %c0_30] : memref<3x3x128x128xbf16, #tpu.memory_space<vmem>>, vector<1x1x128x128xbf16>
    %25 = vector.shape_cast %24 : vector<1x1x128x128xbf16> to vector<128x128xbf16>
    %cst_31 = arith.constant dense<0.000000e+00> : vector<16x128xf32>
    %26 = tpu.matmul %23, %25, %cst_31 {dimension_numbers = #tpu.dot_dimension_numbers<[1], [0], [0], [1], [0, 0, 1, 1], [], []>} : vector<16x128xbf16>, vector<128x128xbf16>, vector<16x128xf32> -> vector<16x128xf32>
    %27 = arith.addf %21, %26 : vector<16x128xf32>
    %28 = vector.extract_strided_slice %4 {offsets = [0, 1, 0], sizes = [1, 16, 128], strides = [1, 1, 1]} : vector<1x17x128xbf16> to vector<1x16x128xbf16>
    %29 = vector.shape_cast %28 : vector<1x16x128xbf16> to vector<16x128xbf16>
    %c0_32 = arith.constant 0 : index
    %c2_33 = arith.constant 2 : index
    %c0_34 = arith.constant 0 : index
    %c0_35 = arith.constant 0 : index
    %30 = vector.load %arg6[%c0_32, %c2_33, %c0_34, %c0_35] : memref<3x3x128x128xbf16, #tpu.memory_space<vmem>>, vector<1x1x128x128xbf16>
    %31 = vector.shape_cast %30 : vector<1x1x128x128xbf16> to vector<128x128xbf16>
    %cst_36 = arith.constant dense<0.000000e+00> : vector<16x128xf32>
    %32 = tpu.matmul %29, %31, %cst_36 {dimension_numbers = #tpu.dot_dimension_numbers<[1], [0], [0], [1], [0, 0, 1, 1], [], []>} : vector<16x128xbf16>, vector<128x128xbf16>, vector<16x128xf32> -> vector<16x128xf32>
    %33 = arith.addf %27, %32 : vector<16x128xf32>
    %34 = vector.extract_strided_slice %8 {offsets = [0, 0, 0], sizes = [1, 16, 128], strides = [1, 1, 1]} : vector<1x17x128xbf16> to vector<1x16x128xbf16>
    %35 = vector.shape_cast %34 : vector<1x16x128xbf16> to vector<16x128xbf16>
    %c1_37 = arith.constant 1 : index
    %c0_38 = arith.constant 0 : index
    %c0_39 = arith.constant 0 : index
    %c0_40 = arith.constant 0 : index
    %36 = vector.load %arg6[%c1_37, %c0_38, %c0_39, %c0_40] : memref<3x3x128x128xbf16, #tpu.memory_space<vmem>>, vector<1x1x128x128xbf16>
    %37 = vector.shape_cast %36 : vector<1x1x128x128xbf16> to vector<128x128xbf16>
    %cst_41 = arith.constant dense<0.000000e+00> : vector<16x128xf32>
    %38 = tpu.matmul %35, %37, %cst_41 {dimension_numbers = #tpu.dot_dimension_numbers<[1], [0], [0], [1], [0, 0, 1, 1], [], []>} : vector<16x128xbf16>, vector<128x128xbf16>, vector<16x128xf32> -> vector<16x128xf32>
    %39 = arith.addf %33, %38 : vector<16x128xf32>
    %40 = vector.extract_strided_slice %10 {offsets = [0, 0, 0], sizes = [1, 16, 128], strides = [1, 1, 1]} : vector<1x17x128xbf16> to vector<1x16x128xbf16>
    %41 = vector.shape_cast %40 : vector<1x16x128xbf16> to vector<16x128xbf16>
    %c1_42 = arith.constant 1 : index
    %c1_43 = arith.constant 1 : index
    %c0_44 = arith.constant 0 : index
    %c0_45 = arith.constant 0 : index
    %42 = vector.load %arg6[%c1_42, %c1_43, %c0_44, %c0_45] : memref<3x3x128x128xbf16, #tpu.memory_space<vmem>>, vector<1x1x128x128xbf16>
    %43 = vector.shape_cast %42 : vector<1x1x128x128xbf16> to vector<128x128xbf16>
    %cst_46 = arith.constant dense<0.000000e+00> : vector<16x128xf32>
    %44 = tpu.matmul %41, %43, %cst_46 {dimension_numbers = #tpu.dot_dimension_numbers<[1], [0], [0], [1], [0, 0, 1, 1], [], []>} : vector<16x128xbf16>, vector<128x128xbf16>, vector<16x128xf32> -> vector<16x128xf32>
    %45 = arith.addf %39, %44 : vector<16x128xf32>
    %46 = vector.extract_strided_slice %8 {offsets = [0, 1, 0], sizes = [1, 16, 128], strides = [1, 1, 1]} : vector<1x17x128xbf16> to vector<1x16x128xbf16>
    %47 = vector.shape_cast %46 : vector<1x16x128xbf16> to vector<16x128xbf16>
    %c1_47 = arith.constant 1 : index
    %c2_48 = arith.constant 2 : index
    %c0_49 = arith.constant 0 : index
    %c0_50 = arith.constant 0 : index
    %48 = vector.load %arg6[%c1_47, %c2_48, %c0_49, %c0_50] : memref<3x3x128x128xbf16, #tpu.memory_space<vmem>>, vector<1x1x128x128xbf16>
    %49 = vector.shape_cast %48 : vector<1x1x128x128xbf16> to vector<128x128xbf16>
    %cst_51 = arith.constant dense<0.000000e+00> : vector<16x128xf32>
    %50 = tpu.matmul %47, %49, %cst_51 {dimension_numbers = #tpu.dot_dimension_numbers<[1], [0], [0], [1], [0, 0, 1, 1], [], []>} : vector<16x128xbf16>, vector<128x128xbf16>, vector<16x128xf32> -> vector<16x128xf32>
    %51 = arith.addf %45, %50 : vector<16x128xf32>
    %52 = vector.extract_strided_slice %12 {offsets = [0, 0, 0], sizes = [1, 16, 128], strides = [1, 1, 1]} : vector<1x17x128xbf16> to vector<1x16x128xbf16>
    %53 = vector.shape_cast %52 : vector<1x16x128xbf16> to vector<16x128xbf16>
    %c2_52 = arith.constant 2 : index
    %c0_53 = arith.constant 0 : index
    %c0_54 = arith.constant 0 : index
    %c0_55 = arith.constant 0 : index
    %54 = vector.load %arg6[%c2_52, %c0_53, %c0_54, %c0_55] : memref<3x3x128x128xbf16, #tpu.memory_space<vmem>>, vector<1x1x128x128xbf16>
    %55 = vector.shape_cast %54 : vector<1x1x128x128xbf16> to vector<128x128xbf16>
    %cst_56 = arith.constant dense<0.000000e+00> : vector<16x128xf32>
    %56 = tpu.matmul %53, %55, %cst_56 {dimension_numbers = #tpu.dot_dimension_numbers<[1], [0], [0], [1], [0, 0, 1, 1], [], []>} : vector<16x128xbf16>, vector<128x128xbf16>, vector<16x128xf32> -> vector<16x128xf32>
    %57 = arith.addf %51, %56 : vector<16x128xf32>
    %58 = vector.extract_strided_slice %14 {offsets = [0, 0, 0], sizes = [1, 16, 128], strides = [1, 1, 1]} : vector<1x17x128xbf16> to vector<1x16x128xbf16>
    %59 = vector.shape_cast %58 : vector<1x16x128xbf16> to vector<16x128xbf16>
    %c2_57 = arith.constant 2 : index
    %c1_58 = arith.constant 1 : index
    %c0_59 = arith.constant 0 : index
    %c0_60 = arith.constant 0 : index
    %60 = vector.load %arg6[%c2_57, %c1_58, %c0_59, %c0_60] : memref<3x3x128x128xbf16, #tpu.memory_space<vmem>>, vector<1x1x128x128xbf16>
    %61 = vector.shape_cast %60 : vector<1x1x128x128xbf16> to vector<128x128xbf16>
    %cst_61 = arith.constant dense<0.000000e+00> : vector<16x128xf32>
    %62 = tpu.matmul %59, %61, %cst_61 {dimension_numbers = #tpu.dot_dimension_numbers<[1], [0], [0], [1], [0, 0, 1, 1], [], []>} : vector<16x128xbf16>, vector<128x128xbf16>, vector<16x128xf32> -> vector<16x128xf32>
    %63 = arith.addf %57, %62 : vector<16x128xf32>
    %64 = vector.extract_strided_slice %12 {offsets = [0, 1, 0], sizes = [1, 16, 128], strides = [1, 1, 1]} : vector<1x17x128xbf16> to vector<1x16x128xbf16>
    %65 = vector.shape_cast %64 : vector<1x16x128xbf16> to vector<16x128xbf16>
    %c2_62 = arith.constant 2 : index
    %c2_63 = arith.constant 2 : index
    %c0_64 = arith.constant 0 : index
    %c0_65 = arith.constant 0 : index
    %66 = vector.load %arg6[%c2_62, %c2_63, %c0_64, %c0_65] : memref<3x3x128x128xbf16, #tpu.memory_space<vmem>>, vector<1x1x128x128xbf16>
    %67 = vector.shape_cast %66 : vector<1x1x128x128xbf16> to vector<128x128xbf16>
    %cst_66 = arith.constant dense<0.000000e+00> : vector<16x128xf32>
    %68 = tpu.matmul %65, %67, %cst_66 {dimension_numbers = #tpu.dot_dimension_numbers<[1], [0], [0], [1], [0, 0, 1, 1], [], []>} : vector<16x128xbf16>, vector<128x128xbf16>, vector<16x128xf32> -> vector<16x128xf32>
    %69 = arith.addf %63, %68 : vector<16x128xf32>
    %c0_67 = arith.constant 0 : index
    %c0_68 = arith.constant 0 : index
    %70 = vector.load %arg9[%c0_67, %c0_68] : memref<16x128xf32, #tpu.memory_space<vmem>>, vector<16x128xf32>
    tpu.vector_store %arg9[%c0_67, %c0_68], %69 {strides = array<i32>} : memref<16x128xf32, #tpu.memory_space<vmem>>, vector<16x128xf32>,
    %c0_i32_69 = arith.constant 0 : i32
    %71 = arith.cmpi eq, %arg3, %c0_i32_69 : i32
    %72 = arith.extui %71 : i1 to i32
    %c0_i32_70 = arith.constant 0 : i32
    %73 = arith.cmpi ne, %72, %c0_i32_70 : i32
    scf.if %73 {
      %c0_71 = arith.constant 0 : index
      %c0_72 = arith.constant 0 : index
      %74 = vector.load %arg7[%c0_71, %c0_72] : memref<1x128xf32, #tpu.memory_space<vmem>>, vector<1x128xf32>
      %75 = vector.broadcast %74 : vector<1x128xf32> to vector<16x128xf32>
      %76 = arith.addf %69, %75 : vector<16x128xf32>
      %cst_73 = arith.constant 0.000000e+00 : f32
      %77 = vector.broadcast %cst_73 : f32 to vector<16x128xf32>
      %78 = arith.maximumf %76, %77 : vector<16x128xf32>
      %79 = arith.truncf %78 : vector<16x128xf32> to vector<16x128xbf16>
      %c0_74 = arith.constant 0 : index
      %c0_75 = arith.constant 0 : index
      %80 = vector.load %arg8[%c0_74, %c0_75] : memref<16x128xbf16, #tpu.memory_space<vmem>>, vector<16x128xbf16>
      tpu.vector_store %arg8[%c0_74, %c0_75], %79 {strides = array<i32>} : memref<16x128xbf16, #tpu.memory_space<vmem>>, vector<16x128xbf16>,
    } else {
    }
    return
  }
  func.func @transform_0(%arg0: i32, %arg1: i32, %arg2: i32, %arg3: i32) -> (i32, i32, i32, i32) {
    %c0_i32 = arith.constant 0 : i32
    %c0_i32_0 = arith.constant 0 : i32
    return %arg1, %arg2, %c0_i32, %arg3 : i32, i32, i32, i32
  }
  func.func @transform_1(%arg0: i32, %arg1: i32, %arg2: i32, %arg3: i32) -> (i32, i32, i32, i32) {
    %c1_i32 = arith.constant 1 : i32
    %0 = arith.addi %arg2, %c1_i32 : i32
    %c1_i32_0 = arith.constant 1 : i32
    %1 = arith.muli %0, %c1_i32_0 : i32
    %c0_i32 = arith.constant 0 : i32
    %c0_i32_1 = arith.constant 0 : i32
    return %arg1, %1, %c0_i32, %arg3 : i32, i32, i32, i32
  }
  func.func @transform_2(%arg0: i32, %arg1: i32, %arg2: i32, %arg3: i32) -> (i32, i32, i32, i32) {
    %c0_i32 = arith.constant 0 : i32
    %c0_i32_0 = arith.constant 0 : i32
    %c0_i32_1 = arith.constant 0 : i32
    return %c0_i32, %c0_i32_0, %arg3, %arg0 : i32, i32, i32, i32
  }
  func.func @transform_3(%arg0: i32, %arg1: i32, %arg2: i32, %arg3: i32) -> (i32, i32) {
    %c0_i32 = arith.constant 0 : i32
    %c0_i32_0 = arith.constant 0 : i32
    return %c0_i32, %arg0 : i32, i32
  }
  func.func @transform_4(%arg0: i32, %arg1: i32, %arg2: i32, %arg3: i32) -> (i32, i32) {
    %c1_i32 = arith.constant 1 : i32
    %0 = arith.muli %arg1, %c1_i32 : i32
    %1 = arith.addi %0, %arg2 : i32
    %c0_i32 = arith.constant 0 : i32
    return %1, %arg0 : i32, i32
  }
}

</mosaic_0001>

<bundles_post_ra>
// kernel: backbone_base_forward.4
= control target key start
LH: loop header
LB: loop body
LE: loop exit
PB: predicated region body
PF: predicated region fallthrough
CT: control target
= control target key end

     0   :  { %s4809_s15 = smov 0   ;;  %s4811_s16 = smov 0   ;;  %s5897_s0 = inlined_call_operand.vmem [shape: bf16[8,9,17,128], index: 0, kind: input, shape index: {}, may-alias: {0,1}]   ;;  %s5898_s1 = inlined_call_operand.vmem [shape: bf16[8,9,17,128], index: 1, kind: input, shape index: {}, may-alias: {0,1}]   ;;  %s5899_s2 = inlined_call_operand.vmem [shape: bf16[3,3,128,128], index: 2, kind: input, shape index: {}]   ;;  %s5900_s3 = inlined_call_operand.vmem [shape: f32[1,128], index: 3, kind: input, shape index: {}]   ;;  %s5901_s4 = inlined_call_operand.vmem [shape: bf16[256,128], index: 4, kind: output, shape index: {}]  }
   0x1   :  { %s4813_s17 = smov 0   ;;  %s4815_s18 = smov 0  }
   0x2   :  { %s4817_s19 = smov 0  }
   0x3 LB: > { %s36_s20 = sadd.s32 1, %s4758_s18  ;;  %p58_p1 = scmp.ne.s32.totalorder %s4750_s16, %s4746_s15  ;;  %s4762_s19 = sphi %s4817_s19, %s14_s19   ;;  %s4758_s18 = sphi %s4815_s18, %s5942_s18   ;;  %s4754_s17 = sphi %s4813_s17, %s5941_s17   ;;  %s4750_s16 = sphi %s4811_s16, %s5940_s16   ;;  %s4746_s15 = sphi %s4809_s15, %s5939_s15  }
   0x4   : > { %p38_p0 = scmp.ge.s32.totalorder %s36_s20, 2  ;;  %p59_p2 = scmp.eq.s32.totalorder %s4762_s19, 0 }
   0x5   : > { %s51_s23 = sadd.s32 1, %s4750_s16  ;;  %p3603_p5 = scmp.ge.s32.totalorder %s4762_s19, 2 }
   0x6   : > { %s5944_s20 = smov (%p38_p0, %s36_s20), 0  ;;  %p4840_p3 = por %p59_p2, %p58_p1 }
   0x7   : > { %s44_s22 = ssub.s32 %s4758_s18, %s5944_s20  ;;  %220 = sbr.rel (%p3603_p5) target bundleno = 88 (0x58), region = 24 }
   0x8   : > { %p49_p4 = scmp.eq.s32.totalorder %s44_s22, 0 }
   0xa   : > { %s4848_s24 = scalar_select %p49_p4, %s4750_s16, %s51_s23  }
   0xc   : > { %223 = sbr.rel (!%p4840_p3) target bundleno = 79 (0x4f), region = 28  ;;  %s225_s25 = sand.u32 (%p4840_p3), 1, %s4750_s16  }
   0xd   : > { %s4471_s26 = smul.u32 (%p4840_p3), 432, %s4758_s18  ;;  %s4862_s6 = smov (%p4840_p3), 0  }
   0xe   : > { %s4470_s27 = smul.u32 (%p4840_p3), 384, %s225_s25 }
   0xf   : > { %s4858_s30 = scalar_lea.vmem (%p4840_p3), %s5897_s0, %s4471_s26  }
  0x10   : > { %s4860_s5 = scalar_lea.vmem (%p4840_p3), [#allocation3], %s4470_s27  }
  0x11 LB: >> { %v262_v0 = vld [vmem:[%s4858_s30] sm:$0xf]  ;;  %v264_v1 = vld [vmem:[%s4858_s30 + $0x4] sm:$0xf]  ;;  %v266_v2 = vld [vmem:[%s4858_s30 + $0x8] sm:$0xf]  ;;  %s4766_s6 = sphi %s4862_s6, %s256_s6  }
  0x12   : >> { %263 = vst [vmem:[%s4860_s5] sm:$0xf] %v262_v0  ;;  %265 = vst [vmem:[%s4860_s5 + $0x4] sm:$0xf] %v264_v1  ;;  %v268_v3 = vld [vmem:[%s4858_s30 + $0xc] sm:$0xf]  ;;  %s256_s6 = sadd.s32 1, %s4766_s6  }
  0x13   : >> { %267 = vst [vmem:[%s4860_s5 + $0x8] sm:$0xf] %v266_v2  ;;  %v270_v4 = vld [vmem:[%s4858_s30 + $0x10] sm:$0xf]  ;;  %v272_v5 = vld [vmem:[%s4858_s30 + $0x14] sm:$0xf] }
  0x14   : >> { %269 = vst [vmem:[%s4860_s5 + $0xc] sm:$0xf] %v268_v3  ;;  %271 = vst [vmem:[%s4860_s5 + $0x10] sm:$0xf] %v270_v4  ;;  %v274_v6 = vld [vmem:[%s4858_s30 + $0x18] sm:$0xf] }
  0x15   : >> { %273 = vst [vmem:[%s4860_s5 + $0x14] sm:$0xf] %v272_v5  ;;  %v276_v7 = vld [vmem:[%s4858_s30 + $0x1c] sm:$0xf]  ;;  %v278_v8 = vld [vmem:[%s4858_s30 + $0x20] sm:$0xf] }
  0x16   : >> { %275 = vst [vmem:[%s4860_s5 + $0x18] sm:$0xf] %v274_v6  ;;  %277 = vst [vmem:[%s4860_s5 + $0x1c] sm:$0xf] %v276_v7  ;;  %v280_v9 = vld [vmem:[%s4858_s30 + $0x24] sm:$0xf] }
  0x17   : >> { %279 = vst [vmem:[%s4860_s5 + $0x20] sm:$0xf] %v278_v8  ;;  %v282_v10 = vld [vmem:[%s4858_s30 + $0x28] sm:$0xf]  ;;  %v284_v11 = vld [vmem:[%s4858_s30 + $0x2c] sm:$0xf] }
  0x18   : >> { %281 = vst [vmem:[%s4860_s5 + $0x24] sm:$0xf] %v280_v9  ;;  %283 = vst [vmem:[%s4860_s5 + $0x28] sm:$0xf] %v282_v10  ;;  %v286_v12 = vld [vmem:[%s4858_s30 + $0x30] sm:$0xf] }
  0x19   : >> { %285 = vst [vmem:[%s4860_s5 + $0x2c] sm:$0xf] %v284_v11  ;;  %v288_v13 = vld [vmem:[%s4858_s30 + $0x34] sm:$0xf]  ;;  %v290_v14 = vld [vmem:[%s4858_s30 + $0x38] sm:$0xf] }
  0x1a   : >> { %287 = vst [vmem:[%s4860_s5 + $0x30] sm:$0xf] %v286_v12  ;;  %289 = vst [vmem:[%s4860_s5 + $0x34] sm:$0xf] %v288_v13  ;;  %v292_v15 = vld [vmem:[%s4858_s30 + $0x3c] sm:$0xf] }
  0x1b   : >> { %291 = vst [vmem:[%s4860_s5 + $0x38] sm:$0xf] %v290_v14  ;;  %v294_v16 = vld [vmem:[%s4858_s30 + $0x6c] sm:$0xf]  ;;  %v296_v17 = vld [vmem:[%s4858_s30 + $0x70] sm:$0xf] }
  0x1c   : >> { %293 = vst [vmem:[%s4860_s5 + $0x3c] sm:$0xf] %v292_v15  ;;  %295 = vst [vmem:[%s4860_s5 + $0x60] sm:$0xf] %v294_v16  ;;  %v298_v18 = vld [vmem:[%s4858_s30 + $0x74] sm:$0xf] }
  0x1d   : >> { %297 = vst [vmem:[%s4860_s5 + $0x64] sm:$0xf] %v296_v17  ;;  %v300_v19 = vld [vmem:[%s4858_s30 + $0x78] sm:$0xf]  ;;  %v302_v20 = vld [vmem:[%s4858_s30 + $0x7c] sm:$0xf] }
  0x1e   : >> { %299 = vst [vmem:[%s4860_s5 + $0x68] sm:$0xf] %v298_v18  ;;  %301 = vst [vmem:[%s4860_s5 + $0x6c] sm:$0xf] %v300_v19  ;;  %v304_v21 = vld [vmem:[%s4858_s30 + $0x80] sm:$0xf] }
  0x1f   : >> { %303 = vst [vmem:[%s4860_s5 + $0x70] sm:$0xf] %v302_v20  ;;  %v306_v22 = vld [vmem:[%s4858_s30 + $0x84] sm:$0xf]  ;;  %v308_v23 = vld [vmem:[%s4858_s30 + $0x88] sm:$0xf] }
  0x20   : >> { %305 = vst [vmem:[%s4860_s5 + $0x74] sm:$0xf] %v304_v21  ;;  %307 = vst [vmem:[%s4860_s5 + $0x78] sm:$0xf] %v306_v22  ;;  %v310_v24 = vld [vmem:[%s4858_s30 + $0x8c] sm:$0xf] }
  0x21   : >> { %309 = vst [vmem:[%s4860_s5 + $0x7c] sm:$0xf] %v308_v23  ;;  %v312_v25 = vld [vmem:[%s4858_s30 + $0x90] sm:$0xf]  ;;  %v314_v26 = vld [vmem:[%s4858_s30 + $0x94] sm:$0xf] }
  0x22   : >> { %311 = vst [vmem:[%s4860_s5 + $0x80] sm:$0xf] %v310_v24  ;;  %313 = vst [vmem:[%s4860_s5 + $0x84] sm:$0xf] %v312_v25  ;;  %v316_v27 = vld [vmem:[%s4858_s30 + $0x98] sm:$0xf] }
  0x23   : >> { %315 = vst [vmem:[%s4860_s5 + $0x88] sm:$0xf] %v314_v26  ;;  %v318_v28 = vld [vmem:[%s4858_s30 + $0x9c] sm:$0xf]  ;;  %v320_v29 = vld [vmem:[%s4858_s30 + $0xa0] sm:$0xf] }
  0x24   : >> { %317 = vst [vmem:[%s4860_s5 + $0x8c] sm:$0xf] %v316_v27  ;;  %319 = vst [vmem:[%s4860_s5 + $0x90] sm:$0xf] %v318_v28  ;;  %v322_v30 = vld [vmem:[%s4858_s30 + $0xa4] sm:$0xf] }
  0x25   : >> { %321 = vst [vmem:[%s4860_s5 + $0x94] sm:$0xf] %v320_v29  ;;  %v324_v31 = vld [vmem:[%s4858_s30 + $0xa8] sm:$0xf]  ;;  %v326_v32 = vld [vmem:[%s4858_s30 + $0xd8] sm:$0xf] }
  0x26   : >> { %323 = vst [vmem:[%s4860_s5 + $0x98] sm:$0xf] %v322_v30  ;;  %325 = vst [vmem:[%s4860_s5 + $0x9c] sm:$0xf] %v324_v31  ;;  %v328_v33 = vld [vmem:[%s4858_s30 + $0xdc] sm:$0xf] }
  0x27   : >> { %327 = vst [vmem:[%s4860_s5 + $0xc0] sm:$0xf] %v326_v32  ;;  %v330_v34 = vld [vmem:[%s4858_s30 + $0xe0] sm:$0xf]  ;;  %v332_v35 = vld [vmem:[%s4858_s30 + $0xe4] sm:$0xf] }
  0x28   : >> { %329 = vst [vmem:[%s4860_s5 + $0xc4] sm:$0xf] %v328_v33  ;;  %331 = vst [vmem:[%s4860_s5 + $0xc8] sm:$0xf] %v330_v34  ;;  %v334_v36 = vld [vmem:[%s4858_s30 + $0xe8] sm:$0xf] }
  0x29   : >> { %333 = vst [vmem:[%s4860_s5 + $0xcc] sm:$0xf] %v332_v35  ;;  %v336_v37 = vld [vmem:[%s4858_s30 + $0xec] sm:$0xf]  ;;  %v338_v38 = vld [vmem:[%s4858_s30 + $0xf0] sm:$0xf] }
  0x2a   : >> { %335 = vst [vmem:[%s4860_s5 + $0xd0] sm:$0xf] %v334_v36  ;;  %337 = vst [vmem:[%s4860_s5 + $0xd4] sm:$0xf] %v336_v37  ;;  %v340_v39 = vld [vmem:[%s4858_s30 + $0xf4] sm:$0xf] }
  0x2b   : >> { %339 = vst [vmem:[%s4860_s5 + $0xd8] sm:$0xf] %v338_v38  ;;  %v342_v40 = vld [vmem:[%s4858_s30 + $0xf8] sm:$0xf]  ;;  %v344_v41 = vld [vmem:[%s4858_s30 + $0xfc] sm:$0xf] }
  0x2c   : >> { %341 = vst [vmem:[%s4860_s5 + $0xdc] sm:$0xf] %v340_v39  ;;  %343 = vst [vmem:[%s4860_s5 + $0xe0] sm:$0xf] %v342_v40  ;;  %v346_v42 = vld [vmem:[%s4858_s30 + $0x100] sm:$0xf] }
  0x2d   : >> { %345 = vst [vmem:[%s4860_s5 + $0xe4] sm:$0xf] %v344_v41  ;;  %v348_v43 = vld [vmem:[%s4858_s30 + $0x104] sm:$0xf]  ;;  %v350_v44 = vld [vmem:[%s4858_s30 + $0x108] sm:$0xf] }
  0x2e   : >> { %347 = vst [vmem:[%s4860_s5 + $0xe8] sm:$0xf] %v346_v42  ;;  %349 = vst [vmem:[%s4860_s5 + $0xec] sm:$0xf] %v348_v43  ;;  %v352_v45 = vld [vmem:[%s4858_s30 + $0x10c] sm:$0xf] }
  0x2f   : >> { %351 = vst [vmem:[%s4860_s5 + $0xf0] sm:$0xf] %v350_v44  ;;  %v354_v46 = vld [vmem:[%s4858_s30 + $0x110] sm:$0xf]  ;;  %v356_v47 = vld [vmem:[%s4858_s30 + $0x114] sm:$0xf] }
  0x30   : >> { %353 = vst [vmem:[%s4860_s5 + $0xf4] sm:$0xf] %v352_v45  ;;  %355 = vst [vmem:[%s4860_s5 + $0xf8] sm:$0xf] %v354_v46  ;;  %v358_v48 = vld [vmem:[%s4858_s30 + $0x144] sm:$0xf] }
  0x31   : >> { %357 = vst [vmem:[%s4860_s5 + $0xfc] sm:$0xf] %v356_v47  ;;  %v360_v49 = vld [vmem:[%s4858_s30 + $0x148] sm:$0xf]  ;;  %v362_v50 = vld [vmem:[%s4858_s30 + $0x14c] sm:$0xf] }
  0x32   : >> { %359 = vst [vmem:[%s4860_s5 + $0x120] sm:$0xf] %v358_v48  ;;  %361 = vst [vmem:[%s4860_s5 + $0x124] sm:$0xf] %v360_v49  ;;  %v364_v51 = vld [vmem:[%s4858_s30 + $0x150] sm:$0xf] }
  0x33   : >> { %363 = vst [vmem:[%s4860_s5 + $0x128] sm:$0xf] %v362_v50  ;;  %v366_v52 = vld [vmem:[%s4858_s30 + $0x154] sm:$0xf]  ;;  %v368_v53 = vld [vmem:[%s4858_s30 + $0x158] sm:$0xf] }
  0x34   : >> { %365 = vst [vmem:[%s4860_s5 + $0x12c] sm:$0xf] %v364_v51  ;;  %367 = vst [vmem:[%s4860_s5 + $0x130] sm:$0xf] %v366_v52  ;;  %v370_v54 = vld [vmem:[%s4858_s30 + $0x15c] sm:$0xf] }
  0x35   : >> { %369 = vst [vmem:[%s4860_s5 + $0x134] sm:$0xf] %v368_v53  ;;  %v372_v55 = vld [vmem:[%s4858_s30 + $0x160] sm:$0xf]  ;;  %v374_v56 = vld [vmem:[%s4858_s30 + $0x164] sm:$0xf] }
  0x36   : >> { %371 = vst [vmem:[%s4860_s5 + $0x138] sm:$0xf] %v370_v54  ;;  %373 = vst [vmem:[%s4860_s5 + $0x13c] sm:$0xf] %v372_v55  ;;  %v376_v57 = vld [vmem:[%s4858_s30 + $0x168] sm:$0xf] }
  0x37   : >> { %375 = vst [vmem:[%s4860_s5 + $0x140] sm:$0xf] %v374_v56  ;;  %v378_v58 = vld [vmem:[%s4858_s30 + $0x16c] sm:$0xf]  ;;  %v380_v59 = vld [vmem:[%s4858_s30 + $0x170] sm:$0xf] }
  0x38   : >> { %377 = vst [vmem:[%s4860_s5 + $0x144] sm:$0xf] %v376_v57  ;;  %379 = vst [vmem:[%s4860_s5 + $0x148] sm:$0xf] %v378_v58  ;;  %v382_v60 = vld [vmem:[%s4858_s30 + $0x174] sm:$0xf] }
  0x39   : >> { %381 = vst [vmem:[%s4860_s5 + $0x14c] sm:$0xf] %v380_v59  ;;  %v384_v61 = vld [vmem:[%s4858_s30 + $0x178] sm:$0xf]  ;;  %v386_v62 = vld [vmem:[%s4858_s30 + $0x17c] sm:$0xf] }
  0x3a   : >> { %383 = vst [vmem:[%s4860_s5 + $0x150] sm:$0xf] %v382_v60  ;;  %385 = vst [vmem:[%s4860_s5 + $0x154] sm:$0xf] %v384_v61  ;;  %v388_v63 = vld [vmem:[%s4858_s30 + $0x180] sm:$0xf] }
  0x3b   : >> { %387 = vst [vmem:[%s4860_s5 + $0x158] sm:$0xf] %v386_v62  ;;  %389 = vst [vmem:[%s4860_s5 + $0x15c] sm:$0xf] %v388_v63  ;;  %p255_p6 = scmp.ge.s32.totalorder %s256_s6, 1 }
  0x3c   : > { %s401_s7 = scalar_lea.vmem (%p255_p6), %s4858_s30, 64   ;;  %s403_s8 = scalar_lea.vmem (%p255_p6), %s4860_s5, 64 [#allocation3]  }
  0x3d   : > { %258 = sbr.rel (!%p255_p6) target bundleno = 17 (0x11), region = 222  ;;  %s5004_s9 = smov (%p255_p6), 0  }
  0x3e   : > { %s5006_s10 = smov (%p255_p6), 0  }
  0x42 LB: >> { %v413_v0 = vld [vmem:[%s4774_s7] sm:$0xf]  ;;  %v415_v1 = vld [vmem:[%s4774_s7 + $0x6c] sm:$0xf]  ;;  %v417_v2 = vld [vmem:[%s4774_s7 + $0xd8] sm:$0xf]  ;;  %s4782_s10 = sphi %s5006_s10, %s407_s10   ;;  %s4778_s9 = sphi %s5004_s9, %s5903_s9   ;;  %s4774_s7 = sphi %s401_s7, %s3612_s7   ;;  %s4770_s8 = sphi %s403_s8, %s3614_s8  }
  0x43   : >> { %414 = vst [vmem:[%s4770_s8] sm:$0xf] %v413_v0  ;;  %416 = vst [vmem:[%s4770_s8 + $0x60] sm:$0xf] %v415_v1  ;;  %v419_v3 = vld [vmem:[%s4774_s7 + $0x144] sm:$0xf]  ;;  %s421_s11 = sadd.s32 1, %s4778_s9 }
  0x44   : >> { %418 = vst [vmem:[%s4770_s8 + $0xc0] sm:$0xf] %v417_v2  ;;  %420 = vst [vmem:[%s4770_s8 + $0x120] sm:$0xf] %v419_v3  ;;  %p422_p7 = scmp.ge.s32.totalorder %s421_s11, 8  ;;  %s407_s10 = sadd.s32 1, %s4782_s10  }
  0x45   : >> { %p406_p8 = scmp.ge.s32.totalorder %s407_s10, 8 }
  0x46   : >> { %s5946_s11 = smov (%p422_p7, %s421_s11), 0 }
  0x47   : >> { %s3609_s12 = sshll.u32 %s5946_s11, 2  ;;  %s5903_s9 = smov %s5946_s11 }
  0x48   : >> { %s3611_s13 = scalar_lea.vmem %s4858_s30, %s3609_s12  ;;  %s3613_s14 = scalar_lea.vmem %s4860_s5, %s3609_s12 [#allocation3] }
  0x49   : >> { %s3612_s7 = scalar_lea.vmem %s3611_s13, 64   ;;  %s3614_s8 = scalar_lea.vmem %s3613_s14, 64 [#allocation3]  }
  0x4a   : > { %409 = sbr.rel (!%p406_p8) target bundleno = 66 (0x42), region = 233 }
  0x4f PF: > { %652 = sbr.rel (!%p4840_p3) target bundleno = 88 (0x58), region = 90  ;;  %s654_s22 = sand.u32 (%p4840_p3), 1, %s4750_s16  }
  0x50   : > { %s3615_s23 = smul.u32 (%p4840_p3), 432, %s4758_s18 }
  0x51   : > { %s4472_s25 = smul.u32 (%p4840_p3), 48, %s654_s22 }
  0x52   : > { %s3477_s28 = scalar_lea.vmem (%p4840_p3), %s5898_s1, %s3615_s23 }
  0x53   : > { %v3616_v4 = vld [vmem:[%s3477_s28 + $0x60] sm:$0xff] (%p4840_p3)   ;;  %v3618_v5 = vld [vmem:[%s3477_s28 + $0x68] sm:$0xf] (%p4840_p3)  ;;  %v3619_v6 = vld [vmem:[%s3477_s28 + $0xcc] sm:$0xff] (%p4840_p3)   ;;  %s656_s29 = scalar_lea.vmem (%p4840_p3), [#allocation4], %s4472_s25 }
  0x54   : > { %683 = vst [vmem:[%s656_s29] sm:$0xff] %v3616_v4   ;;  %687 = vst [vmem:[%s656_s29 + $0x8] sm:$0xf] %v3618_v5  ;;  %v3621_v7 = vld [vmem:[%s3477_s28 + $0xd4] sm:$0xf]  ;;  %v3622_v8 = vld [vmem:[%s3477_s28 + $0x138] sm:$0xff]  }
  0x55   : > { %689 = vst [vmem:[%s656_s29 + $0xc] sm:$0xff] %v3619_v6   ;;  %v3624_v9 = vld [vmem:[%s3477_s28 + $0x140] sm:$0xf]  ;;  %693 = vst [vmem:[%s656_s29 + $0x14] sm:$0xf] %v3621_v7  ;;  %v3625_v10 = vld [vmem:[%s3477_s28 + $0x1a4] sm:$0xff]  }
  0x56   : > { %695 = vst [vmem:[%s656_s29 + $0x18] sm:$0xff] %v3622_v8   ;;  %699 = vst [vmem:[%s656_s29 + $0x20] sm:$0xf] %v3624_v9  ;;  %v3627_v11 = vld [vmem:[%s3477_s28 + $0x1ac] sm:$0xf] }
  0x57   : > { %701 = vst [vmem:[%s656_s29 + $0x24] sm:$0xff] %v3625_v10   ;;  %705 = vst [vmem:[%s656_s29 + $0x2c] sm:$0xf] %v3627_v11 }
  0x58 PF: > { %p3628_p9 = scmp.ge.s32.totalorder %s4762_s19, 1  ;;  %p752_p10 = scmp.lt.s32.totalorder %s4762_s19, 3 }
  0x5a   : > { %p753_p11 = pnand %p3628_p9, %p752_p10 }
  0x5c   : > { %756 = sbr.rel (%p753_p11) target bundleno = 475 (0x1db), region = 131 }
  0x61   : > { %v4579_v12 = vld [vmem:[%s5899_s2 + $0x38] sm:$0xff]   ;;  %v4581_v14 = vld [vmem:[%s5899_s2 + $0x30] sm:$0xff]   ;;  %v4583_v16 = vld [vmem:[%s5899_s2 + $0x28] sm:$0xff]   ;;  %s759_s22 = sand.u32 1, %s4746_s15   ;;  %vm1420_vm0 = vsmask.f32 3328 }
  0x62   : > { %v4580_v13 = vld [vmem:[%s5899_s2 + $0x78] sm:$0xff]   ;;  %4166 = vmatprep.subr.bf16.mxu0 %v4579_v12  ;;  %v4582_v15 = vld [vmem:[%s5899_s2 + $0x70] sm:$0xff]   ;;  %v4584_v17 = vld [vmem:[%s5899_s2 + $0x68] sm:$0xff]   ;;  %s4473_s28 = smul.u32 384, %s759_s22  ;;  %vm1421_vm1 = vsmask.f32 7440 }
  0x63   : > { %4198 = vmatprep.subr.bf16.mxu1 %v4580_v13  ;;  %4167 = vmatpush3.bf16.msra.mxu0 %v4579_v12  ;;  %v4585_v18 = vld [vmem:[%s5899_s2 + $0x20] sm:$0xff]   ;;  %v4587_v20 = vld [vmem:[%s5899_s2 + $0x18] sm:$0xff]   ;;  %v4589_v22 = vld [vmem:[%s5899_s2 + $0x10] sm:$0xff]   ;;  %s4474_s8 = smul.u32 48, %s759_s22 }
  0x64   : > { %4199 = vmatpush3.bf16.msra.mxu1 %v4580_v13  ;;  %4168 = vmatprep.subr.bf16.mxu0 %v4581_v14  ;;  %v4586_v19 = vld [vmem:[%s5899_s2 + $0x60] sm:$0xff]   ;;  %v4588_v21 = vld [vmem:[%s5899_s2 + $0x58] sm:$0xff]   ;;  %v4590_v23 = vld [vmem:[%s5899_s2 + $0x50] sm:$0xff]   ;;  %s5070_s10 = scalar_lea.vmem [#allocation3], %s4473_s28 }
  0x65   : > { %4200 = vmatprep.subr.bf16.mxu1 %v4582_v15  ;;  %v864_v24 = vld [vmem:[%s5070_s10] sm:$0xf]  ;;  %v865_v25 = vld [vmem:[%s5070_s10 + $0x4] sm:$0xf]  ;;  %v867_v32 = vld [vmem:[%s5070_s10 + $0xc] sm:$0xf] }
  0x66   : > { %v3689_v26 = vcombine.low %v864_v24, %v865_v25  ;;  %v1424_v27 = vshrl.u32 %v864_v24, 16  ;;  %v1427_v28 = vshll.u32 %v864_v24, 16  ;;  %v1433_v29 = vshll.u32 %v865_v25, 16  ;;  %v4596_v30 = vld [vmem:[%s5070_s10 + $0x60] sm:$0xff]   ;;  %v868_v33 = vld [vmem:[%s5070_s10 + $0x10] sm:$0xf]  ;;  %vm5240_vm2 = vmor %vm1420_vm0, %vm1421_vm1 }
  0x67   : > { %4169 = vmatpush3.bf16.msra.mxu0 %v4581_v14  ;;  %v1437_v31 = vshrl.u32 %v865_v25, 16  ;;  %v4591_v34 = vld [vmem:[%s5899_s2 + $0x8] sm:$0xff]   ;;  %v1448_v39 = vshrl.u32 %v867_v32, 16  ;;  %v1451_v40 = vshll.u32 %v867_v32, 16  ;;  %v1457_v41 = vshll.u32 %v868_v33, 16  ;;  %4214 = vmatprep.mubr.bf16.mxu1 %v4596_v30  ;;  %v4593_v48 = vld [vmem:[%s5899_s2] sm:$0xff]  }
  0x68   : > { %4201 = vmatpush3.bf16.msra.mxu1 %v4582_v15  ;;  %4170 = vmatprep.subr.bf16.mxu0 %v4583_v16  ;;  %v1426_v35 = vrot.slane %v1424_v27, 4  ;;  %v1429_v36 = vrot.slane %v1427_v28, 5  ;;  %v5080_v37 = vrot.slane %v1433_v29, 5  ;;  %v4592_v42 = vld [vmem:[%s5899_s2 + $0x48] sm:$0xff]   ;;  %v1461_v43 = vshrl.u32 %v868_v33, 16  ;;  %v4594_v51 = vld [vmem:[%s5899_s2 + $0x40] sm:$0xff]  }
  0x69   : > { %4202 = vmatprep.subr.bf16.mxu1 %v4584_v17  ;;  %4182 = vmatprep.mubr.bf16.mxu0 %v3689_v26  ;;  %v1439_v38 = vrot.slane %v1437_v31, 4  ;;  %v1450_v44 = vrot.slane %v1448_v39, 4  ;;  %v1453_v45 = vrot.slane %v1451_v40, 5  ;;  %v5085_v46 = vrot.slane %v1457_v41, 5  ;;  %v870_v54 = vld [vmem:[%s5070_s10 + $0x18] sm:$0xf] }
  0x6a   : > { %v1463_v47 = vrot.slane %v1461_v43, 4  ;;  %v1430_v49 = vor.u32 %v1429_v36, %v1426_v35  ;;  %v1472_v55 = vshrl.u32 %v870_v54, 16  ;;  %v4599_v58 = vld [vmem:[%s5899_s2 + $0xb8] sm:$0xff]   ;;  %v4598_v63 = vld [vmem:[%s5070_s10 + $0x6c] sm:$0xff]   ;;  %v1475_v0 = vshll.u32 %v870_v54, 16  ;;  %v4606_v27 = vld [vmem:[%s5070_s10 + $0x84] sm:$0xff]  }
  0x6b   : > { %4171 = vmatpush3.bf16.msra.mxu0 %v4583_v16  ;;  %v1440_v50 = vor.u32 %v1439_v38, %v5080_v37  ;;  %v1454_v52 = vor.u32 %v1453_v45, %v1450_v44  ;;  %v4600_v59 = vld [vmem:[%s5899_s2 + $0xf8] sm:$0xff]   ;;  %v5112_v2 = vcombine.low %v867_v32, %v868_v33  ;;  %v4601_v3 = vld [vmem:[%s5899_s2 + $0xb0] sm:$0xff]   ;;  %v873_v6 = vld [vmem:[%s5070_s10 + $0x24] sm:$0xf]  ;;  %s5638_s15 = scalar_lea.vmem [#allocation4], %s4474_s8 }
  0x6c   : > { %4203 = vmatpush3.bf16.msra.mxu1 %v4584_v17  ;;  %4172 = vmatprep.subr.bf16.mxu0 %v4585_v18  ;;  %v1464_v53 = vor.u32 %v1463_v47, %v5085_v46  ;;  %v5096_v56 = vrot.slane %v1430_v49, 4  ;;  %v871_v60 = vld [vmem:[%s5070_s10 + $0x1c] sm:$0xf]  ;;  %v5117_v4 = vrot.slane %v1472_v55, 4  ;;  %v4602_v7 = vld [vmem:[%s5899_s2 + $0xf0] sm:$0xff]   ;;  %v1496_v10 = vshrl.u32 %v873_v6, 16 }
  0x6d   : > { %4204 = vmatprep.subr.bf16.mxu1 %v4586_v19  ;;  %v5098_v57 = vrot.slane %v1440_v50, 4  ;;  %v5107_v61 = vrot.slane %v1454_v52, 4  ;;  %v1481_v1 = vshll.u32 %v871_v60, 16  ;;  %v1485_v5 = vshrl.u32 %v871_v60, 16  ;;  %v874_v8 = vld [vmem:[%s5070_s10 + $0x28] sm:$0xf] }
  0x6e   : > { %v5109_v62 = vrot.slane %v1464_v53, 4  ;;  %v4604_v9 = vld [vmem:[%s5070_s10 + $0x78] sm:$0xff]   ;;  %v1499_v11 = vshll.u32 %v873_v6, 16  ;;  %v1505_v12 = vshll.u32 %v874_v8, 16  ;;  %v1509_v13 = vshrl.u32 %v874_v8, 16  ;;  %v4608_v28 = vld [vmem:[%s5899_s2 + $0xe8] sm:$0xff]  }
  0x6f   : > { %4173 = vmatpush3.bf16.msra.mxu0 %v4585_v18  ;;  %v5125_v14 = vcombine.low %v870_v54, %v871_v60  ;;  %v876_v15 = vld [vmem:[%s5070_s10 + $0x30] sm:$0xf]  ;;  %v5129_v16 = vrot.slane %v1475_v0, 5  ;;  %v877_v17 = vld [vmem:[%s5070_s10 + $0x34] sm:$0xf]  ;;  %v5140_v24 = vcombine.low %v873_v6, %v874_v8  ;;  %v5142_v25 = vrot.slane %v1496_v10, 4 }
  0x70   : > { %4205 = vmatpush3.bf16.msra.mxu1 %v4586_v19  ;;  %4174 = vmatprep.subr.bf16.mxu0 %v4587_v20  ;;  %v1520_v18 = vshrl.u32 %v876_v15, 16  ;;  %v5132_v19 = vrot.slane %v1481_v1, 5  ;;  %v5144_v26 = vrot.slane %v1499_v11, 5  ;;  %v5150_v29 = vrot.slane %v1505_v12, 5  ;;  %v4609_v31 = vld [vmem:[%s5899_s2 + $0xa0] sm:$0xff]   ;;  %v4612_v41 = vld [vmem:[%s5070_s10 + $0x90] sm:$0xff]  }
  0x71   : > { %4206 = vmatprep.subr.bf16.mxu1 %v4588_v21  ;;  %v5152_v30 = vrot.slane %v1509_v13, 4  ;;  %v1533_v33 = vshrl.u32 %v877_v17, 16  ;;  %v879_v35 = vld [vmem:[%s5070_s10 + $0x3c] sm:$0xf]  ;;  %v880_v36 = vld [vmem:[%s5070_s10 + $0x40] sm:$0xf]  ;;  %v5164_v38 = vcombine.low %v876_v15, %v877_v17 }
  0x72   : > { %v5157_v32 = vrot.slane %v1520_v18, 4  ;;  %v1547_v43 = vshll.u32 %v879_v35, 16  ;;  %v1553_v44 = vshll.u32 %v880_v36, 16  ;;  %v1557_v45 = vshrl.u32 %v880_v36, 16  ;;  %v4615_v47 = vld [vmem:[%s5899_s2 + $0x98] sm:$0xff]   ;;  %v4620_v10 = vld [vmem:[%s5070_s10 + $0xa8] sm:$0xff]  }
  0x73   : > { %4175 = vmatpush3.bf16.msra.mxu0 %v4587_v20  ;;  %v4607_v20 = vld [vmem:[%s5899_s2 + $0xa8] sm:$0xff]   ;;  %v5178_v52 = vrot.slane %v1533_v33, 4  ;;  %v5180_v53 = vcombine.low %v879_v35, %v880_v36  ;;  %v4616_v54 = vld [vmem:[%s5899_s2 + $0xd8] sm:$0xff]   ;;  %v1502_v33 = vor.u32 %v5144_v26, %v5142_v25 }
  0x74   : > { %4207 = vmatpush3.bf16.msra.mxu1 %v4588_v21  ;;  %4176 = vmatprep.subr.bf16.mxu0 %v4589_v22  ;;  %v1523_v21 = vshll.u32 %v876_v15, 16  ;;  %v883_v49 = vld [vmem:[%s5070_s10 + $0x4c] sm:$0xf]  ;;  %v5187_v60 = vrot.slane %v1547_v43, 5  ;;  %v5191_v0 = vrot.slane %v1557_v45, 4  ;;  %v4614_v1 = vld [vmem:[%s5070_s10 + $0x9c] sm:$0xff]   ;;  %v1512_v45 = vor.u32 %v5152_v30, %v5150_v29 }
  0x75   : > { %4208 = vmatprep.subr.bf16.mxu1 %v4590_v23  ;;  %v1577_v55 = vshll.u32 %v883_v49, 16  ;;  %v886_v11 = vld [vmem:[%s5070_s10 + $0x58] sm:$0xf]  ;;  %v3647_v43 = vld [vmem:[%s5070_s10 + $0xc0] sm:$0xf] }
  0x76   : > { %v5166_v39 = vrot.slane %v1523_v21, 5  ;;  %v1601_v18 = vshll.u32 %v886_v11, 16  ;;  %v4623_v21 = vld [vmem:[%s5899_s2 + $0x88] sm:$0xff]  }
  0x77   : > { %4177 = vmatpush3.bf16.msra.mxu0 %v4589_v22  ;;  %v1529_v22 = vshll.u32 %v877_v17, 16  ;;  %v3657_v30 = vld [vmem:[%s5070_s10 + $0xe8] sm:$0xf] }
  0x78   : > { %4209 = vmatpush3.bf16.msra.mxu1 %v4590_v23  ;;  %4178 = vmatprep.subr.bf16.mxu0 %v4591_v34  ;;  %v5138_v23 = vrot.slane %v1485_v5, 4  ;;  %v4618_v5 = vld [vmem:[%s5899_s2 + $0xd0] sm:$0xff]  }
  0x79   : > { %4210 = vmatprep.subr.bf16.mxu1 %v4592_v42  ;;  %v5168_v40 = vrot.slane %v1529_v22, 5  ;;  %v4624_v22 = vld [vmem:[%s5899_s2 + $0xc8] sm:$0xff]  }
  0x7b   : > { %4179 = vmatpush3.bf16.msra.mxu0 %v4591_v34  ;;  %v4610_v34 = vld [vmem:[%s5899_s2 + $0xe0] sm:$0xff]  }
  0x7c   : > { %4211 = vmatpush3.bf16.msra.mxu1 %v4592_v42  ;;  %4180 = vmatprep.subr.bf16.mxu0 %v4593_v48  ;;  %v1544_v42 = vshrl.u32 %v879_v35, 16  ;;  %v4622_v35 = vld [vmem:[%s5070_s10 + $0xb4] sm:$0xff]  }
  0x7d   : > { %4212 = vmatprep.subr.bf16.mxu1 %v4594_v51 }
  0x7f   : > { %4181 = vmatpush3.bf16.msra.mxu0 %v4593_v48  ;;  %v882_v48 = vld [vmem:[%s5070_s10 + $0x48] sm:$0xf] }
  0x80   : > { %4213 = vmatpush3.bf16.msra.mxu1 %v4594_v51  ;;  %4230 = vmatprep.subr.bf16.mxu0 %v4599_v58  ;;  %v1568_v50 = vshrl.u32 %v882_v48, 16  ;;  %v1571_v51 = vshll.u32 %v882_v48, 16  ;;  %v5209_v12 = vcombine.low %v882_v48, %v883_v49  ;;  %v4626_v48 = vld [vmem:[%s5899_s2 + $0xc0] sm:$0xff]  }
  0x81   : > { %4262 = vmatprep.subr.bf16.mxu1 %v4600_v59 }
  0x82   : > { %4183 = vmatmul.mubr.bf16.vlgmr.msra.gmra.mxu0 %v5112_v2  ;;  %v5200_v6 = vrot.slane %v1568_v50, 4  ;;  %v5203_v8 = vrot.slane %v1571_v51, 5  ;;  %v2278_v51 = vshrl.u32 %v3647_v43, 16 }
  0x83   : > { %4215 = vmatmul.mubr.bf16.vlgmr.msra.gmra.mxu1 %v4598_v63  ;;  %4231 = vmatpush3.bf16.msra.mxu0 %v4599_v58  ;;  %v1581_v58 = vshrl.u32 %v883_v49, 16  ;;  %v5189_v63 = vrot.slane %v1553_v44, 5  ;;  %v3648_v44 = vld [vmem:[%s5070_s10 + $0xc4] sm:$0xf]  ;;  %v1436_v49 = vsel %vm5240_vm2, %v5096_v56, %v5080_v37 }
  0x84   : > { %4263 = vmatpush3.bf16.msra.mxu1 %v4600_v59  ;;  %4232 = vmatprep.subr.bf16.mxu0 %v4601_v3  ;;  %v5185_v59 = vrot.slane %v1544_v42, 4  ;;  %v3785_v37 = vcombine.low %v3647_v43, %v3648_v44  ;;  %v2291_v56 = vshrl.u32 %v3648_v44, 16 }
  0x85   : > { %4264 = vmatprep.subr.bf16.mxu1 %v4602_v7  ;;  %4186 = vmatprep.mubr.bf16.mxu0 %v5125_v14  ;;  %v5211_v13 = vrot.slane %v1581_v58, 4  ;;  %v2287_v58 = vshll.u32 %v3648_v44, 16 }
  0x86   : > { %4218 = vmatprep.mubr.bf16.mxu1 %v4604_v9  ;;  %v5205_v9 = vrot.slane %v1577_v55, 5  ;;  %v2281_v55 = vshll.u32 %v3647_v43, 16 }
  0x87   : > { %4233 = vmatpush3.bf16.msra.mxu0 %v4601_v3  ;;  %v4617_v3 = vld [vmem:[%s5899_s2 + $0x90] sm:$0xff]   ;;  %v5283_v43 = vrot.slane %v2287_v58, 5 }
  0x88   : > { %4265 = vmatpush3.bf16.msra.mxu1 %v4602_v7  ;;  %4234 = vmatprep.subr.bf16.mxu0 %v4607_v20  ;;  %v885_v7 = vld [vmem:[%s5070_s10 + $0x54] sm:$0xf] }
  0x89   : > { %4266 = vmatprep.subr.bf16.mxu1 %v4608_v28  ;;  %v1592_v15 = vshrl.u32 %v885_v7, 16  ;;  %v1595_v17 = vshll.u32 %v885_v7, 16 }
  0x8a   : > { %4187 = vmatmul.mubr.bf16.gmra.mxu0 %v5140_v24 }
  0x8b   : > { %4219 = vmatmul.mubr.bf16.gmra.mxu1 %v4606_v27  ;;  %4235 = vmatpush3.bf16.msra.mxu0 %v4607_v20  ;;  %v1605_v20 = vshrl.u32 %v886_v11, 16  ;;  %v866_v27 = vld [vmem:[%s5070_s10 + $0x8] sm:$0x1] }
  0x8c   : > { %4267 = vmatpush3.bf16.msra.mxu1 %v4608_v28  ;;  %4236 = vmatprep.subr.bf16.mxu0 %v4609_v31  ;;  %v1478_v28 = vor.u32 %v5129_v16, %v5117_v4  ;;  %v1443_v36 = vshll.u32 %v866_v27, 16  ;;  %v5231_v4 = vcombine.low %v885_v7, %v886_v11  ;;  %v5233_v16 = vrot.slane %v1595_v17, 5 }
  0x8d   : > { %4268 = vmatprep.subr.bf16.mxu1 %v4610_v34  ;;  %4190 = vmatprep.mubr.bf16.mxu0 %v5164_v38  ;;  %v5271_v17 = vrot.slane %v2281_v55, 5  ;;  %v1550_v55 = vor.u32 %v5187_v60, %v5185_v59 }
  0x8e   : > { %4222 = vmatprep.mubr.bf16.mxu1 %v4612_v41  ;;  %v4625_v41 = vld [vmem:[%s5899_s2 + $0x80] sm:$0xff]   ;;  %v1445_v50 = vrot.slane %v1443_v36, 5 }
  0x8f   : > { %4237 = vmatpush3.bf16.msra.mxu0 %v4609_v31  ;;  %v1488_v31 = vor.u32 %v5138_v23, %v5132_v19  ;;  %v5235_v23 = vrot.slane %v1601_v18, 5  ;;  %v1460_v18 = vsel %vm5240_vm2, %v5107_v61, %v5085_v46  ;;  %v1526_v46 = vor.u32 %v5166_v39, %v5157_v32  ;;  %v4630_v32 = vld [vmem:[%s5899_s2 + $0x178] sm:$0xff]  }
  0x90   : > { %4269 = vmatpush3.bf16.msra.mxu1 %v4610_v34  ;;  %4238 = vmatprep.subr.bf16.mxu0 %v4615_v47  ;;  %v5228_v34 = vrot.slane %v1592_v15, 4  ;;  %v5269_v15 = vrot.slane %v2278_v51, 4  ;;  %v1536_v61 = vor.u32 %v5178_v52, %v5168_v40 }
  0x91   : > { %4270 = vmatprep.subr.bf16.mxu1 %v4616_v54  ;;  %v5263_v7 = vrot.slane %v1488_v31, 4 }
  0x92   : > { %4191 = vmatmul.mubr.bf16.gmra.mxu0 %v5180_v53  ;;  %v1598_v52 = vor.u32 %v5233_v16, %v5228_v34  ;;  %v3662_v16 = vld [vmem:[%s5070_s10 + $0xfc] sm:$0xf] }
  0x93   : > { %4223 = vmatmul.mubr.bf16.gmra.mxu1 %v4614_v1  ;;  %4239 = vmatpush3.bf16.msra.mxu0 %v4615_v47  ;;  %v5248_v47 = vrot.slane %v1605_v20, 4  ;;  %v5259_v1 = vld [vmem:[%s5070_s10 + $0xcc] sm:$0xf]  ;;  %v3651_v20 = vld [vmem:[%s5070_s10 + $0xd0] sm:$0xf] }
  0x94   : > { %4271 = vmatpush3.bf16.msra.mxu1 %v4616_v54  ;;  %4240 = vmatprep.subr.bf16.mxu0 %v4617_v3  ;;  %v869_v54 = vld [vmem:[%s5070_s10 + $0x14] sm:$0x1]  ;;  %v2305_v31 = vshll.u32 %v5259_v1, 16  ;;  %v2311_v36 = vshll.u32 %v3651_v20, 16  ;;  %v2315_v44 = vshrl.u32 %v3651_v20, 16  ;;  %v3786_v58 = vcombine.low %v5259_v1, %v3651_v20 }
  0x95   : > { %4272 = vmatprep.subr.bf16.mxu1 %v4618_v5  ;;  %4194 = vmatprep.mubr.bf16.mxu0 %v5209_v12  ;;  %v1467_v11 = vshll.u32 %v869_v54, 16  ;;  %v872_v54 = vld [vmem:[%s5070_s10 + $0x20] sm:$0x1]  ;;  %v1513_v20 = vrot.slane %v1512_v45, 4 }
  0x96   : > { %4226 = vmatprep.mubr.bf16.mxu1 %v4620_v10  ;;  %v1446_v10 = vsel %vm5240_vm2, %v5098_v57, %v1445_v50  ;;  %v4629_v57 = vld [vmem:[%s5899_s2 + $0x138] sm:$0xff]   ;;  %v5303_v50 = vrot.slane %v2311_v36, 5  ;;  %v5305_v51 = vrot.slane %v2315_v44, 4  ;;  %v4635_v44 = vld [vmem:[%s5899_s2 + $0x128] sm:$0xff]  }
  0x97   : > { %4241 = vmatpush3.bf16.msra.mxu0 %v4617_v3  ;;  %v5261_v3 = vrot.slane %v1478_v28, 4  ;;  %v1469_v27 = vrot.slane %v1467_v11, 5  ;;  %v2302_v28 = vshrl.u32 %v5259_v1, 16  ;;  %v3654_v11 = vld [vmem:[%s5070_s10 + $0xdc] sm:$0xf] }
  0x98   : > { %4273 = vmatpush3.bf16.msra.mxu1 %v4618_v5  ;;  %4242 = vmatprep.subr.bf16.mxu0 %v4623_v21  ;;  %v3753_v5 = vcombine.low %v1436_v49, %v1446_v10  ;;  %v5296_v49 = vrot.slane %v2305_v31, 5  ;;  %v875_v1 = vld [vmem:[%s5070_s10 + $0x2c] sm:$0x1]  ;;  %v2339_v25 = vshrl.u32 %v3654_v11, 16 }
  0x99   : > { %4274 = vmatprep.subr.bf16.mxu1 %v4624_v22  ;;  %v1484_v10 = vsel %vm5240_vm2, %v5261_v3, %v5132_v19  ;;  %v4632_v19 = vld [vmem:[%s5899_s2 + $0x170] sm:$0xff]   ;;  %v1515_v26 = vshll.u32 %v875_v1, 16  ;;  %v4637_v1 = vld [vmem:[%s5899_s2 + $0x120] sm:$0xff]  }
  0x9a   : > { %4195 = vmatmul.mubr.bf16.gmra.mxu0 %v5231_v4 }
  0x9b   : > { %4227 = vmatmul.mubr.bf16.gmra.mxu1 %v4622_v35  ;;  %4243 = vmatpush3.bf16.msra.mxu0 %v4623_v21  ;;  %v5289_v21 = vrot.slane %v2291_v56, 4  ;;  %v5294_v35 = vrot.slane %v2302_v28, 4  ;;  %v3653_v56 = vld [vmem:[%s5070_s10 + $0xd8] sm:$0xf] }
  0x9c   : > { %4275 = vmatpush3.bf16.msra.mxu1 %v4624_v22  ;;  %4244 = vmatprep.subr.bf16.mxu0 %v4625_v41  ;;  %v1470_v22 = vsel %vm5240_vm2, %v5109_v62, %v1469_v27  ;;  %v4631_v62 = vld [vmem:[%s5899_s2 + $0x130] sm:$0xff]   ;;  %v2335_v27 = vshll.u32 %v3654_v11, 16  ;;  %v3787_v28 = vcombine.low %v3653_v56, %v3654_v11 }
  0x9d   : > { %4276 = vmatprep.subr.bf16.mxu1 %v4626_v48  ;;  %4246 = vmatprep.mubr.bf16.mxu0 %v3753_v5  ;;  %v5301_v39 = vcombine.low %v1460_v18, %v1470_v22  ;;  %v1503_v5 = vrot.slane %v1502_v33, 4  ;;  %v2326_v18 = vshrl.u32 %v3653_v56, 16  ;;  %v3656_v33 = vld [vmem:[%s5070_s10 + $0xe4] sm:$0xf] }
  0x9e   : > { %4278 = vmatprep.mubr.bf16.mxu1 %v3785_v37  ;;  %v1491_v37 = vshll.u32 %v872_v54, 16  ;;  %v5336_v36 = vrot.slane %v2335_v27, 5  ;;  %v2350_v45 = vshrl.u32 %v3656_v33, 16  ;;  %v5345_v54 = vrot.slane %v2339_v25, 4 }
  0x9f   : > { %4245 = vmatpush3.bf16.msra.mxu0 %v4625_v41  ;;  %v2329_v41 = vshll.u32 %v3653_v56, 16  ;;  %v1517_v56 = vrot.slane %v1515_v26, 5  ;;  %v1537_v25 = vrot.slane %v1536_v61, 4  ;;  %v1574_v26 = vor.u32 %v5203_v8, %v5200_v6  ;;  %v4638_v6 = vld [vmem:[%s5899_s2 + $0x160] sm:$0xff]  }
  0xa0   : > { %4277 = vmatpush3.bf16.msra.mxu1 %v4626_v48  ;;  %4294 = vmatprep.subr.bf16.mxu0 %v4629_v57  ;;  %v1493_v3 = vrot.slane %v1491_v37, 5  ;;  %v5332_v48 = vrot.slane %v2326_v18, 4  ;;  %v1508_v37 = vsel %vm5240_vm2, %v1503_v5, %v5150_v29  ;;  %v5352_v18 = vrot.slane %v2350_v45, 4 }
  0xa1   : > { %4326 = vmatprep.subr.bf16.mxu1 %v4630_v32  ;;  %v5334_v31 = vrot.slane %v2329_v41, 5  ;;  %v2353_v41 = vshll.u32 %v3656_v33, 16  ;;  %v2363_v29 = vshrl.u32 %v3657_v30, 16  ;;  %v1527_v5 = vrot.slane %v1526_v46, 4 }
  0xa2   : > { %4247 = vmatmul.mubr.bf16.vlgmr.msra.gmra.mxu0 %v5301_v39  ;;  %v1494_v22 = vsel %vm5240_vm2, %v5263_v7, %v1493_v3  ;;  %v4636_v7 = vld [vmem:[%s5899_s2 + $0x168] sm:$0xff]   ;;  %v1560_v3 = vor.u32 %v5191_v0, %v5189_v63  ;;  %v1551_v0 = vrot.slane %v1550_v55, 4  ;;  %v4641_v55 = vld [vmem:[%s5899_s2 + $0x118] sm:$0xff]  }
  0xa3   : > { %4279 = vmatmul.mubr.bf16.vlgmr.msra.gmra.mxu1 %v3786_v58  ;;  %4295 = vmatpush3.bf16.msra.mxu0 %v4629_v57  ;;  %v5350_v11 = vcombine.low %v1484_v10, %v1494_v22  ;;  %v2359_v58 = vshll.u32 %v3657_v30, 16  ;;  %v1518_v57 = vsel %vm5240_vm2, %v1513_v20, %v1517_v56  ;;  %v5362_v10 = vrot.slane %v2353_v41, 5  ;;  %v3659_v22 = vld [vmem:[%s5070_s10 + $0xf0] sm:$0xf] }
  0xa4   : > { %4327 = vmatpush3.bf16.msra.mxu1 %v4630_v32  ;;  %4296 = vmatprep.subr.bf16.mxu0 %v4631_v62  ;;  %v5360_v32 = vcombine.low %v1508_v37, %v1518_v57  ;;  %v3788_v20 = vcombine.low %v3656_v33, %v3657_v30  ;;  %v5371_v46 = vrot.slane %v2363_v29, 4  ;;  %v3660_v37 = vld [vmem:[%s5070_s10 + $0xf4] sm:$0xf]  ;;  %v2374_v61 = vshrl.u32 %v3659_v22, 16  ;;  %v881_v30 = vld [vmem:[%s5070_s10 + $0x44] sm:$0x1] }
  0xa5   : > { %4328 = vmatprep.subr.bf16.mxu1 %v4632_v19  ;;  %4282 = vmatprep.mubr.bf16.mxu1 %v3787_v28  ;;  %v5364_v27 = vrot.slane %v2359_v58, 5  ;;  %v878_v28 = vld [vmem:[%s5070_s10 + $0x38] sm:$0x1]  ;;  %v3789_v8 = vcombine.low %v3659_v22, %v3660_v37  ;;  %v2383_v33 = vshll.u32 %v3660_v37, 16  ;;  %v1532_v59 = vsel %vm5240_vm2, %v1527_v5, %v5168_v40  ;;  %v3663_v29 = vld [vmem:[%s5070_s10 + $0x100] sm:$0xf] }
  0xa6   : > { %4250 = vmatprep.mubr.bf16.mxu0 %v5350_v11  ;;  %v1539_v45 = vshll.u32 %v878_v28, 16  ;;  %v1561_v34 = vrot.slane %v1560_v3, 4  ;;  %v5400_v56 = vrot.slane %v2374_v61, 4  ;;  %v1563_v57 = vshll.u32 %v881_v30, 16  ;;  %v884_v30 = vld [vmem:[%s5070_s10 + $0x50] sm:$0x1] }
  0xa7   : > { %4297 = vmatpush3.bf16.msra.mxu0 %v4631_v62  ;;  %v1584_v62 = vor.u32 %v5211_v13, %v5205_v9  ;;  %v2387_v13 = vshrl.u32 %v3660_v37, 16  ;;  %v5404_v58 = vrot.slane %v2383_v33, 5  ;;  %v1556_v3 = vsel %vm5240_vm2, %v1551_v0, %v5189_v63  ;;  %v4643_v37 = vld [vmem:[%s5899_s2 + $0x110] sm:$0xff]  }
  0xa8   : > { %4329 = vmatpush3.bf16.msra.mxu1 %v4632_v19  ;;  %4298 = vmatprep.subr.bf16.mxu0 %v4635_v44  ;;  %v2377_v19 = vshll.u32 %v3659_v22, 16  ;;  %v1541_v60 = vrot.slane %v1539_v45, 5  ;;  %v1565_v28 = vrot.slane %v1563_v57, 5  ;;  %v2401_v45 = vshll.u32 %v3662_v16, 16  ;;  %v3666_v57 = vld [vmem:[%s5070_s10 + $0x10c] sm:$0xf] }
  0xa9   : > { %4330 = vmatprep.subr.bf16.mxu1 %v4636_v7  ;;  %v5409_v5 = vrot.slane %v2387_v13, 4  ;;  %v2407_v22 = vshll.u32 %v3663_v29, 16  ;;  %v3790_v0 = vcombine.low %v3662_v16, %v3663_v29  ;;  %v2411_v61 = vshrl.u32 %v3663_v29, 16 }
  0xaa   : > { %4251 = vmatmul.mubr.bf16.gmra.mxu0 %v5360_v32  ;;  %v5402_v41 = vrot.slane %v2377_v19, 5  ;;  %v1542_v40 = vsel %vm5240_vm2, %v1537_v25, %v1541_v60  ;;  %v1566_v63 = vsel %vm5240_vm2, %v1561_v34, %v1565_v28  ;;  %v1575_v60 = vrot.slane %v1574_v26, 4 }
  0xab   : > { %4283 = vmatmul.mubr.bf16.gmra.mxu1 %v3788_v20  ;;  %4299 = vmatpush3.bf16.msra.mxu0 %v4635_v44  ;;  %v2398_v44 = vshrl.u32 %v3662_v16, 16  ;;  %v5414_v20 = vcombine.low %v1532_v59, %v1542_v40  ;;  %v5429_v19 = vcombine.low %v1556_v3, %v1566_v63  ;;  %v5431_v33 = vrot.slane %v2407_v22, 5  ;;  %v887_v3 = vld [vmem:[%s5070_s10 + $0x5c] sm:$0x1]  ;;  %v5452_v22 = vld [vmem:[%s5070_s10 + $0x118] sm:$0xf] }
  0xac   : > { %4331 = vmatpush3.bf16.msra.mxu1 %v4636_v7  ;;  %4300 = vmatprep.subr.bf16.mxu0 %v4637_v1  ;;  %v4642_v7 = vld [vmem:[%s5899_s2 + $0x158] sm:$0xff]   ;;  %v1608_v59 = vor.u32 %v5248_v47, %v5235_v23  ;;  %v1585_v13 = vrot.slane %v1584_v62, 4  ;;  %v1587_v34 = vshll.u32 %v884_v30, 16  ;;  %v1599_v16 = vrot.slane %v1598_v52, 4  ;;  %v5447_v62 = vld [vmem:[%s5070_s10 + $0x114] sm:$0xf] }
  0xad   : > { %4332 = vmatprep.subr.bf16.mxu1 %v4638_v6  ;;  %4286 = vmatprep.mubr.bf16.mxu1 %v3789_v8  ;;  %v5419_v25 = vrot.slane %v2398_v44, 4  ;;  %v5427_v8 = vrot.slane %v2401_v45, 5  ;;  %v1580_v47 = vsel %vm5240_vm2, %v1575_v60, %v5205_v9  ;;  %v2431_v28 = vshll.u32 %v3666_v57, 16 }
  0xae   : > { %4254 = vmatprep.mubr.bf16.mxu0 %v5414_v20  ;;  %v1589_v44 = vrot.slane %v1587_v34, 5  ;;  %v5449_v45 = vrot.slane %v2411_v61, 4  ;;  %v2435_v52 = vshrl.u32 %v3666_v57, 16  ;;  %v2284_v63 = vor.u32 %v5271_v17, %v5269_v15  ;;  %v4647_v61 = vld [vmem:[%s5899_s2 + $0x108] sm:$0xff]  }
  0xaf   : > { %4301 = vmatpush3.bf16.msra.mxu0 %v4637_v1  ;;  %v4644_v1 = vld [vmem:[%s5899_s2 + $0x150] sm:$0xff]   ;;  %v1609_v9 = vrot.slane %v1608_v59, 4  ;;  %v2294_v30 = vor.u32 %v5289_v21, %v5283_v43  ;;  %v1604_v59 = vsel %vm5240_vm2, %v1599_v16, %v5235_v23  ;;  %v2446_v21 = vshrl.u32 %v5447_v62, 16 }
  0xb0   : > { %4333 = vmatpush3.bf16.msra.mxu1 %v4638_v6  ;;  %4302 = vmatprep.subr.bf16.mxu0 %v4641_v55  ;;  %v3665_v6 = vld [vmem:[%s5070_s10 + $0x108] sm:$0xf]  ;;  %v2308_v23 = vor.u32 %v5296_v49, %v5294_v35  ;;  %v2455_v16 = vshll.u32 %v5452_v22, 16  ;;  %v2318_v35 = vor.u32 %v5305_v51, %v5303_v50 }
  0xb1   : > { %4334 = vmatprep.subr.bf16.mxu1 %v4642_v7  ;;  %v2422_v29 = vshrl.u32 %v3665_v6, 16  ;;  %v2425_v40 = vshll.u32 %v3665_v6, 16  ;;  %v3791_v26 = vcombine.low %v3665_v6, %v3666_v57  ;;  %v3792_v6 = vcombine.low %v5447_v62, %v5452_v22 }
  0xb2   : > { %4255 = vmatmul.mubr.bf16.gmra.mxu0 %v5429_v19  ;;  %v5481_v57 = vrot.slane %v2435_v52, 4  ;;  %v2319_v51 = vrot.slane %v2318_v35, 4 }
  0xb3   : > { %4287 = vmatmul.mubr.bf16.gmra.mxu1 %v3790_v0  ;;  %4303 = vmatpush3.bf16.msra.mxu0 %v4641_v55  ;;  %v1590_v55 = vsel %vm5240_vm2, %v1585_v13, %v1589_v44  ;;  %v1611_v0 = vshll.u32 %v887_v3, 16  ;;  %v5468_v15 = vrot.slane %v2422_v29, 4  ;;  %v5470_v17 = vrot.slane %v2425_v40, 5  ;;  %v4650_v3 = vld [vmem:[%s5899_s2 + $0x140] sm:$0xff]  }
  0xb4   : > { %4335 = vmatpush3.bf16.msra.mxu1 %v4642_v7  ;;  %4304 = vmatprep.subr.bf16.mxu0 %v4643_v37  ;;  %v4648_v7 = vld [vmem:[%s5899_s2 + $0x148] sm:$0xff]   ;;  %v5466_v60 = vcombine.low %v1580_v47, %v1590_v55  ;;  %v5475_v13 = vrot.slane %v2431_v28, 5  ;;  %v2449_v29 = vshll.u32 %v5447_v62, 16  ;;  %v2459_v40 = vshrl.u32 %v5452_v22, 16  ;;  %v4651_v47 = vld [vmem:[%s5070_s10 + $0x120] sm:$0xff]  }
  0xb5   : > { %4336 = vmatprep.subr.bf16.mxu1 %v4644_v1  ;;  %4290 = vmatprep.mubr.bf16.mxu1 %v3791_v26  ;;  %v1613_v34 = vrot.slane %v1611_v0, 5  ;;  %v2285_v44 = vrot.slane %v2284_v63, 4  ;;  %v5501_v26 = vrot.slane %v2446_v21, 4  ;;  %v3649_v28 = vld [vmem:[%s5070_s10 + $0xc8] sm:$0x1]  ;;  %v2295_v62 = vrot.slane %v2294_v30, 4 }
  0xb6   : > { %4258 = vmatprep.mubr.bf16.mxu0 %v5466_v60  ;;  %v2297_v52 = vshll.u32 %v3649_v28, 16  ;;  %v3652_v55 = vld [vmem:[%s5070_s10 + $0xd4] sm:$0x1]  ;;  %v2332_v63 = vor.u32 %v5334_v31, %v5332_v48  ;;  %v4652_v30 = vld [vmem:[%s5070_s10 + $0x12c] sm:$0xff]   ;;  %v5525_v21 = vrot.slane %v2449_v29, 5  ;;  %v4661_v22 = vld [vmem:[%s5899_s2 + $0x1a0] sm:$0xff]  }
  0xb7   : > { %4305 = vmatpush3.bf16.msra.mxu0 %v4643_v37  ;;  %v1614_v37 = vsel %vm5240_vm2, %v1609_v9, %v1613_v34  ;;  %v2309_v9 = vrot.slane %v2308_v23, 4  ;;  %v2321_v0 = vshll.u32 %v3652_v55, 16  ;;  %v2342_v34 = vor.u32 %v5345_v54, %v5336_v36  ;;  %v4656_v29 = vld [vmem:[%s5899_s2 + $0x1f0] sm:$0xff]  }
  0xb8   : > { %4337 = vmatpush3.bf16.msra.mxu1 %v4644_v1  ;;  %4306 = vmatprep.subr.bf16.mxu0 %v4647_v61  ;;  %v4649_v1 = vld [vmem:[%s5899_s2 + $0x100] sm:$0xff]   ;;  %v5498_v49 = vcombine.low %v1604_v59, %v1614_v37  ;;  %v2299_v59 = vrot.slane %v2297_v52, 5  ;;  %v2333_v37 = vrot.slane %v2332_v63, 4  ;;  %v2380_v55 = vor.u32 %v5402_v41, %v5400_v56 }
  0xb9   : > { %4338 = vmatprep.subr.bf16.mxu1 %v4648_v7  ;;  %v2314_v48 = vsel %vm5240_vm2, %v2309_v9, %v5303_v50  ;;  %v2323_v31 = vrot.slane %v2321_v0, 5  ;;  %v2366_v50 = vor.u32 %v5371_v46, %v5364_v27  ;;  %v2343_v35 = vrot.slane %v2342_v34, 4 }
  0xba   : > { %4259 = vmatmul.mubr.bf16.gmra.mxu0 %v5498_v49  ;;  %v2300_v54 = vsel %vm5240_vm2, %v2295_v62, %v2299_v59  ;;  %v3658_v62 = vld [vmem:[%s5070_s10 + $0xec] sm:$0x1]  ;;  %v2390_v9 = vor.u32 %v5409_v5, %v5404_v58  ;;  %v2338_v0 = vsel %vm5240_vm2, %v2333_v37, %v5336_v36  ;;  %v4658_v59 = vld [vmem:[%s5070_s10 + $0x144] sm:$0xff]   ;;  %v2461_v36 = vrot.slane %v2459_v40, 4 }
  0xbb   : > { %4291 = vmatmul.mubr.bf16.gmra.mxu1 %v3792_v6  ;;  %4307 = vmatpush3.bf16.msra.mxu0 %v4647_v61  ;;  %v2290_v61 = vsel %vm5240_vm2, %v2285_v44, %v5283_v43  ;;  %v2356_v6 = vor.u32 %v5362_v10, %v5352_v18  ;;  %v4654_v43 = vld [vmem:[%s5899_s2 + $0x1f8] sm:$0xff]   ;;  %v4655_v18 = vld [vmem:[%s5899_s2 + $0x1b0] sm:$0xff]   ;;  %v2324_v23 = vsel %vm5240_vm2, %v2319_v51, %v2323_v31  ;;  %v2367_v46 = vrot.slane %v2366_v50, 4  ;;  %v4659_v5 = vld [vmem:[%s5899_s2 + $0x1a8] sm:$0xff]  }
  0xbc   : > { %4339 = vmatpush3.bf16.msra.mxu1 %v4648_v7  ;;  %4308 = vmatprep.subr.bf16.mxu0 %v4649_v1  ;;  %v4653_v7 = vld [vmem:[%s5899_s2 + $0x1b8] sm:$0xff]   ;;  %v3849_v10 = vcombine.low %v2290_v61, %v2300_v54  ;;  %v2369_v52 = vshll.u32 %v3658_v62, 16  ;;  %v5546_v51 = vrot.slane %v2455_v16, 5  ;;  %v2404_v61 = vor.u32 %v5427_v8, %v5419_v25  ;;  %v4660_v8 = vld [vmem:[%s5899_s2 + $0x1e8] sm:$0xff]   ;;  %v4662_v40 = vld [vmem:[%s5899_s2 + $0x1e0] sm:$0xff]  }
  0xbd   : > { %4340 = vmatprep.subr.bf16.mxu1 %v4650_v3  ;;  %4310 = vmatprep.mubr.bf16.mxu0 %v4651_v47  ;;  %v2357_v47 = vrot.slane %v2356_v6, 4  ;;  %v4657_v44 = vld [vmem:[%s5070_s10 + $0x138] sm:$0xff]   ;;  %v4663_v31 = vld [vmem:[%s5070_s10 + $0x150] sm:$0xff]   ;;  %v3664_v54 = vld [vmem:[%s5070_s10 + $0x104] sm:$0x1]  ;;  %v2438_v37 = vor.u32 %v5481_v57, %v5475_v13 }
  0xbe   : > { %4342 = vmatprep.mubr.bf16.mxu1 %v3849_v10  ;;  %v2371_v41 = vrot.slane %v2369_v52, 5  ;;  %v3661_v6 = vld [vmem:[%s5070_s10 + $0xf8] sm:$0x1]  ;;  %v2417_v10 = vshll.u32 %v3664_v54, 16  ;;  %v4668_v62 = vld [vmem:[%s5899_s2 + $0x1d0] sm:$0xff]   ;;  %v4690_v54 = vld [vmem:[%s5070_s10 + $0xa8] sm:$0xff]  }
  0xbf   : > { %4309 = vmatpush3.bf16.msra.mxu0 %v4649_v1  ;;  %v3850_v1 = vcombine.low %v2314_v48, %v2324_v23  ;;  %v2362_v56 = vsel %vm5240_vm2, %v2357_v47, %v5364_v27  ;;  %v2414_v27 = vor.u32 %v5449_v45, %v5431_v33  ;;  %v2391_v48 = vrot.slane %v2390_v9, 4  ;;  %v4665_v57 = vld [vmem:[%s5899_s2 + $0x198] sm:$0xff]  }
  0xc0   : > { %4341 = vmatpush3.bf16.msra.mxu1 %v4650_v3  ;;  %4358 = vmatprep.subr.bf16.mxu0 %v4653_v7  ;;  %v3655_v3 = vld [vmem:[%s5070_s10 + $0xe0] sm:$0x1]  ;;  %v2405_v45 = vrot.slane %v2404_v61, 4  ;;  %v2428_v23 = vor.u32 %v5470_v17, %v5468_v15  ;;  %v2452_v15 = vor.u32 %v5525_v21, %v5501_v26  ;;  %v4666_v26 = vld [vmem:[%s5899_s2 + $0x1d8] sm:$0xff]   ;;  %v2439_v52 = vrot.slane %v2438_v37, 4  ;;  %v4683_v37 = vld [vmem:[%s5899_s2 + $0x208] sm:$0xff]  }
  0xc1   : > { %4390 = vmatprep.subr.bf16.mxu1 %v4654_v43  ;;  %v2345_v28 = vshll.u32 %v3655_v3, 16  ;;  %v2415_v50 = vrot.slane %v2414_v27, 4  ;;  %v2419_v3 = vrot.slane %v2417_v10, 5  ;;  %v4664_v17 = vld [vmem:[%s5070_s10 + $0x15c] sm:$0xff]   ;;  %v948_v10 = vld [vmem:[%s5638_s15 + $0x4] sm:$0xf] }
  0xc2   : > { %4311 = vmatmul.mubr.bf16.vlgmr.msra.gmra.mxu0 %v4652_v30  ;;  %v2372_v30 = vsel %vm5240_vm2, %v2367_v46, %v2371_v41  ;;  %v2429_v21 = vrot.slane %v2428_v23, 4  ;;  %v3667_v46 = vld [vmem:[%s5070_s10 + $0x110] sm:$0x1]  ;;  %v3670_v9 = vld [vmem:[%s5070_s10 + $0x11c] sm:$0x1] }
  0xc3   : > { %4343 = vmatmul.mubr.bf16.vlgmr.msra.gmra.mxu1 %v3850_v1  ;;  %4359 = vmatpush3.bf16.msra.mxu0 %v4653_v7  ;;  %v2347_v63 = vrot.slane %v2345_v28, 5  ;;  %v2381_v7 = vrot.slane %v2380_v55, 4  ;;  %v3852_v34 = vcombine.low %v2362_v56, %v2372_v30  ;;  %v2410_v1 = vsel %vm5240_vm2, %v2405_v45, %v5431_v33  ;;  %v4667_v28 = vld [vmem:[%s5899_s2 + $0x190] sm:$0xff]   ;;  %v4687_v45 = vld [vmem:[%s5070_s10 + $0x84] sm:$0xff]  }
  0xc4   : > { %4391 = vmatpush3.bf16.msra.mxu1 %v4654_v43  ;;  %4360 = vmatprep.subr.bf16.mxu0 %v4655_v18  ;;  %v2393_v43 = vshll.u32 %v3661_v6, 16  ;;  %v2420_v47 = vsel %vm5240_vm2, %v2415_v50, %v2419_v3  ;;  %v2441_v55 = vshll.u32 %v3667_v46, 16  ;;  %v2465_v61 = vshll.u32 %v3670_v9, 16  ;;  %v4670_v30 = vld [vmem:[%s5070_s10 + $0x174] sm:$0xff]   ;;  %v947_v50 = vld [vmem:[%s5638_s15] sm:$0xf] }
  0xc5   : > { %4392 = vmatprep.subr.bf16.mxu1 %v4656_v29  ;;  %4314 = vmatprep.mubr.bf16.mxu0 %v4657_v44  ;;  %v2348_v25 = vsel %vm5240_vm2, %v2343_v35, %v2347_v63  ;;  %v2462_v35 = vor.u32 %v2461_v36, %v5546_v51  ;;  %v3854_v44 = vcombine.low %v2410_v1, %v2420_v47  ;;  %v4676_v6 = vld [vmem:[%s5899_s2 + $0x230] sm:$0xff]   ;;  %v3051_v23 = vshll.u32 %v947_v50, 16 }
  0xc6   : > { %v3851_v16 = vcombine.low %v2338_v0, %v2348_v25  ;;  %v2453_v0 = vrot.slane %v2452_v15, 4  ;;  %v2434_v56 = vsel %vm5240_vm2, %v2429_v21, %v5475_v13  ;;  %v2443_v41 = vrot.slane %v2441_v55, 5  ;;  %v4682_v3 = vld [vmem:[%s5638_s15 + $0xc] sm:$0xff]  }
  0xc7   : > { %4361 = vmatpush3.bf16.msra.mxu0 %v4655_v18  ;;  %v2386_v18 = vsel %vm5240_vm2, %v2381_v7, %v5404_v58  ;;  %v2463_v63 = vrot.slane %v2462_v35, 4  ;;  %v4675_v7 = vld [vmem:[%s5899_s2 + $0x238] sm:$0xff]   ;;  %v3881_v1 = vcombine.low %v947_v50, %v948_v10  ;;  %v4684_v35 = vld [vmem:[%s5899_s2 + $0x200] sm:$0xff]  }
  0xc8   : > { %4393 = vmatpush3.bf16.msra.mxu1 %v4656_v29  ;;  %4346 = vmatprep.mubr.bf16.mxu1 %v3851_v16  ;;  %v2395_v29 = vrot.slane %v2393_v43, 5  ;;  %v2444_v36 = vsel %vm5240_vm2, %v2439_v52, %v2443_v41  ;;  %v2458_v25 = vsel %vm5240_vm2, %v2453_v0, %v5546_v51  ;;  %v4672_v16 = vld [vmem:[%s5899_s2 + $0x1c8] sm:$0xff]   ;;  %v4673_v51 = vld [vmem:[%s5899_s2 + $0x180] sm:$0xff]  }
  0xc9   : > { %4362 = vmatprep.subr.bf16.mxu0 %v4659_v5  ;;  %4394 = vmatprep.subr.bf16.mxu1 %v4660_v8  ;;  %v3855_v13 = vcombine.low %v2434_v56, %v2444_v36  ;;  %v4689_v43 = vld [vmem:[%s5070_s10 + $0x9c] sm:$0xff]  }
  0xca   : > { %4315 = vmatmul.mubr.bf16.gmra.mxu0 %v4658_v59  ;;  %v2396_v58 = vsel %vm5240_vm2, %v2391_v48, %v2395_v29  ;;  %v4669_v59 = vld [vmem:[%s5070_s10 + $0x168] sm:$0xff]   ;;  %v4686_v48 = vld [vmem:[%s5070_s10 + $0x78] sm:$0xff]   ;;  %v3061_v29 = vshrl.u32 %v948_v10, 16 }
  0xcb   : > { %4347 = vmatmul.mubr.bf16.gmra.mxu1 %v3852_v34  ;;  %4363 = vmatpush3.bf16.msra.mxu0 %v4659_v5  ;;  %v3853_v33 = vcombine.low %v2386_v18, %v2396_v58  ;;  %v2467_v5 = vrot.slane %v2465_v61, 5  ;;  %v4685_v34 = vld [vmem:[%s5070_s10 + $0x6c] sm:$0xff]   ;;  %v3057_v18 = vshll.u32 %v948_v10, 16  ;;  %v3053_v58 = vrot.slane %v3051_v23, 5 }
  0xcc   : > { %4395 = vmatpush3.bf16.msra.mxu1 %v4660_v8  ;;  %4364 = vmatprep.subr.bf16.mxu0 %v4661_v22  ;;  %v4671_v8 = vld [vmem:[%s5899_s2 + $0x188] sm:$0xff]  }
  0xcd   : > { %4396 = vmatprep.subr.bf16.mxu1 %v4662_v40  ;;  %4318 = vmatprep.mubr.bf16.mxu0 %v4663_v31  ;;  %v2468_v27 = vsel %vm5240_vm2, %v2463_v63, %v2467_v5  ;;  %v4688_v31 = vld [vmem:[%s5070_s10 + $0x90] sm:$0xff]  }
  0xce   : > { %4350 = vmatprep.mubr.bf16.mxu1 %v3853_v33  ;;  %v949_v33 = vld [vmem:[%s5638_s15 + $0x8] sm:$0x1] }
  0xcf   : > { %4365 = vmatpush3.bf16.msra.mxu0 %v4661_v22  ;;  %v3856_v22 = vcombine.low %v2458_v25, %v2468_v27 }
  0xd0   : > { %4397 = vmatpush3.bf16.msra.mxu1 %v4662_v40  ;;  %4366 = vmatprep.subr.bf16.mxu0 %v4665_v57  ;;  %v4674_v40 = vld [vmem:[%s5899_s2 + $0x1c0] sm:$0xff]  }
  0xd1   : > { %4398 = vmatprep.subr.bf16.mxu1 %v4666_v26 }
  0xd2   : > { %4319 = vmatmul.mubr.bf16.gmra.mxu0 %v4664_v17  ;;  %v3059_v17 = vrot.slane %v3057_v18, 5 }
  0xd3   : > { %4351 = vmatmul.mubr.bf16.gmra.mxu1 %v3854_v44  ;;  %4367 = vmatpush3.bf16.msra.mxu0 %v4665_v57  ;;  %v3063_v57 = vrot.slane %v3061_v29, 4 }
  0xd4   : > { %4399 = vmatpush3.bf16.msra.mxu1 %v4666_v26  ;;  %4368 = vmatprep.subr.bf16.mxu0 %v4667_v28  ;;  %v3067_v26 = vshll.u32 %v949_v33, 16 }
  0xd5   : > { %4400 = vmatprep.subr.bf16.mxu1 %v4668_v62  ;;  %4322 = vmatprep.mubr.bf16.mxu0 %v4669_v59  ;;  %v3064_v47 = vor.u32 %v3063_v57, %v3059_v17 }
  0xd6   : > { %4354 = vmatprep.mubr.bf16.mxu1 %v3855_v13 }
  0xd7   : > { %4369 = vmatpush3.bf16.msra.mxu0 %v4667_v28  ;;  %v3065_v44 = vrot.slane %v3064_v47, 4  ;;  %v3069_v28 = vrot.slane %v3067_v26, 5 }
  0xd8   : > { %4401 = vmatpush3.bf16.msra.mxu1 %v4668_v62  ;;  %4370 = vmatprep.subr.bf16.mxu0 %v4671_v8 }
  0xd9   : > { %4402 = vmatprep.subr.bf16.mxu1 %v4672_v16 }
  0xda   : > { %4323 = vmatmul.mubr.bf16.gmra.mxu0 %v4670_v30 }
  0xdb   : > { %4355 = vmatmul.mubr.bf16.gmra.mxu1 %v3856_v22  ;;  %4371 = vmatpush3.bf16.msra.mxu0 %v4671_v8 }
  0xdc   : > { %4403 = vmatpush3.bf16.msra.mxu1 %v4672_v16  ;;  %4372 = vmatprep.subr.bf16.mxu0 %v4673_v51 }
  0xdd   : > { %4404 = vmatprep.subr.bf16.mxu1 %v4674_v40  ;;  %4374 = vmatprep.mubr.bf16.mxu0 %v5112_v2  ;;  %v4677_v2 = vld [vmem:[%s5899_s2 + $0x228] sm:$0xff]  }
  0xde   : > { %4406 = vmatprep.mubr.bf16.mxu1 %v4685_v34 }
  0xdf   : > { %4373 = vmatpush3.bf16.msra.mxu0 %v4673_v51 }
  0xe0   : > { %4405 = vmatpush3.bf16.msra.mxu1 %v4674_v40  ;;  %4422 = vmatprep.subr.bf16.mxu0 %v4675_v7 }
  0xe1   : > { %4454 = vmatprep.subr.bf16.mxu1 %v4675_v7 }
  0xe2   : > { %4375 = vmatmul.mubr.bf16.vlgmr.msra.gmra.mxu0 %v5125_v14  ;;  %v4678_v14 = vld [vmem:[%s5899_s2 + $0x220] sm:$0xff]  }
  0xe3   : > { %4407 = vmatmul.mubr.bf16.vlgmr.msra.gmra.mxu1 %v4686_v48  ;;  %4423 = vmatpush3.bf16.msra.mxu0 %v4675_v7 }
  0xe4   : > { %4462 = vmatpush3.bf16.msra.mxu1 %v4675_v7  ;;  %4424 = vmatprep.subr.bf16.mxu0 %v4676_v6 }
  0xe5   : > { %4455 = vmatprep.subr.bf16.mxu1 %v4676_v6  ;;  %4378 = vmatprep.mubr.bf16.mxu0 %v5140_v24  ;;  %v4679_v24 = vld [vmem:[%s5899_s2 + $0x218] sm:$0xff]  }
  0xe6   : > { %4410 = vmatprep.mubr.bf16.mxu1 %v4687_v45 }
  0xe7   : > { %4425 = vmatpush3.bf16.msra.mxu0 %v4676_v6 }
  0xe8   : > { %4463 = vmatpush3.bf16.msra.mxu1 %v4676_v6  ;;  %4426 = vmatprep.subr.bf16.mxu0 %v4677_v2 }
  0xe9   : > { %4456 = vmatprep.subr.bf16.mxu1 %v4677_v2 }
  0xea   : > { %4379 = vmatmul.mubr.bf16.gmra.mxu0 %v5164_v38  ;;  %v4680_v38 = vld [vmem:[%s5899_s2 + $0x210] sm:$0xff]  }
  0xeb   : > { %4411 = vmatmul.mubr.bf16.gmra.mxu1 %v4688_v31  ;;  %4427 = vmatpush3.bf16.msra.mxu0 %v4677_v2 }
  0xec   : > { %4464 = vmatpush3.bf16.msra.mxu1 %v4677_v2  ;;  %4428 = vmatprep.subr.bf16.mxu0 %v4678_v14 }
  0xed   : > { %4457 = vmatprep.subr.bf16.mxu1 %v4678_v14  ;;  %4382 = vmatprep.mubr.bf16.mxu0 %v5180_v53  ;;  %v3048_v53 = vshrl.u32 %v947_v50, 16 }
  0xee   : > { %4414 = vmatprep.mubr.bf16.mxu1 %v4689_v43 }
  0xef   : > { %4429 = vmatpush3.bf16.msra.mxu0 %v4678_v14  ;;  %v3050_v15 = vrot.slane %v3048_v53, 4 }
  0xf0   : > { %4465 = vmatpush3.bf16.msra.mxu1 %v4678_v14  ;;  %4430 = vmatprep.subr.bf16.mxu0 %v4679_v24 }
  0xf1   : > { %4458 = vmatprep.subr.bf16.mxu1 %v4679_v24 }
  0xf2   : > { %4383 = vmatmul.mubr.bf16.gmra.mxu0 %v5209_v12  ;;  %v4691_v12 = vld [vmem:[%s5070_s10 + $0xb4] sm:$0xff]   ;;  %s3629_s10 = sshll.u32 %s4754_s17, 4 }
  0xf3   : > { %4415 = vmatmul.mubr.bf16.gmra.mxu1 %v4690_v54  ;;  %4431 = vmatpush3.bf16.msra.mxu0 %v4679_v24  ;;  %p5825_p12 = scmp.lt.s32.totalorder %s3629_s10, 31 }
  0xf4   : > { %4466 = vmatpush3.bf16.msra.mxu1 %v4679_v24  ;;  %4432 = vmatprep.subr.bf16.mxu0 %v4680_v38 }
  0xf5   : > { %4459 = vmatprep.subr.bf16.mxu1 %v4680_v38  ;;  %4386 = vmatprep.mubr.bf16.mxu0 %v5231_v4  ;;  %v3054_v4 = vor.u32 %v3053_v58, %v3050_v15  ;;  %s5948_s10 = smov (!%p5825_p12, %s3629_s10), 31 }
  0xf6   : > { %4418 = vmatprep.mubr.bf16.mxu1 %v4691_v12  ;;  %s3630_s17 = sshll.u32 %s5948_s10, 2 }
  0xf7   : > { %4433 = vmatpush3.bf16.msra.mxu0 %v4680_v38  ;;  %v3055_v21 = vrot.slane %v3054_v4, 4  ;;  %s5862_s23 = scalar_lea.vmem %s5901_s4, %s3630_s17 }
  0xf8   : > { %4467 = vmatpush3.bf16.msra.mxu1 %v4680_v38  ;;  %4434 = vmatprep.subr.bf16.mxu0 %v4683_v37 }
  0xf9   : > { %4460 = vmatprep.subr.bf16.mxu1 %v4683_v37  ;;  %v3060_v62 = vsel %vm5240_vm2, %v3055_v21, %v3059_v17 }
  0xfa   : > { %4387 = vmatmul.mubr.bf16.gmra.mxu0 %v3881_v1 }
  0xfb   : > { %4419 = vmatmul.mubr.bf16.gmra.mxu1 %v4682_v3  ;;  %4435 = vmatpush3.bf16.msra.mxu0 %v4683_v37 }
  0xfc   : > { %4468 = vmatpush3.bf16.msra.mxu1 %v4683_v37  ;;  %4436 = vmatprep.subr.bf16.mxu0 %v4684_v35 }
  0xfd   : > { %4461 = vmatprep.subr.bf16.mxu1 %v4684_v35  ;;  %4438 = vmatprep.mubr.bf16.mxu0 %v5301_v39  ;;  %v3070_v39 = vsel %vm5240_vm2, %v3065_v44, %v3069_v28 }
  0xfe   : > { %4446 = vmatprep.mubr.bf16.mxu1 %v5429_v19  ;;  %v3931_v19 = vcombine.low %v3060_v62, %v3070_v39 }
  0xff   : > { %4437 = vmatpush3.bf16.msra.mxu0 %v4684_v35 }
 0x100   : > { %4469 = vmatpush3.bf16.msra.mxu1 %v4684_v35 }
 0x102   : > { %4439 = vmatmul.mubr.bf16.vlgmr.msra.gmra.mxu0 %v5350_v11 }
 0x103   : > { %4447 = vmatmul.mubr.bf16.vlgmr.msra.gmra.mxu1 %v5466_v60  ;;  %4442 = vmatprep.mubr.bf16.mxu0 %v5360_v32 }
 0x104   : > { %4450 = vmatprep.mubr.bf16.mxu1 %v5498_v49 }
 0x10a   : > { %4443 = vmatmul.mubr.bf16.gmra.mxu0 %v5414_v20 }
 0x10b   : > { %4451 = vmatmul.mubr.bf16.gmra.mxu1 %v3931_v19 }
 0x142   : > { %v4184_v46 = vpop.f32.mrf.mxu0 }
 0x143   : > { %v4216_v52 = vpop.f32.mrf.mxu1 }
 0x144   : > { %v1406_v55 = vadd.f32 %v4216_v52, %v4184_v46  ;;  %v1115_v11 = vpop.f32.mrf.mxu0 }
 0x145   : > { %v1341_v9 = vpop.f32.mrf.mxu1 }
 0x146   : > { %v1404_v60 = vadd.f32 %v1341_v9, %v1115_v11  ;;  %v4185_v0 = vpop.f32.mrf.mxu0 }
 0x147   : > { %v4217_v32 = vpop.f32.mrf.mxu1 }
 0x148   : > { %v1407_v63 = vadd.f32 %v4217_v32, %v4185_v0  ;;  %v1118_v49 = vpop.f32.mrf.mxu0 }
 0x149   : > { %v1344_v61 = vpop.f32.mrf.mxu1 }
 0x14a   : > { %v1405_v59 = vadd.f32 %v1344_v61, %v1118_v49  ;;  %v4188_v56 = vpop.f32.mrf.mxu0 }
 0x14b   : > { %v4220_v41 = vpop.f32.mrf.mxu1 }
 0x14c   : > { %v1410_v42 = vadd.f32 %v4220_v41, %v4188_v56  ;;  %v1131_v5 = vpop.f32.mrf.mxu0 }
 0x14d   : > { %v1357_v36 = vpop.f32.mrf.mxu1 }
 0x14e   : > { %v1408_v25 = vadd.f32 %v1357_v36, %v1131_v5  ;;  %v4189_v20 = vpop.f32.mrf.mxu0 }
 0x14f   : > { %v4221_v8 = vpop.f32.mrf.mxu1 }
 0x150   : > { %v1411_v13 = vadd.f32 %v4221_v8, %v4189_v20  ;;  %v1134_v27 = vpop.f32.mrf.mxu0 }
 0x151   : > { %v1360_v16 = vpop.f32.mrf.mxu1 }
 0x152   : > { %v1409_v30 = vadd.f32 %v1360_v16, %v1134_v27  ;;  %v4192_v22 = vpop.f32.mrf.mxu0 }
 0x153   : > { %v4224_v51 = vpop.f32.mrf.mxu1 }
 0x154   : > { %v1414_v40 = vadd.f32 %v4224_v51, %v4192_v22  ;;  %v1147_v7 = vpop.f32.mrf.mxu0 }
 0x155   : > { %v1373_v34 = vpop.f32.mrf.mxu1 }
 0x156   : > { %v1412_v6 = vadd.f32 %v1373_v34, %v1147_v7  ;;  %v4193_v48 = vpop.f32.mrf.mxu0 }
 0x157   : > { %v4225_v2 = vpop.f32.mrf.mxu1 }
 0x158   : > { %v1415_v45 = vadd.f32 %v4225_v2, %v4193_v48  ;;  %v1150_v14 = vpop.f32.mrf.mxu0 }
 0x159   : > { %v1376_v31 = vpop.f32.mrf.mxu1 }
 0x15a   : > { %v1413_v24 = vadd.f32 %v1376_v31, %v1150_v14  ;;  %v4196_v43 = vpop.f32.mrf.mxu0 }
 0x15b   : > { %v4228_v38 = vpop.f32.mrf.mxu1 }
 0x15c   : > { %v1418_v54 = vadd.f32 %v4228_v38, %v4196_v43  ;;  %v1163_v50 = vpop.f32.mrf.mxu0 }
 0x15d   : > { %v1389_v10 = vpop.f32.mrf.mxu1 }
 0x15e   : > { %v1416_v53 = vadd.f32 %v1389_v10, %v1163_v50  ;;  %v4197_v23 = vpop.f32.mrf.mxu0 }
 0x15f   : > { %v4229_v18 = vpop.f32.mrf.mxu1 }
 0x160   : > { %v1419_v29 = vadd.f32 %v4229_v18, %v4197_v23  ;;  %v1166_v37 = vpop.f32.mrf.mxu0 }
 0x161   : > { %v1392_v12 = vpop.f32.mrf.mxu1 }
 0x162   : > { %v5693_v1 = vadd.f32 %v1392_v12, %v1166_v37  ;;  %v4248_v3 = vpop.f32.mrf.mxu0 }
 0x163   : > { %v1811_v15 = vadd.f32 %v4248_v3, %v1406_v55  ;;  %v4280_v58 = vpop.f32.mrf.mxu1 }
 0x164   : > { %v1746_v17 = vpop.f32.mrf.mxu0 }
 0x165   : > { %v5695_v57 = vadd.f32 %v4280_v58, %v1811_v15  ;;  %v1809_v35 = vadd.f32 %v1746_v17, %v1404_v60  ;;  %v1972_v33 = vpop.f32.mrf.mxu1 }
 0x166   : > { %v4249_v4 = vpop.f32.mrf.mxu0 }
 0x167   : > { %v5697_v47 = vadd.f32 %v1972_v33, %v1809_v35  ;;  %v1812_v26 = vadd.f32 %v4249_v4, %v1407_v63  ;;  %v4281_v21 = vpop.f32.mrf.mxu1 }
 0x168   : > { %v1749_v44 = vpop.f32.mrf.mxu0 }
 0x169   : > { %v5699_v28 = vadd.f32 %v4281_v21, %v1812_v26  ;;  %v1810_v62 = vadd.f32 %v1749_v44, %v1405_v59  ;;  %v1975_v39 = vpop.f32.mrf.mxu1 }
 0x16a   : > { %v4252_v19 = vpop.f32.mrf.mxu0 }
 0x16b   : > { %v5701_v46 = vadd.f32 %v1975_v39, %v1810_v62  ;;  %v1815_v52 = vadd.f32 %v4252_v19, %v1410_v42  ;;  %v4284_v55 = vpop.f32.mrf.mxu1 }
 0x16c   : > { %v1762_v11 = vpop.f32.mrf.mxu0 }
 0x16d   : > { %v5703_v9 = vadd.f32 %v4284_v55, %v1815_v52  ;;  %v1813_v60 = vadd.f32 %v1762_v11, %v1408_v25  ;;  %v1988_v0 = vpop.f32.mrf.mxu1 }
 0x16e   : > { %v4253_v32 = vpop.f32.mrf.mxu0 }
 0x16f   : > { %v5705_v49 = vadd.f32 %v1988_v0, %v1813_v60  ;;  %v1816_v63 = vadd.f32 %v4253_v32, %v1411_v13  ;;  %v4285_v61 = vpop.f32.mrf.mxu1 }
 0x170   : > { %v1765_v56 = vpop.f32.mrf.mxu0 }
 0x171   : > { %v5707_v41 = vadd.f32 %v4285_v61, %v1816_v63  ;;  %v1814_v59 = vadd.f32 %v1765_v56, %v1409_v30  ;;  %v1991_v5 = vpop.f32.mrf.mxu1 }
 0x172   : > { %v4256_v36 = vpop.f32.mrf.mxu0 }
 0x173   : > { %v5709_v20 = vadd.f32 %v1991_v5, %v1814_v59  ;;  %v1819_v42 = vadd.f32 %v4256_v36, %v1414_v40  ;;  %v4288_v8 = vpop.f32.mrf.mxu1 }
 0x174   : > { %v1778_v27 = vpop.f32.mrf.mxu0 }
 0x175   : > { %v5711_v16 = vadd.f32 %v4288_v8, %v1819_v42  ;;  %v1817_v25 = vadd.f32 %v1778_v27, %v1412_v6  ;;  %v2004_v22 = vpop.f32.mrf.mxu1 }
 0x176   : > { %v4257_v51 = vpop.f32.mrf.mxu0 }
 0x177   : > { %v5713_v7 = vadd.f32 %v2004_v22, %v1817_v25  ;;  %v1820_v13 = vadd.f32 %v4257_v51, %v1415_v45  ;;  %v4289_v34 = vpop.f32.mrf.mxu1 }
 0x178   : > { %v1781_v48 = vpop.f32.mrf.mxu0 }
 0x179   : > { %v5715_v2 = vadd.f32 %v4289_v34, %v1820_v13  ;;  %v1818_v30 = vadd.f32 %v1781_v48, %v1413_v24  ;;  %v2007_v14 = vpop.f32.mrf.mxu1 }
 0x17a   : > { %v4260_v40 = vpop.f32.mrf.mxu0 }
 0x17b   : > { %v5717_v31 = vadd.f32 %v2007_v14, %v1818_v30  ;;  %v4292_v43 = vpop.f32.mrf.mxu1  ;;  %v1823_v38 = vadd.f32 %v4260_v40, %v1418_v54 }
 0x17c   : > { %v1794_v10 = vpop.f32.mrf.mxu0 }
 0x17d   : > { %v2020_v50 = vpop.f32.mrf.mxu1  ;;  %v5719_v23 = vadd.f32 %v4292_v43, %v1823_v38  ;;  %v1821_v6 = vadd.f32 %v1794_v10, %v1416_v53 }
 0x17e   : > { %v4261_v37 = vpop.f32.mrf.mxu0 }
 0x17f   : > { %v4293_v18 = vpop.f32.mrf.mxu1  ;;  %v5721_v12 = vadd.f32 %v2020_v50, %v1821_v6  ;;  %v1824_v45 = vadd.f32 %v4261_v37, %v1419_v29 }
 0x180   : > { %v1797_v15 = vpop.f32.mrf.mxu0 }
 0x181   : > { %v2023_v3 = vpop.f32.mrf.mxu1  ;;  %v5723_v58 = vadd.f32 %v4293_v18, %v1824_v45  ;;  %v1822_v24 = vadd.f32 %v1797_v15, %v5693_v1 }
 0x182   : > { %v4312_v17 = vpop.f32.mrf.mxu0 }
 0x183   : > { %v4344_v35 = vpop.f32.mrf.mxu1  ;;  %v5726_v33 = vadd.f32 %v2023_v3, %v1822_v24 }
 0x184   : > { %v2198_v54 = vpop.f32.mrf.mxu0 }
 0x185   : > { %5906 = vst [vmem:[#allocation5_spill] sm:$0xff] %v5726_v33  ;;  %v2600_v4 = vpop.f32.mrf.mxu1 }
 0x186   : > { %v4313_v26 = vpop.f32.mrf.mxu0 }
 0x187   : > { %v5728_v21 = vpop.f32.mrf.mxu1 }
 0x188   : > { %v2201_v53 = vpop.f32.mrf.mxu0 }
 0x189   : > { %v5730_v44 = vpop.f32.mrf.mxu1 }
 0x18a   : > { %v4316_v62 = vpop.f32.mrf.mxu0 }
 0x18b   : > { %v5732_v29 = vpop.f32.mrf.mxu1 }
 0x18c   : > { %v2214_v39 = vpop.f32.mrf.mxu0 }
 0x18d   : > { %v5734_v19 = vpop.f32.mrf.mxu1 }
 0x18e   : > { %v4317_v52 = vpop.f32.mrf.mxu0 }
 0x18f   : > { %v5736_v1 = vpop.f32.mrf.mxu1 }
 0x190   : > { %v2217_v55 = vpop.f32.mrf.mxu0 }
 0x191   : > { %v5738_v11 = vpop.f32.mrf.mxu1 }
 0x192   : > { %v4320_v60 = vpop.f32.mrf.mxu0 }
 0x193   : > { %v4352_v0 = vpop.f32.mrf.mxu1 }
 0x194   : > { %v2230_v32 = vpop.f32.mrf.mxu0 }
 0x195   : > { %v2632_v63 = vpop.f32.mrf.mxu1  ;;  %v2269_v33 = vadd.f32 %v2230_v32, %v5713_v7 }
 0x196   : > { %v4321_v61 = vpop.f32.mrf.mxu0 }
 0x197   : > { %v5740_v56 = vpop.f32.mrf.mxu1 }
 0x198   : > { %v2233_v59 = vpop.f32.mrf.mxu0 }
 0x199   : > { %v5742_v5 = vpop.f32.mrf.mxu1 }
 0x19a   : > { %v4324_v36 = vpop.f32.mrf.mxu0 }
 0x19b   : > { %v5744_v42 = vpop.f32.mrf.mxu1 }
 0x19c   : > { %v2246_v8 = vpop.f32.mrf.mxu0 }
 0x19d   : > { %v5746_v27 = vpop.f32.mrf.mxu1 }
 0x19e   : > { %v4325_v25 = vpop.f32.mrf.mxu0 }
 0x19f   : > { %v5748_v22 = vpop.f32.mrf.mxu1 }
 0x1a0   : > { %v5750_v51 = vpop.f32.mrf.mxu0 }
 0x1a1   : > { %5907 = vst [vmem:[#allocation6_spill] sm:$0xff] %v5750_v51  ;;  %v5752_v13 = vpop.f32.mrf.mxu1  ;;  %v2267_v51 = vadd.f32 %v4316_v62, %v5703_v9  ;;  %v2671_v62 = vadd.f32 %v2632_v63, %v2269_v33 }
 0x1a2   : > { %5908 = vst [vmem:[#allocation7_spill] sm:$0xff] %v5752_v13  ;;  %v4376_v34 = vpop.f32.mrf.mxu0 }
 0x1a3   : > { %v5754_v48 = vpop.f32.mrf.mxu1 }
 0x1a4   : > { %5909 = vst [vmem:[#allocation8_spill] sm:$0xff] %v5754_v48  ;;  %v2784_v30 = vpop.f32.mrf.mxu0 }
 0x1a5   : > { %v5756_v14 = vpop.f32.mrf.mxu1 }
 0x1a6   : > { %5910 = vst [vmem:[#allocation9_spill] sm:$0xff] %v5756_v14  ;;  %v4377_v43 = vpop.f32.mrf.mxu0 }
 0x1a7   : > { %v5758_v40 = vpop.f32.mrf.mxu1 }
 0x1a8   : > { %5911 = vst [vmem:[#allocation10_spill] sm:$0xff] %v5758_v40  ;;  %v5760_v38 = vpop.f32.mrf.mxu0 }
 0x1a9   : > { %5912 = vst [vmem:[#allocation11_spill] sm:$0xff] %v5760_v38  ;;  %v5762_v50 = vpop.f32.mrf.mxu1 }
 0x1aa   : > { %5913 = vst [vmem:[#allocation12_spill] sm:$0xff] %v5762_v50  ;;  %v5764_v10 = vpop.f32.mrf.mxu0 }
 0x1ab   : > { %5914 = vst [vmem:[#allocation13_spill] sm:$0xff] %v5764_v10  ;;  %v5766_v6 = vpop.f32.mrf.mxu1  ;;  %v2263_v10 = vadd.f32 %v4312_v17, %v5695_v57  ;;  %v2268_v17 = vadd.f32 %v4317_v52, %v5707_v41  ;;  %v2276_v41 = vadd.f32 %v4325_v25, %v5723_v58 }
 0x1ac   : > { %5915 = vst [vmem:[#allocation14_spill] sm:$0xff] %v5766_v6  ;;  %v5768_v18 = vpop.f32.mrf.mxu0  ;;  %v2261_v6 = vadd.f32 %v2198_v54, %v5697_v47  ;;  %v2265_v47 = vadd.f32 %v2214_v39, %v5705_v49  ;;  %v2266_v54 = vadd.f32 %v2217_v55, %v5709_v20  ;;  %v2273_v49 = vadd.f32 %v2246_v8, %v5721_v12 }
 0x1ad   : > { %5916 = vst [vmem:[#allocation15_spill] sm:$0xff] %v5768_v18  ;;  %v5770_v37 = vpop.f32.mrf.mxu1 }
 0x1ae   : > { %5917 = vst [vmem:[#allocation16_spill] sm:$0xff] %v5770_v37  ;;  %v5772_v45 = vpop.f32.mrf.mxu0  ;;  %v2271_v37 = vadd.f32 %v4320_v60, %v5711_v16  ;;  %v2663_v57 = vadd.f32 %v2600_v4, %v2261_v6  ;;  %v2675_v33 = vadd.f32 %v5746_v27, %v2273_v49 }
 0x1af   : > { %5918 = vst [vmem:[#allocation17_spill] sm:$0xff] %v5772_v45  ;;  %v5774_v3 = vpop.f32.mrf.mxu1  ;;  %v2264_v45 = vadd.f32 %v4313_v26, %v5699_v28  ;;  %v2270_v26 = vadd.f32 %v2233_v59, %v5717_v31  ;;  %v2667_v31 = vadd.f32 %v5734_v19, %v2265_v47  ;;  %v5922_v19 = vld [vmem:[#allocation5_spill] sm:$0xff]  ;;  %v5932_v47 = vld [vmem:[#allocation10_spill] sm:$0xff] }
 0x1b0   : > { %5919 = vst [vmem:[#allocation18_spill] sm:$0xff] %v5774_v3  ;;  %v5776_v15 = vpop.f32.mrf.mxu0  ;;  %v2262_v3 = vadd.f32 %v2201_v53, %v5701_v46  ;;  %v2673_v28 = vadd.f32 %v4352_v0, %v2271_v37  ;;  %v2272_v46 = vadd.f32 %v4321_v61, %v5715_v2  ;;  %v2669_v53 = vadd.f32 %v5732_v29, %v2267_v51  ;;  %v5925_v8 = vld [vmem:[#allocation11_spill] sm:$0xff] }
 0x1b1   : > { %5920 = vst [vmem:[#allocation19_spill] sm:$0xff] %v5776_v15  ;;  %v5778_v24 = vpop.f32.mrf.mxu1  ;;  %v2666_v9 = vadd.f32 %v5728_v21, %v2264_v45  ;;  %v2668_v21 = vadd.f32 %v5738_v11, %v2266_v54  ;;  %v2847_v52 = vadd.f32 %v2784_v30, %v2663_v57  ;;  %v2672_v58 = vadd.f32 %v5742_v5, %v2270_v26  ;;  %v5931_v57 = vld [vmem:[#allocation7_spill] sm:$0xff] }
 0x1b2   : > { %5921 = vst [vmem:[#allocation20_spill] sm:$0xff] %v5778_v24  ;;  %v4384_v40 = vpop.f32.mrf.mxu0  ;;  %v2665_v24 = vadd.f32 %v4344_v35, %v2263_v10  ;;  %v2275_v35 = vadd.f32 %v4324_v36, %v5719_v23  ;;  %v2664_v7 = vadd.f32 %v5730_v44, %v2262_v3  ;;  %v2670_v23 = vadd.f32 %v5736_v1, %v2268_v17  ;;  %v5923_v1 = vld [vmem:[#allocation6_spill] sm:$0xff]  ;;  %v5924_v36 = vld [vmem:[#allocation8_spill] sm:$0xff]  ;;  %v5926_v25 = vld [vmem:[#allocation13_spill] sm:$0xff] }
 0x1b3   : > { %v4416_v13 = vpop.f32.mrf.mxu1  ;;  %v2857_v2 = vadd.f32 %v4384_v40, %v2673_v28  ;;  %v2674_v12 = vadd.f32 %v5740_v56, %v2272_v46  ;;  %v2678_v29 = vadd.f32 %v5748_v22, %v2276_v41  ;;  %v2274_v63 = vadd.f32 %v5923_v1, %v5922_v19 }
 0x1b4   : > { %v2816_v14 = vpop.f32.mrf.mxu0  ;;  %v2849_v39 = vadd.f32 %v4376_v34, %v2665_v24  ;;  %v2677_v0 = vadd.f32 %v5744_v42, %v2275_v35  ;;  %v2850_v11 = vadd.f32 %v4377_v43, %v2666_v9  ;;  %v2848_v5 = vadd.f32 %v5925_v8, %v2664_v7  ;;  %v5927_v34 = vld [vmem:[#allocation9_spill] sm:$0xff]  ;;  %v5928_v27 = vld [vmem:[#allocation15_spill] sm:$0xff]  ;;  %v5933_v35 = vld [vmem:[#allocation12_spill] sm:$0xff] }
 0x1b5   : > { %v3000_v50 = vpop.f32.mrf.mxu1  ;;  %v2855_v32 = vadd.f32 %v2816_v14, %v2671_v62  ;;  %v2853_v42 = vadd.f32 %v5926_v25, %v2669_v53  ;;  %v3041_v51 = vadd.f32 %v4416_v13, %v2857_v2  ;;  %v3031_v30 = vadd.f32 %v5927_v34, %v2847_v52  ;;  %v5935_v41 = vld [vmem:[#allocation16_spill] sm:$0xff] }
 0x1b6   : > { %v4385_v38 = vpop.f32.mrf.mxu0  ;;  %v3033_v56 = vadd.f32 %v5924_v36, %v2849_v39  ;;  %v2851_v14 = vadd.f32 %v5928_v27, %v2667_v31  ;;  %v5929_v40 = vld [vmem:[#allocation17_spill] sm:$0xff]  ;;  %v2676_v13 = vadd.f32 %v5931_v57, %v2274_v63  ;;  %v3034_v17 = vadd.f32 %v5932_v47, %v2850_v11 }
 0x1b7   : > { %v5782_v18 = vpop.f32.mrf.mxu1  ;;  %v2854_v22 = vadd.f32 %v5929_v40, %v2670_v23  ;;  %v2858_v10 = vadd.f32 %v4385_v38, %v2674_v12  ;;  %v3039_v43 = vadd.f32 %v3000_v50, %v2855_v32  ;;  %v5834_v38 = vld [vmem:[%s5900_s3] ss:$0 sm:$0xff]  ;;  %v3032_v50 = vadd.f32 %v5933_v35, %v2848_v5  ;;  %v5936_v62 = vld [vmem:[#allocation18_spill] sm:$0xff] }
 0x1b8   : > { %v2819_v15 = vpop.f32.mrf.mxu0  ;;  %v3035_v53 = vadd.f32 %v5935_v41, %v2851_v14  ;;  %v5937_v23 = vld [vmem:[#allocation19_spill] sm:$0xff] }
 0x1b9   : > { %v5787_v48 = vpop.f32.mrf.mxu1  ;;  %v2856_v45 = vadd.f32 %v2819_v15, %v2672_v58  ;;  %v5934_v15 = vld [vmem:[#allocation14_spill] sm:$0xff]  ;;  %v3038_v39 = vadd.f32 %v5936_v62, %v2854_v22  ;;  %v2852_v52 = vadd.f32 %v5937_v23, %v2668_v21 }
 0x1ba   : > { %v4388_v16 = vpop.f32.mrf.mxu0  ;;  %v3037_v9 = vadd.f32 %v5934_v15, %v2853_v42 }
 0x1bb   : > { %v5794_v60 = vpop.f32.mrf.mxu1  ;;  %v2861_v54 = vadd.f32 %v4388_v16, %v2677_v0  ;;  %v3042_v16 = vadd.f32 %v5782_v18, %v2858_v10  ;;  %v3040_v12 = vadd.f32 %v5787_v48, %v2856_v45 }
 0x1bc   : > { %v2832_v4 = vpop.f32.mrf.mxu0 }
 0x1bd   : > { %v3016_v20 = vpop.f32.mrf.mxu1  ;;  %v2859_v28 = vadd.f32 %v2832_v4, %v2675_v33  ;;  %v3045_v32 = vadd.f32 %v5794_v60, %v2861_v54 }
 0x1be   : > { %v4389_v44 = vpop.f32.mrf.mxu0 }
 0x1bf   : > { %v4421_v55 = vpop.f32.mrf.mxu1  ;;  %v2862_v4 = vadd.f32 %v4389_v44, %v2678_v29  ;;  %v3043_v33 = vadd.f32 %v3016_v20, %v2859_v28 }
 0x1c0   : > { %v2835_v61 = vpop.f32.mrf.mxu0 }
 0x1c1   : > { %v5815_v59 = vpop.f32.mrf.mxu1  ;;  %v3046_v36 = vadd.f32 %v4421_v55, %v2862_v4 }
 0x1c2   : > { %v4440_v6 = vpop.f32.mrf.mxu0 }
 0x1c3   : > { %v4448_v37 = vpop.f32.mrf.mxu1  ;;  %v3239_v3 = vadd.f32 %v4440_v6, %v3033_v56  ;;  %v2860_v56 = vadd.f32 %v2835_v61, %v2676_v13  ;;  %v5938_v13 = vld [vmem:[#allocation20_spill] sm:$0xff] }
 0x1c4   : > { %v3247_v24 = vadd.f32 %v4448_v37, %v3041_v51  ;;  %v3174_v46 = vpop.f32.mrf.mxu0  ;;  %v3036_v47 = vadd.f32 %v5938_v13, %v2852_v52 }
 0x1c5   : > { %v3206_v26 = vpop.f32.mrf.mxu1  ;;  %v3237_v7 = vadd.f32 %v3174_v46, %v3031_v30  ;;  %v3281_v58 = vadd.f32 %v5834_v38, %v3239_v3 }
 0x1c6   : > { %v3245_v49 = vadd.f32 %v3206_v26, %v3039_v43  ;;  %v4441_v2 = vpop.f32.mrf.mxu0  ;;  %v3289_v0 = vadd.f32 %v5834_v38, %v3247_v24 }
 0x1c7   : > { %v4449_v31 = vpop.f32.mrf.mxu1  ;;  %v3240_v18 = vadd.f32 %v4441_v2, %v3034_v17  ;;  %v3279_v1 = vadd.f32 %v5834_v38, %v3237_v7  ;;  %v3297_v20 = vmax.f32 %v3281_v58, 0.0  ;;  %v3044_v17 = vadd.f32 %v5815_v59, %v2860_v56 }
 0x1c8   : > { %v3248_v44 = vadd.f32 %v4449_v31, %v3042_v16  ;;  %v3177_v29 = vpop.f32.mrf.mxu0  ;;  %v3287_v63 = vadd.f32 %v5834_v38, %v3245_v49  ;;  %v3305_v25 = vmax.f32 %v3289_v0, 0.0 }
 0x1c9   : > { %v3209_v19 = vpop.f32.mrf.mxu1  ;;  %v3238_v11 = vadd.f32 %v3177_v29, %v3032_v50  ;;  %v3282_v48 = vadd.f32 %v5834_v38, %v3240_v18  ;;  %v3295_v61 = vmax.f32 %v3279_v1, 0.0 }
 0x1ca   : > { %v3246_v21 = vadd.f32 %v3209_v19, %v3040_v12  ;;  %v3290_v8 = vadd.f32 %v5834_v38, %v3248_v44  ;;  %v4444_v5 = vpop.f32.mrf.mxu0  ;;  %v3303_v22 = vmax.f32 %v3287_v63, 0.0 }
 0x1cb   : > { %v4452_v60 = vpop.f32.mrf.mxu1  ;;  %v3280_v42 = vadd.f32 %v5834_v38, %v3238_v11  ;;  %v3298_v34 = vmax.f32 %v3282_v48, 0.0  ;;  %v3243_v27 = vadd.f32 %v4444_v5, %v3037_v9 }
 0x1cc   : > { %v3288_v51 = vadd.f32 %v5834_v38, %v3246_v21  ;;  %v3306_v30 = vmax.f32 %v3290_v8, 0.0  ;;  %v3251_v14 = vadd.f32 %v4452_v60, %v3045_v32  ;;  %v3190_v40 = vpop.f32.mrf.mxu0 }
 0x1cd   : > { %v3222_v55 = vpop.f32.mrf.mxu1  ;;  %v3296_v10 = vmax.f32 %v3280_v42, 0.0  ;;  %v3983_v37 = vpack.c.bf16 %v3298_v34, %v3297_v20  ;;  %v3241_v45 = vadd.f32 %v3190_v40, %v3035_v53  ;;  %v3285_v46 = vadd.f32 %v5834_v38, %v3243_v27 }
 0x1ce   : > { %v3304_v6 = vmax.f32 %v3288_v51, 0.0  ;;  %v4003_v43 = vpack.c.bf16 %v3306_v30, %v3305_v25  ;;  %v3249_v3 = vadd.f32 %v3222_v55, %v3043_v33  ;;  %v4445_v24 = vpop.f32.mrf.mxu0  ;;  %v3293_v26 = vadd.f32 %v5834_v38, %v3251_v14 }
 0x1cf   : > { %v4453_v57 = vpop.f32.mrf.mxu1  ;;  %v3978_v54 = vpack.c.bf16 %v3296_v10, %v3295_v61  ;;  %4015 = vst [vmem:[%s5862_s23 + $0x8] sm:$0xff] %v3983_v37   ;;  %v3244_v35 = vadd.f32 %v4445_v24, %v3038_v39  ;;  %v3283_v7 = vadd.f32 %v5834_v38, %v3241_v45  ;;  %v3301_v4 = vmax.f32 %v3285_v46, 0.0 }
 0x1d0   : > { %v3998_v28 = vpack.c.bf16 %v3304_v6, %v3303_v22  ;;  %4019 = vst [vmem:[%s5862_s23 + $0x28] sm:$0xff] %v4003_v43   ;;  %v3252_v50 = vadd.f32 %v4453_v57, %v3046_v36  ;;  %v3193_v15 = vpop.f32.mrf.mxu0  ;;  %v3291_v49 = vadd.f32 %v5834_v38, %v3249_v3  ;;  %v3309_v2 = vmax.f32 %v3293_v26, 0.0 }
 0x1d1   : > { %v3225_v9 = vpop.f32.mrf.mxu1  ;;  %3979 = vst [vmem:[%s5862_s23] sm:$0xff] %v3978_v54   ;;  %v3242_v41 = vadd.f32 %v3193_v15, %v3036_v47  ;;  %v3286_v53 = vadd.f32 %v5834_v38, %v3244_v35  ;;  %v3299_v52 = vmax.f32 %v3283_v7, 0.0 }
 0x1d2   : > { %4018 = vst [vmem:[%s5862_s23 + $0x20] sm:$0xff] %v3998_v28   ;;  %v3250_v59 = vadd.f32 %v3225_v9, %v3044_v17  ;;  %v3294_v62 = vadd.f32 %v5834_v38, %v3252_v50  ;;  %v3307_v12 = vmax.f32 %v3291_v49, 0.0 }
 0x1d3   : > { %v3284_v16 = vadd.f32 %v5834_v38, %v3242_v41  ;;  %v3302_v31 = vmax.f32 %v3286_v53, 0.0 }
 0x1d4   : > { %v3292_v39 = vadd.f32 %v5834_v38, %v3250_v59  ;;  %v3310_v23 = vmax.f32 %v3294_v62, 0.0 }
 0x1d5   : > { %v3300_v58 = vmax.f32 %v3284_v16, 0.0  ;;  %v3993_v32 = vpack.c.bf16 %v3302_v31, %v3301_v4 }
 0x1d6   : > { %v3308_v0 = vmax.f32 %v3292_v39, 0.0  ;;  %v4013_v33 = vpack.c.bf16 %v3310_v23, %v3309_v2 }
 0x1d7   : > { %v3988_v18 = vpack.c.bf16 %v3300_v58, %v3299_v52  ;;  %4017 = vst [vmem:[%s5862_s23 + $0x18] sm:$0xff] %v3993_v32  }
 0x1d8   : > { %v4008_v44 = vpack.c.bf16 %v3308_v0, %v3307_v12  ;;  %4021 = vst [vmem:[%s5862_s23 + $0x38] sm:$0xff] %v4013_v33  }
 0x1d9   : > { %4016 = vst [vmem:[%s5862_s23 + $0x10] sm:$0xff] %v3988_v18  }
 0x1da   : > { %4020 = vst [vmem:[%s5862_s23 + $0x30] sm:$0xff] %v4008_v44  }
 0x1db PF: > { %s14_s19 = sadd.s32 1, %s4762_s19   ;;  %s5939_s15 = smov %s4750_s16 }
 0x1dc   : > { %p11_p13 = scmp.ge.s32.totalorder %s14_s19, 4   ;;  %s5940_s16 = smov %s4848_s24 }
 0x1dd   : > { %s5941_s17 = smov %s4758_s18  ;;  %s5942_s18 = smov %s5944_s20 }
 0x1de   :  { %13 = sbr.rel (!%p11_p13) target bundleno = 3 (0x3), region = 244 }

// kernel: backbone_base_forward.6
= control target key start
LH: loop header
LB: loop body
LE: loop exit
PB: predicated region body
PF: predicated region fallthrough
CT: control target
= control target key end

     0   :  { %s3038_s15 = smov 0   ;;  %s3040_s16 = smov 0   ;;  %s3472_s0 = inlined_call_operand.vmem [shape: bf16[8,3,17,128], index: 0, kind: input, shape index: {}, may-alias: {0,1}]   ;;  %s3473_s1 = inlined_call_operand.vmem [shape: bf16[8,3,17,128], index: 1, kind: input, shape index: {}, may-alias: {0,1}]   ;;  %s3474_s2 = inlined_call_operand.vmem [shape: bf16[3,3,128,128], index: 2, kind: input, shape index: {}]   ;;  %s3475_s3 = inlined_call_operand.vmem [shape: f32[1,128], index: 3, kind: input, shape index: {}]   ;;  %s3476_s4 = inlined_call_operand.vmem [shape: bf16[64,128], index: 4, kind: output, shape index: {}]  }
   0x1   :  { %s3042_s17 = smov 0   ;;  %s3044_s18 = smov 0  }
   0x2   :  { %s3046_s19 = smov 0  }
   0x3 LB: > { %s36_s20 = sadd.s32 1, %s3003_s18  ;;  %p58_p1 = scmp.ne.s32.totalorder %s2995_s16, %s2991_s15  ;;  %s3007_s19 = sphi %s3046_s19, %s14_s19   ;;  %s3003_s18 = sphi %s3044_s18, %s3483_s18   ;;  %s2999_s17 = sphi %s3042_s17, %s3482_s17   ;;  %s2995_s16 = sphi %s3040_s16, %s3481_s16   ;;  %s2991_s15 = sphi %s3038_s15, %s3480_s15  }
   0x4   : > { %p38_p0 = scmp.ge.s32.totalorder %s36_s20, 2  ;;  %p59_p2 = scmp.eq.s32.totalorder %s3007_s19, 0 }
   0x5   : > { %s51_s23 = sadd.s32 1, %s2995_s16  ;;  %p2245_p5 = scmp.ge.s32.totalorder %s3007_s19, 2 }
   0x6   : > { %s3485_s20 = smov (%p38_p0, %s36_s20), 0  ;;  %p3069_p3 = por %p59_p2, %p58_p1 }
   0x7   : > { %s44_s22 = ssub.s32 %s3003_s18, %s3485_s20  ;;  %220 = sbr.rel (%p2245_p5) target bundleno = 48 (0x30), region = 24 }
   0x8   : > { %p49_p4 = scmp.eq.s32.totalorder %s44_s22, 0 }
   0xa   : > { %s3077_s24 = scalar_select %p49_p4, %s2995_s16, %s51_s23  }
   0xc   : > { %223 = sbr.rel (!%p3069_p3) target bundleno = 39 (0x27), region = 28  ;;  %s225_s25 = sand.u32 (%p3069_p3), 1, %s2995_s16  }
   0xd   : > { %s2795_s26 = smul.u32 (%p3069_p3), 144, %s3003_s18  ;;  %s3091_s6 = smov (%p3069_p3), 0  }
   0xe   : > { %s2794_s27 = smul.u32 (%p3069_p3), 96, %s225_s25 }
   0xf   : > { %s3087_s30 = scalar_lea.vmem (%p3069_p3), %s3472_s0, %s2795_s26  }
  0x10   : > { %s3089_s5 = scalar_lea.vmem (%p3069_p3), [#allocation3], %s2794_s27  }
  0x11 LB: >> { %v263_v0 = vld [vmem:[%s3087_s30] sm:$0xf]  ;;  %v265_v1 = vld [vmem:[%s3087_s30 + $0x4] sm:$0xf]  ;;  %v267_v2 = vld [vmem:[%s3087_s30 + $0x8] sm:$0xf]  ;;  %s3011_s6 = sphi %s3091_s6, %s257_s6  }
  0x12   : >> { %264 = vst [vmem:[%s3089_s5] sm:$0xf] %v263_v0  ;;  %266 = vst [vmem:[%s3089_s5 + $0x4] sm:$0xf] %v265_v1  ;;  %v269_v3 = vld [vmem:[%s3087_s30 + $0xc] sm:$0xf]  ;;  %s257_s6 = sadd.s32 1, %s3011_s6  }
  0x13   : >> { %268 = vst [vmem:[%s3089_s5 + $0x8] sm:$0xf] %v267_v2  ;;  %v271_v4 = vld [vmem:[%s3087_s30 + $0x10] sm:$0xf]  ;;  %v273_v5 = vld [vmem:[%s3087_s30 + $0x14] sm:$0xf] }
  0x14   : >> { %270 = vst [vmem:[%s3089_s5 + $0xc] sm:$0xf] %v269_v3  ;;  %272 = vst [vmem:[%s3089_s5 + $0x10] sm:$0xf] %v271_v4  ;;  %v275_v6 = vld [vmem:[%s3087_s30 + $0x24] sm:$0xf] }
  0x15   : >> { %274 = vst [vmem:[%s3089_s5 + $0x14] sm:$0xf] %v273_v5  ;;  %v277_v7 = vld [vmem:[%s3087_s30 + $0x28] sm:$0xf]  ;;  %v279_v8 = vld [vmem:[%s3087_s30 + $0x2c] sm:$0xf] }
  0x16   : >> { %276 = vst [vmem:[%s3089_s5 + $0x18] sm:$0xf] %v275_v6  ;;  %278 = vst [vmem:[%s3089_s5 + $0x1c] sm:$0xf] %v277_v7  ;;  %v281_v9 = vld [vmem:[%s3087_s30 + $0x30] sm:$0xf] }
  0x17   : >> { %280 = vst [vmem:[%s3089_s5 + $0x20] sm:$0xf] %v279_v8  ;;  %v283_v10 = vld [vmem:[%s3087_s30 + $0x34] sm:$0xf]  ;;  %v285_v11 = vld [vmem:[%s3087_s30 + $0x38] sm:$0xf] }
  0x18   : >> { %282 = vst [vmem:[%s3089_s5 + $0x24] sm:$0xf] %v281_v9  ;;  %284 = vst [vmem:[%s3089_s5 + $0x28] sm:$0xf] %v283_v10  ;;  %v287_v12 = vld [vmem:[%s3087_s30 + $0x48] sm:$0xf] }
  0x19   : >> { %286 = vst [vmem:[%s3089_s5 + $0x2c] sm:$0xf] %v285_v11  ;;  %v289_v13 = vld [vmem:[%s3087_s30 + $0x4c] sm:$0xf]  ;;  %v291_v14 = vld [vmem:[%s3087_s30 + $0x50] sm:$0xf] }
  0x1a   : >> { %288 = vst [vmem:[%s3089_s5 + $0x30] sm:$0xf] %v287_v12  ;;  %290 = vst [vmem:[%s3089_s5 + $0x34] sm:$0xf] %v289_v13  ;;  %v293_v15 = vld [vmem:[%s3087_s30 + $0x54] sm:$0xf] }
  0x1b   : >> { %292 = vst [vmem:[%s3089_s5 + $0x38] sm:$0xf] %v291_v14  ;;  %v295_v16 = vld [vmem:[%s3087_s30 + $0x58] sm:$0xf]  ;;  %v297_v17 = vld [vmem:[%s3087_s30 + $0x5c] sm:$0xf] }
  0x1c   : >> { %294 = vst [vmem:[%s3089_s5 + $0x3c] sm:$0xf] %v293_v15  ;;  %296 = vst [vmem:[%s3089_s5 + $0x40] sm:$0xf] %v295_v16  ;;  %v299_v18 = vld [vmem:[%s3087_s30 + $0x6c] sm:$0xf] }
  0x1d   : >> { %298 = vst [vmem:[%s3089_s5 + $0x44] sm:$0xf] %v297_v17  ;;  %v301_v19 = vld [vmem:[%s3087_s30 + $0x70] sm:$0xf]  ;;  %v303_v20 = vld [vmem:[%s3087_s30 + $0x74] sm:$0xf] }
  0x1e   : >> { %300 = vst [vmem:[%s3089_s5 + $0x48] sm:$0xf] %v299_v18  ;;  %302 = vst [vmem:[%s3089_s5 + $0x4c] sm:$0xf] %v301_v19  ;;  %v305_v21 = vld [vmem:[%s3087_s30 + $0x78] sm:$0xf] }
  0x1f   : >> { %304 = vst [vmem:[%s3089_s5 + $0x50] sm:$0xf] %v303_v20  ;;  %v307_v22 = vld [vmem:[%s3087_s30 + $0x7c] sm:$0xf]  ;;  %v309_v23 = vld [vmem:[%s3087_s30 + $0x80] sm:$0xf] }
  0x20   : >> { %306 = vst [vmem:[%s3089_s5 + $0x54] sm:$0xf] %v305_v21  ;;  %308 = vst [vmem:[%s3089_s5 + $0x58] sm:$0xf] %v307_v22  ;;  %p256_p6 = scmp.ge.s32.totalorder %s257_s6, 1 }
  0x21   : >> { %310 = vst [vmem:[%s3089_s5 + $0x5c] sm:$0xf] %v309_v23 }
  0x22   : > { %259 = sbr.rel (!%p256_p6) target bundleno = 17 (0x11), region = 222 }
  0x27 PF: > { %494 = sbr.rel (!%p3069_p3) target bundleno = 48 (0x30), region = 90  ;;  %s496_s7 = sand.u32 (%p3069_p3), 1, %s2995_s16  }
  0x28   : > { %s2255_s8 = smul.u32 (%p3069_p3), 144, %s3003_s18 }
  0x29   : > { %s2796_s9 = smul.u32 (%p3069_p3), 48, %s496_s7 }
  0x2a   : > { %s2119_s12 = scalar_lea.vmem (%p3069_p3), %s3473_s1, %s2255_s8 }
  0x2b   : > { %v2256_v24 = vld [vmem:[%s2119_s12 + $0x18] sm:$0xff] (%p3069_p3)   ;;  %v2258_v25 = vld [vmem:[%s2119_s12 + $0x20] sm:$0xf] (%p3069_p3)  ;;  %s498_s13 = scalar_lea.vmem (%p3069_p3), [#allocation4], %s2796_s9  ;;  %v2261_v27 = vld [vmem:[%s2119_s12 + $0x44] sm:$0xf] (%p3069_p3) }
  0x2c   : > { %v2259_v26 = vld [vmem:[%s2119_s12 + $0x3c] sm:$0xff]   ;;  %525 = vst [vmem:[%s498_s13] sm:$0xff] %v2256_v24   ;;  %529 = vst [vmem:[%s498_s13 + $0x8] sm:$0xf] %v2258_v25  ;;  %v2264_v29 = vld [vmem:[%s2119_s12 + $0x68] sm:$0xf] }
  0x2d   : > { %531 = vst [vmem:[%s498_s13 + $0xc] sm:$0xff] %v2259_v26   ;;  %v2262_v28 = vld [vmem:[%s2119_s12 + $0x60] sm:$0xff]   ;;  %535 = vst [vmem:[%s498_s13 + $0x14] sm:$0xf] %v2261_v27  ;;  %v2267_v31 = vld [vmem:[%s2119_s12 + $0x8c] sm:$0xf] }
  0x2e   : > { %537 = vst [vmem:[%s498_s13 + $0x18] sm:$0xff] %v2262_v28   ;;  %541 = vst [vmem:[%s498_s13 + $0x20] sm:$0xf] %v2264_v29  ;;  %v2265_v30 = vld [vmem:[%s2119_s12 + $0x84] sm:$0xff]  }
  0x2f   : > { %543 = vst [vmem:[%s498_s13 + $0x24] sm:$0xff] %v2265_v30   ;;  %547 = vst [vmem:[%s498_s13 + $0x2c] sm:$0xf] %v2267_v31 }
  0x30 PF: > { %p2268_p7 = scmp.ge.s32.totalorder %s3007_s19, 1  ;;  %p594_p8 = scmp.lt.s32.totalorder %s3007_s19, 3 }
  0x32   : > { %p595_p9 = pnand %p2268_p7, %p594_p8 }
  0x33   : > { %s601_s7 = sand.u32 (!%p595_p9), 1, %s2991_s15  }
  0x34   : > { %598 = sbr.rel (%p595_p9) target bundleno = 426 (0x1aa), region = 131 }
  0x35   : > { %s2797_s12 = smul.u32 (!%p595_p9), 96, %s601_s7 }
  0x36   : > { %s2798_s30 = smul.u32 (!%p595_p9), 48, %s601_s7 }
  0x37   : > { %s3192_s26 = scalar_lea.vmem (!%p595_p9), [#allocation3], %s2797_s12 }
  0x38   : > { %s3328_s12 = scalar_lea.vmem (!%p595_p9), [#allocation4], %s2798_s30 }
  0x39   : > { %v2871_v32 = vld [vmem:[%s3474_s2 + $0x38] sm:$0xff]   ;;  %v2873_v34 = vld [vmem:[%s3474_s2 + $0x30] sm:$0xff]   ;;  %v2875_v36 = vld [vmem:[%s3474_s2 + $0x28] sm:$0xff]   ;;  %vm986_vm0 = vsmask.f32 3328 }
  0x3a   : > { %v2872_v33 = vld [vmem:[%s3474_s2 + $0x78] sm:$0xff]   ;;  %2614 = vmatprep.subr.bf16.mxu0 %v2871_v32  ;;  %v2874_v35 = vld [vmem:[%s3474_s2 + $0x70] sm:$0xff]   ;;  %v2876_v37 = vld [vmem:[%s3474_s2 + $0x68] sm:$0xff]   ;;  %vm987_vm1 = vsmask.f32 7440 }
  0x3b   : > { %2634 = vmatprep.subr.bf16.mxu1 %v2872_v33  ;;  %2615 = vmatpush3.bf16.msra.mxu0 %v2871_v32  ;;  %v2877_v38 = vld [vmem:[%s3474_s2 + $0x20] sm:$0xff]   ;;  %v2879_v40 = vld [vmem:[%s3474_s2 + $0x18] sm:$0xff]   ;;  %v2881_v42 = vld [vmem:[%s3474_s2 + $0x10] sm:$0xff]  }
  0x3c   : > { %2635 = vmatpush3.bf16.msra.mxu1 %v2872_v33  ;;  %2616 = vmatprep.subr.bf16.mxu0 %v2873_v34  ;;  %v2878_v39 = vld [vmem:[%s3474_s2 + $0x60] sm:$0xff]   ;;  %v2880_v41 = vld [vmem:[%s3474_s2 + $0x58] sm:$0xff]   ;;  %v2882_v45 = vld [vmem:[%s3474_s2 + $0x50] sm:$0xff]  }
  0x3d   : > { %2636 = vmatprep.subr.bf16.mxu1 %v2874_v35  ;;  %v694_v43 = vld [vmem:[%s3192_s26] sm:$0xf]  ;;  %v695_v44 = vld [vmem:[%s3192_s26 + $0x4] sm:$0xf]  ;;  %v2888_v47 = vld [vmem:[%s3192_s26 + $0x18] sm:$0xff]  }
  0x3e   : > { %v2287_v46 = vcombine.low %v694_v43, %v695_v44  ;;  %v2883_v48 = vld [vmem:[%s3474_s2 + $0x8] sm:$0xff]   ;;  %2650 = vmatprep.mubr.bf16.mxu1 %v2888_v47  ;;  %v2885_v50 = vld [vmem:[%s3474_s2] sm:$0xff]   ;;  %v990_v52 = vshrl.u32 %v694_v43, 16  ;;  %v993_v53 = vshll.u32 %v694_v43, 16  ;;  %v999_v54 = vshll.u32 %v695_v44, 16  ;;  %v2891_v60 = vld [vmem:[%s3474_s2 + $0xb8] sm:$0xff]  }
  0x3f   : > { %2617 = vmatpush3.bf16.msra.mxu0 %v2873_v34  ;;  %v2884_v49 = vld [vmem:[%s3474_s2 + $0x48] sm:$0xff]   ;;  %v2886_v51 = vld [vmem:[%s3474_s2 + $0x40] sm:$0xff]   ;;  %v1003_v55 = vshrl.u32 %v695_v44, 16  ;;  %v698_v57 = vld [vmem:[%s3192_s26 + $0x10] sm:$0xf] }
  0x40   : > { %2637 = vmatpush3.bf16.msra.mxu1 %v2874_v35  ;;  %2618 = vmatprep.subr.bf16.mxu0 %v2875_v36  ;;  %v697_v56 = vld [vmem:[%s3192_s26 + $0xc] sm:$0xf]  ;;  %v992_v58 = vrot.slane %v990_v52, 4  ;;  %v995_v59 = vrot.slane %v993_v53, 5  ;;  %v2892_v61 = vld [vmem:[%s3474_s2 + $0xf8] sm:$0xff]   ;;  %v1001_v62 = vrot.slane %v999_v54, 5  ;;  %vm3240_vm2 = vmor %vm986_vm0, %vm987_vm1 }
  0x41   : > { %2638 = vmatprep.subr.bf16.mxu1 %v2876_v37  ;;  %2630 = vmatprep.mubr.bf16.mxu0 %v2287_v46  ;;  %v1005_v63 = vrot.slane %v1003_v55, 4  ;;  %v3220_v0 = vcombine.low %v697_v56, %v698_v57  ;;  %v3223_v1 = vld [vmem:[%s3192_s26 + $0x24] sm:$0xff]   ;;  %v2893_v3 = vld [vmem:[%s3474_s2 + $0xb0] sm:$0xff]   ;;  %v1014_v12 = vshrl.u32 %v697_v56, 16  ;;  %v1017_v19 = vshll.u32 %v697_v56, 16  ;;  %v2899_v27 = vld [vmem:[%s3474_s2 + $0x98] sm:$0xff]  }
  0x42   : > { %v996_v2 = vor.u32 %v995_v59, %v992_v58  ;;  %v2894_v4 = vld [vmem:[%s3474_s2 + $0xf0] sm:$0xff]   ;;  %v2895_v7 = vld [vmem:[%s3474_s2 + $0xa8] sm:$0xff]   ;;  %v2897_v14 = vld [vmem:[%s3474_s2 + $0xa0] sm:$0xff]   ;;  %v1023_v20 = vshll.u32 %v698_v57, 16  ;;  %v1027_v21 = vshrl.u32 %v698_v57, 16 }
  0x43   : > { %2619 = vmatpush3.bf16.msra.mxu0 %v2875_v36  ;;  %v1006_v5 = vor.u32 %v1005_v63, %v1001_v62  ;;  %v2896_v8 = vld [vmem:[%s3474_s2 + $0xe8] sm:$0xff]   ;;  %v2275_v17 = vld [vmem:[%s3192_s26 + $0x30] sm:$0xf]  ;;  %v2276_v18 = vld [vmem:[%s3192_s26 + $0x34] sm:$0xf]  ;;  %v1016_v26 = vrot.slane %v1014_v12, 4 }
  0x44   : > { %2639 = vmatpush3.bf16.msra.mxu1 %v2876_v37  ;;  %2620 = vmatprep.subr.bf16.mxu0 %v2877_v38  ;;  %v997_v6 = vrot.slane %v996_v2, 4  ;;  %v696_v9 = vld [vmem:[%s3192_s26 + $0x8] sm:$0x1]  ;;  %v2898_v22 = vld [vmem:[%s3474_s2 + $0xe0] sm:$0xff]   ;;  %v2365_v23 = vcombine.low %v2275_v17, %v2276_v18  ;;  %v1019_v28 = vrot.slane %v1017_v19, 5  ;;  %v1025_v29 = vrot.slane %v1023_v20, 5 }
  0x45   : > { %2640 = vmatprep.subr.bf16.mxu1 %v2878_v39  ;;  %v1007_v10 = vrot.slane %v1006_v5, 4  ;;  %v1009_v11 = vshll.u32 %v696_v9, 16  ;;  %v1029_v30 = vrot.slane %v1027_v21, 4  ;;  %v2900_v31 = vld [vmem:[%s3474_s2 + $0xd8] sm:$0xff]   ;;  %v2901_v32 = vld [vmem:[%s3474_s2 + $0x90] sm:$0xff]   ;;  %v1424_v34 = vshrl.u32 %v2275_v17, 16 }
  0x46   : > { %v1002_v15 = vsel %vm3240_vm2, %v997_v6, %v1001_v62  ;;  %v699_v33 = vld [vmem:[%s3192_s26 + $0x14] sm:$0x1]  ;;  %v1427_v35 = vshll.u32 %v2275_v17, 16  ;;  %v1020_v36 = vor.u32 %v1019_v28, %v1016_v26  ;;  %v2904_v46 = vld [vmem:[%s3474_s2 + $0xc8] sm:$0xff]   ;;  %v2906_v53 = vld [vmem:[%s3474_s2 + $0xc0] sm:$0xff]  }
  0x47   : > { %2621 = vmatpush3.bf16.msra.mxu0 %v2877_v38  ;;  %v1011_v16 = vrot.slane %v1009_v11, 5  ;;  %v2902_v37 = vld [vmem:[%s3474_s2 + $0xd0] sm:$0xff]   ;;  %v1433_v38 = vshll.u32 %v2276_v18, 16  ;;  %v1426_v43 = vrot.slane %v1424_v34, 4  ;;  %v2278_v54 = vld [vmem:[%s3192_s26 + $0x3c] sm:$0xf] }
  0x48   : > { %2641 = vmatpush3.bf16.msra.mxu1 %v2878_v39  ;;  %2622 = vmatprep.subr.bf16.mxu0 %v2879_v40  ;;  %v1437_v39 = vshrl.u32 %v2276_v18, 16  ;;  %v1429_v44 = vrot.slane %v1427_v35, 5  ;;  %v2279_v58 = vld [vmem:[%s3192_s26 + $0x40] sm:$0xf]  ;;  %v2907_v59 = vld [vmem:[%s3474_s2 + $0x138] sm:$0xff]   ;;  %v2911_v5 = vld [vmem:[%s3474_s2 + $0x130] sm:$0xff]  }
  0x49   : > { %2642 = vmatprep.subr.bf16.mxu1 %v2880_v41  ;;  %v1012_v24 = vsel %vm3240_vm2, %v1007_v10, %v1011_v16  ;;  %v1435_v47 = vrot.slane %v1433_v38, 5  ;;  %v2277_v62 = vld [vmem:[%s3192_s26 + $0x38] sm:$0x1]  ;;  %v2912_v6 = vld [vmem:[%s3474_s2 + $0x170] sm:$0xff]   ;;  %v2913_v12 = vld [vmem:[%s3474_s2 + $0x128] sm:$0xff]   ;;  %v1451_v17 = vshll.u32 %v2278_v54, 16 }
  0x4a   : > { %v2339_v25 = vcombine.low %v1002_v15, %v1012_v24  ;;  %v1430_v52 = vor.u32 %v1429_v44, %v1426_v43  ;;  %v1448_v15 = vshrl.u32 %v2278_v54, 16  ;;  %v2915_v16 = vld [vmem:[%s3474_s2 + $0x120] sm:$0xff]   ;;  %v1457_v19 = vshll.u32 %v2279_v58, 16  ;;  %v2918_v24 = vld [vmem:[%s3474_s2 + $0x158] sm:$0xff]   ;;  %v2919_v34 = vld [vmem:[%s3474_s2 + $0x110] sm:$0xff]  }
  0x4b   : > { %2623 = vmatpush3.bf16.msra.mxu0 %v2879_v40  ;;  %v1030_v40 = vor.u32 %v1029_v30, %v1025_v29  ;;  %v2916_v18 = vld [vmem:[%s3474_s2 + $0x160] sm:$0xff]   ;;  %v1461_v20 = vshrl.u32 %v2279_v58, 16  ;;  %v2920_v38 = vld [vmem:[%s3474_s2 + $0x150] sm:$0xff]  }
  0x4c   : > { %2643 = vmatpush3.bf16.msra.mxu1 %v2880_v41  ;;  %2624 = vmatprep.subr.bf16.mxu0 %v2881_v42  ;;  %v2903_v41 = vld [vmem:[%s3474_s2 + $0x88] sm:$0xff]   ;;  %v1450_v21 = vrot.slane %v1448_v15, 4  ;;  %v3334_v26 = vld [vmem:[%s3328_s12 + $0x4] sm:$0xf] }
  0x4d   : > { %2644 = vmatprep.subr.bf16.mxu1 %v2882_v45  ;;  %v1855_v30 = vshll.u32 %v3334_v26, 16  ;;  %v2930_v13 = vld [vmem:[%s3474_s2 + $0x1f0] sm:$0xff]   ;;  %v2941_v15 = vld [vmem:[%s3474_s2 + $0x180] sm:$0xff]  }
  0x4f   : > { %2625 = vmatpush3.bf16.msra.mxu0 %v2881_v42  ;;  %v1033_v42 = vshll.u32 %v699_v33, 16  ;;  %v1859_v33 = vshrl.u32 %v3334_v26, 16 }
  0x50   : > { %2645 = vmatpush3.bf16.msra.mxu1 %v2882_v45  ;;  %2626 = vmatprep.subr.bf16.mxu0 %v2883_v48  ;;  %v1021_v45 = vrot.slane %v1020_v36, 4 }
  0x51   : > { %2646 = vmatprep.subr.bf16.mxu1 %v2884_v49 }
  0x52   : > { %v1026_v56 = vsel %vm3240_vm2, %v1021_v45, %v1025_v29 }
  0x53   : > { %2627 = vmatpush3.bf16.msra.mxu0 %v2883_v48  ;;  %v1439_v48 = vrot.slane %v1437_v39, 4  ;;  %v1861_v39 = vrot.slane %v1859_v33, 4 }
  0x54   : > { %2647 = vmatpush3.bf16.msra.mxu1 %v2884_v49  ;;  %2628 = vmatprep.subr.bf16.mxu0 %v2885_v50  ;;  %v1031_v49 = vrot.slane %v1030_v40, 4 }
  0x55   : > { %2648 = vmatprep.subr.bf16.mxu1 %v2886_v51  ;;  %v1440_v55 = vor.u32 %v1439_v48, %v1435_v47 }
  0x57   : > { %2629 = vmatpush3.bf16.msra.mxu0 %v2885_v50  ;;  %v1035_v50 = vrot.slane %v1033_v42, 5  ;;  %v1441_v2 = vrot.slane %v1440_v55, 4  ;;  %v2921_v42 = vld [vmem:[%s3474_s2 + $0x108] sm:$0xff]   ;;  %v2924_v55 = vld [vmem:[%s3474_s2 + $0x140] sm:$0xff]  }
  0x58   : > { %2649 = vmatpush3.bf16.msra.mxu1 %v2886_v51  ;;  %2654 = vmatprep.subr.bf16.mxu0 %v2891_v60  ;;  %v2905_v51 = vld [vmem:[%s3474_s2 + $0x80] sm:$0xff]  }
  0x59   : > { %2674 = vmatprep.subr.bf16.mxu1 %v2892_v61  ;;  %v1036_v57 = vsel %vm3240_vm2, %v1031_v49, %v1035_v50  ;;  %v719_v49 = vld [vmem:[%s3328_s12 + $0x8] sm:$0x1]  ;;  %v2923_v50 = vld [vmem:[%s3474_s2 + $0x100] sm:$0xff]  }
  0x5a   : > { %2631 = vmatmul.mubr.bf16.vlgmr.msra.gmra.mxu0 %v3220_v0  ;;  %v3294_v63 = vcombine.low %v1026_v56, %v1036_v57 }
  0x5b   : > { %2651 = vmatmul.mubr.bf16.vlgmr.msra.gmra.mxu1 %v3223_v1  ;;  %2655 = vmatpush3.bf16.msra.mxu0 %v2891_v60  ;;  %v1431_v60 = vrot.slane %v1430_v52, 4 }
  0x5c   : > { %2675 = vmatpush3.bf16.msra.mxu1 %v2892_v61  ;;  %2656 = vmatprep.subr.bf16.mxu0 %v2893_v3  ;;  %v2910_v61 = vld [vmem:[%s3474_s2 + $0x178] sm:$0xff]  }
  0x5d   : > { %2676 = vmatprep.subr.bf16.mxu1 %v2894_v4  ;;  %2690 = vmatprep.mubr.bf16.mxu1 %v2365_v23  ;;  %v1453_v23 = vrot.slane %v1451_v17, 5  ;;  %v2944_v17 = vld [vmem:[%s3474_s2 + $0x238] sm:$0xff]  }
  0x5e   : > { %2670 = vmatprep.mubr.bf16.mxu0 %v2339_v25  ;;  %v3331_v25 = vld [vmem:[%s3328_s12] sm:$0xf] }
  0x5f   : > { %2657 = vmatpush3.bf16.msra.mxu0 %v2893_v3  ;;  %v1443_v3 = vshll.u32 %v2277_v62, 16  ;;  %v1846_v28 = vshrl.u32 %v3331_v25, 16  ;;  %v1849_v29 = vshll.u32 %v3331_v25, 16  ;;  %v2928_v62 = vld [vmem:[%s3474_s2 + $0x1f8] sm:$0xff]  }
  0x60   : > { %2677 = vmatpush3.bf16.msra.mxu1 %v2894_v4  ;;  %2658 = vmatprep.subr.bf16.mxu0 %v2895_v7  ;;  %v2366_v4 = vcombine.low %v2278_v54, %v2279_v58  ;;  %v1865_v54 = vshll.u32 %v719_v49, 16  ;;  %v2927_v58 = vld [vmem:[%s3474_s2 + $0x1b8] sm:$0xff]  }
  0x61   : > { %2678 = vmatprep.subr.bf16.mxu1 %v2896_v8  ;;  %v1445_v9 = vrot.slane %v1443_v3, 5  ;;  %v1848_v35 = vrot.slane %v1846_v28, 4  ;;  %v1851_v36 = vrot.slane %v1849_v29, 5  ;;  %v2926_v3 = vld [vmem:[%s3192_s26 + $0x54] sm:$0xff]  }
  0x62   : > { %v1867_v57 = vrot.slane %v1865_v54, 5 }
  0x63   : > { %2659 = vmatpush3.bf16.msra.mxu0 %v2895_v7  ;;  %v2925_v7 = vld [vmem:[%s3192_s26 + $0x48] sm:$0xff]   ;;  %v1446_v10 = vsel %vm3240_vm2, %v1441_v2, %v1445_v9  ;;  %v1852_v40 = vor.u32 %v1851_v36, %v1848_v35  ;;  %v2934_v9 = vld [vmem:[%s3474_s2 + $0x1e0] sm:$0xff]  }
  0x64   : > { %2679 = vmatpush3.bf16.msra.mxu1 %v2896_v8  ;;  %2660 = vmatprep.subr.bf16.mxu0 %v2897_v14  ;;  %v1436_v8 = vsel %vm3240_vm2, %v1431_v60, %v1435_v47 }
  0x65   : > { %2680 = vmatprep.subr.bf16.mxu1 %v2898_v22  ;;  %v2417_v11 = vcombine.low %v1436_v8, %v1446_v10  ;;  %v1853_v47 = vrot.slane %v1852_v40, 4  ;;  %v2933_v8 = vld [vmem:[%s3474_s2 + $0x1a0] sm:$0xff]   ;;  %v2937_v10 = vld [vmem:[%s3474_s2 + $0x190] sm:$0xff]  }
  0x67   : > { %2661 = vmatpush3.bf16.msra.mxu0 %v2897_v14  ;;  %v2914_v14 = vld [vmem:[%s3474_s2 + $0x168] sm:$0xff]  }
  0x68   : > { %2681 = vmatpush3.bf16.msra.mxu1 %v2898_v22  ;;  %2662 = vmatprep.subr.bf16.mxu0 %v2899_v27  ;;  %v2917_v22 = vld [vmem:[%s3474_s2 + $0x118] sm:$0xff]  }
  0x69   : > { %2682 = vmatprep.subr.bf16.mxu1 %v2900_v31 }
  0x6b   : > { %2663 = vmatpush3.bf16.msra.mxu0 %v2899_v27  ;;  %v1459_v27 = vrot.slane %v1457_v19, 5  ;;  %v2945_v19 = vld [vmem:[%s3328_s12 + $0xc] sm:$0xff]  }
  0x6c   : > { %2683 = vmatpush3.bf16.msra.mxu1 %v2900_v31  ;;  %2664 = vmatprep.subr.bf16.mxu0 %v2901_v32  ;;  %v1463_v31 = vrot.slane %v1461_v20, 4  ;;  %v2946_v20 = vld [vmem:[%s3474_s2 + $0x230] sm:$0xff]  }
  0x6d   : > { %2684 = vmatprep.subr.bf16.mxu1 %v2902_v37 }
  0x6e   : > { %v1464_v43 = vor.u32 %v1463_v31, %v1459_v27 }
  0x6f   : > { %2665 = vmatpush3.bf16.msra.mxu0 %v2901_v32  ;;  %v2280_v32 = vld [vmem:[%s3192_s26 + $0x44] sm:$0x1]  ;;  %s2269_s26 = sshll.u32 %s2999_s17, 2 }
  0x70   : > { %2685 = vmatpush3.bf16.msra.mxu1 %v2902_v37  ;;  %2666 = vmatprep.subr.bf16.mxu0 %v2903_v41  ;;  %v1857_v37 = vrot.slane %v1855_v30, 5  ;;  %v1467_v44 = vshll.u32 %v2280_v32, 16  ;;  %p676_p10 = scmp.lt.s32.totalorder %s2269_s26, 7 }
  0x71   : > { %2686 = vmatprep.subr.bf16.mxu1 %v2904_v46 }
  0x72   : > { %v1862_v45 = vor.u32 %v1861_v39, %v1857_v37  ;;  %v1469_v52 = vrot.slane %v1467_v44, 5  ;;  %v1858_v56 = vsel %vm3240_vm2, %v1853_v47, %v1857_v37  ;;  %s3487_s26 = smov (!%p676_p10, %s2269_s26), 7 }
  0x73   : > { %2667 = vmatpush3.bf16.msra.mxu0 %v2903_v41  ;;  %v1454_v41 = vor.u32 %v1453_v23, %v1450_v21  ;;  %v2947_v21 = vld [vmem:[%s3474_s2 + $0x228] sm:$0xff]   ;;  %v2949_v23 = vld [vmem:[%s3474_s2 + $0x218] sm:$0xff]   ;;  %s2270_s17 = sshll.u32 %s3487_s26, 2 }
  0x74   : > { %2687 = vmatpush3.bf16.msra.mxu1 %v2904_v46  ;;  %2668 = vmatprep.subr.bf16.mxu0 %v2905_v51  ;;  %v2922_v46 = vld [vmem:[%s3474_s2 + $0x148] sm:$0xff]   ;;  %s682_s28 = scalar_lea.vmem %s3476_s4, %s2270_s17 }
  0x75   : > { %2688 = vmatprep.subr.bf16.mxu1 %v2906_v53  ;;  %v1455_v48 = vrot.slane %v1454_v41, 4 }
  0x77   : > { %2669 = vmatpush3.bf16.msra.mxu0 %v2905_v51  ;;  %v1465_v51 = vrot.slane %v1464_v43, 4 }
  0x78   : > { %2689 = vmatpush3.bf16.msra.mxu1 %v2906_v53  ;;  %2694 = vmatprep.subr.bf16.mxu0 %v2907_v59  ;;  %v1863_v53 = vrot.slane %v1862_v45, 4 }
  0x79   : > { %2714 = vmatprep.subr.bf16.mxu1 %v2910_v61  ;;  %v1470_v60 = vsel %vm3240_vm2, %v1465_v51, %v1469_v52 }
  0x7a   : > { %2671 = vmatmul.mubr.bf16.vlgmr.msra.gmra.mxu0 %v3294_v63 }
  0x7b   : > { %2695 = vmatpush3.bf16.msra.mxu0 %v2907_v59  ;;  %2691 = vmatmul.mubr.bf16.vlgmr.msra.gmra.mxu1 %v2366_v4  ;;  %v1460_v59 = vsel %vm3240_vm2, %v1455_v48, %v1459_v27 }
  0x7c   : > { %2715 = vmatpush3.bf16.msra.mxu1 %v2910_v61  ;;  %2696 = vmatprep.subr.bf16.mxu0 %v2911_v5  ;;  %v1868_v61 = vsel %vm3240_vm2, %v1863_v53, %v1867_v57  ;;  %v2418_v4 = vcombine.low %v1460_v59, %v1470_v60 }
  0x7d   : > { %2716 = vmatprep.subr.bf16.mxu1 %v2912_v6  ;;  %2710 = vmatprep.mubr.bf16.mxu0 %v2925_v7  ;;  %v3374_v2 = vcombine.low %v1858_v56, %v1868_v61  ;;  %v2932_v7 = vld [vmem:[%s3474_s2 + $0x1e8] sm:$0xff]  }
  0x7e   : > { %2730 = vmatprep.mubr.bf16.mxu1 %v2417_v11  ;;  %v2938_v11 = vld [vmem:[%s3474_s2 + $0x1d0] sm:$0xff]  }
  0x7f   : > { %2697 = vmatpush3.bf16.msra.mxu0 %v2911_v5  ;;  %v2929_v5 = vld [vmem:[%s3474_s2 + $0x1b0] sm:$0xff]  }
  0x80   : > { %2717 = vmatpush3.bf16.msra.mxu1 %v2912_v6  ;;  %2698 = vmatprep.subr.bf16.mxu0 %v2913_v12  ;;  %v2931_v6 = vld [vmem:[%s3474_s2 + $0x1a8] sm:$0xff]  }
  0x81   : > { %2718 = vmatprep.subr.bf16.mxu1 %v2914_v14 }
  0x83   : > { %2699 = vmatpush3.bf16.msra.mxu0 %v2913_v12  ;;  %v2939_v12 = vld [vmem:[%s3474_s2 + $0x188] sm:$0xff]  }
  0x84   : > { %2719 = vmatpush3.bf16.msra.mxu1 %v2914_v14  ;;  %2700 = vmatprep.subr.bf16.mxu0 %v2915_v16  ;;  %v2940_v14 = vld [vmem:[%s3474_s2 + $0x1c8] sm:$0xff]  }
  0x85   : > { %2720 = vmatprep.subr.bf16.mxu1 %v2916_v18 }
  0x87   : > { %2701 = vmatpush3.bf16.msra.mxu0 %v2915_v16  ;;  %v2942_v16 = vld [vmem:[%s3474_s2 + $0x1c0] sm:$0xff]  }
  0x88   : > { %2721 = vmatpush3.bf16.msra.mxu1 %v2916_v18  ;;  %2702 = vmatprep.subr.bf16.mxu0 %v2917_v22  ;;  %v2443_v18 = vcombine.low %v3331_v25, %v3334_v26  ;;  %v2952_v25 = vld [vmem:[%s3474_s2 + $0x200] sm:$0xff]  }
  0x89   : > { %2722 = vmatprep.subr.bf16.mxu1 %v2918_v24 }
  0x8b   : > { %2703 = vmatpush3.bf16.msra.mxu0 %v2917_v22  ;;  %v2948_v22 = vld [vmem:[%s3474_s2 + $0x220] sm:$0xff]  }
  0x8c   : > { %2723 = vmatpush3.bf16.msra.mxu1 %v2918_v24  ;;  %2704 = vmatprep.subr.bf16.mxu0 %v2919_v34  ;;  %v2950_v24 = vld [vmem:[%s3474_s2 + $0x210] sm:$0xff]  }
  0x8d   : > { %2724 = vmatprep.subr.bf16.mxu1 %v2920_v38 }
  0x8f   : > { %2705 = vmatpush3.bf16.msra.mxu0 %v2919_v34 }
  0x90   : > { %2725 = vmatpush3.bf16.msra.mxu1 %v2920_v38  ;;  %2706 = vmatprep.subr.bf16.mxu0 %v2921_v42 }
  0x91   : > { %2726 = vmatprep.subr.bf16.mxu1 %v2922_v46 }
  0x93   : > { %2707 = vmatpush3.bf16.msra.mxu0 %v2921_v42 }
  0x94   : > { %2727 = vmatpush3.bf16.msra.mxu1 %v2922_v46  ;;  %2708 = vmatprep.subr.bf16.mxu0 %v2923_v50 }
  0x95   : > { %2728 = vmatprep.subr.bf16.mxu1 %v2924_v55 }
  0x97   : > { %2709 = vmatpush3.bf16.msra.mxu0 %v2923_v50 }
  0x98   : > { %2729 = vmatpush3.bf16.msra.mxu1 %v2924_v55  ;;  %2734 = vmatprep.subr.bf16.mxu0 %v2927_v58 }
  0x99   : > { %2754 = vmatprep.subr.bf16.mxu1 %v2928_v62 }
  0x9a   : > { %2711 = vmatmul.mubr.bf16.vlgmr.msra.gmra.mxu0 %v2926_v3 }
  0x9b   : > { %2735 = vmatpush3.bf16.msra.mxu0 %v2927_v58  ;;  %2731 = vmatmul.mubr.bf16.vlgmr.msra.gmra.mxu1 %v2418_v4 }
  0x9c   : > { %2755 = vmatpush3.bf16.msra.mxu1 %v2928_v62  ;;  %2736 = vmatprep.subr.bf16.mxu0 %v2929_v5 }
  0x9d   : > { %2756 = vmatprep.subr.bf16.mxu1 %v2930_v13  ;;  %2750 = vmatprep.mubr.bf16.mxu0 %v3220_v0  ;;  %v2935_v0 = vld [vmem:[%s3474_s2 + $0x198] sm:$0xff]  }
  0x9e   : > { %2770 = vmatprep.mubr.bf16.mxu1 %v3223_v1  ;;  %v2936_v1 = vld [vmem:[%s3474_s2 + $0x1d8] sm:$0xff]  }
  0x9f   : > { %2737 = vmatpush3.bf16.msra.mxu0 %v2929_v5 }
  0xa0   : > { %2757 = vmatpush3.bf16.msra.mxu1 %v2930_v13  ;;  %2738 = vmatprep.subr.bf16.mxu0 %v2931_v6 }
  0xa1   : > { %2758 = vmatprep.subr.bf16.mxu1 %v2932_v7 }
  0xa3   : > { %2739 = vmatpush3.bf16.msra.mxu0 %v2931_v6 }
  0xa4   : > { %2759 = vmatpush3.bf16.msra.mxu1 %v2932_v7  ;;  %2740 = vmatprep.subr.bf16.mxu0 %v2933_v8 }
  0xa5   : > { %2760 = vmatprep.subr.bf16.mxu1 %v2934_v9 }
  0xa7   : > { %2741 = vmatpush3.bf16.msra.mxu0 %v2933_v8 }
  0xa8   : > { %2761 = vmatpush3.bf16.msra.mxu1 %v2934_v9  ;;  %2742 = vmatprep.subr.bf16.mxu0 %v2935_v0 }
  0xa9   : > { %2762 = vmatprep.subr.bf16.mxu1 %v2936_v1 }
  0xab   : > { %2743 = vmatpush3.bf16.msra.mxu0 %v2935_v0 }
  0xac   : > { %2763 = vmatpush3.bf16.msra.mxu1 %v2936_v1  ;;  %2744 = vmatprep.subr.bf16.mxu0 %v2937_v10 }
  0xad   : > { %2764 = vmatprep.subr.bf16.mxu1 %v2938_v11 }
  0xaf   : > { %2745 = vmatpush3.bf16.msra.mxu0 %v2937_v10 }
  0xb0   : > { %2765 = vmatpush3.bf16.msra.mxu1 %v2938_v11  ;;  %2746 = vmatprep.subr.bf16.mxu0 %v2939_v12 }
  0xb1   : > { %2766 = vmatprep.subr.bf16.mxu1 %v2940_v14 }
  0xb3   : > { %2747 = vmatpush3.bf16.msra.mxu0 %v2939_v12 }
  0xb4   : > { %2767 = vmatpush3.bf16.msra.mxu1 %v2940_v14  ;;  %2748 = vmatprep.subr.bf16.mxu0 %v2941_v15 }
  0xb5   : > { %2768 = vmatprep.subr.bf16.mxu1 %v2942_v16 }
  0xb7   : > { %2749 = vmatpush3.bf16.msra.mxu0 %v2941_v15 }
  0xb8   : > { %2769 = vmatpush3.bf16.msra.mxu1 %v2942_v16  ;;  %2774 = vmatprep.subr.bf16.mxu0 %v2944_v17 }
  0xba   : > { %2751 = vmatmul.mubr.bf16.vlgmr.msra.gmra.mxu0 %v2443_v18 }
  0xbb   : > { %2775 = vmatpush3.bf16.msra.mxu0 %v2944_v17  ;;  %2771 = vmatmul.mubr.bf16.vlgmr.msra.gmra.mxu1 %v2945_v19 }
  0xbc   : > { %2776 = vmatprep.subr.bf16.mxu0 %v2946_v20  ;;  %2790 = vmatprep.mubr.bf16.mxu0 %v3294_v63  ;;  %v2951_v63 = vld [vmem:[%s3474_s2 + $0x208] sm:$0xff]  }
  0xbf   : > { %2777 = vmatpush3.bf16.msra.mxu0 %v2946_v20 }
  0xc0   : > { %2778 = vmatprep.subr.bf16.mxu0 %v2947_v21 }
  0xc3   : > { %2779 = vmatpush3.bf16.msra.mxu0 %v2947_v21 }
  0xc4   : > { %2780 = vmatprep.subr.bf16.mxu0 %v2948_v22 }
  0xc7   : > { %2781 = vmatpush3.bf16.msra.mxu0 %v2948_v22 }
  0xc8   : > { %2782 = vmatprep.subr.bf16.mxu0 %v2949_v23 }
  0xcb   : > { %2783 = vmatpush3.bf16.msra.mxu0 %v2949_v23 }
  0xcc   : > { %2784 = vmatprep.subr.bf16.mxu0 %v2950_v24 }
  0xcf   : > { %2785 = vmatpush3.bf16.msra.mxu0 %v2950_v24 }
  0xd0   : > { %2786 = vmatprep.subr.bf16.mxu0 %v2951_v63 }
  0xd3   : > { %2787 = vmatpush3.bf16.msra.mxu0 %v2951_v63 }
  0xd4   : > { %2788 = vmatprep.subr.bf16.mxu0 %v2952_v25 }
  0xd7   : > { %2789 = vmatpush3.bf16.msra.mxu0 %v2952_v25 }
  0xda   : > { %2791 = vmatmul.mubr.bf16.vlgmr.msra.gmra.mxu0 %v3374_v2 }
 0x11a   : > { %v2632_v26 = vpop.f32.mrf.mxu0 }
 0x11b   : > { %v2652_v27 = vpop.f32.mrf.mxu1 }
 0x11c   : > { %v837_v28 = vpop.f32.mrf.mxu0  ;;  %v984_v48 = vadd.f32 %v2652_v27, %v2632_v26  ;;  %v2502_v27 = vld [vmem:[%s3475_s3] ss:$0 sm:$0xff] }
 0x11d   : > { %v967_v29 = vpop.f32.mrf.mxu1 }
 0x11e   : > { %v2633_v30 = vpop.f32.mrf.mxu0  ;;  %v982_v47 = vadd.f32 %v967_v29, %v837_v28 }
 0x11f   : > { %v2653_v31 = vpop.f32.mrf.mxu1 }
 0x120   : > { %v840_v32 = vpop.f32.mrf.mxu0  ;;  %v985_v51 = vadd.f32 %v2653_v31, %v2633_v30 }
 0x121   : > { %v970_v34 = vpop.f32.mrf.mxu1 }
 0x122   : > { %v983_v55 = vadd.f32 %v970_v34, %v840_v32 }
 0x13a   : > { %v2672_v33 = vpop.f32.mrf.mxu0 }
 0x13b   : > { %v2692_v36 = vpop.f32.mrf.mxu1  ;;  %v1161_v53 = vadd.f32 %v2672_v33, %v984_v48 }
 0x13c   : > { %v1144_v35 = vpop.f32.mrf.mxu0 }
 0x13d   : > { %v1274_v38 = vpop.f32.mrf.mxu1  ;;  %v1159_v52 = vadd.f32 %v1144_v35, %v982_v47  ;;  %v1291_v60 = vadd.f32 %v2692_v36, %v1161_v53 }
 0x13e   : > { %v2673_v37 = vpop.f32.mrf.mxu0 }
 0x13f   : > { %v2693_v40 = vpop.f32.mrf.mxu1  ;;  %v1162_v56 = vadd.f32 %v2673_v37, %v985_v51  ;;  %v1289_v58 = vadd.f32 %v1274_v38, %v1159_v52 }
 0x140   : > { %v1147_v39 = vpop.f32.mrf.mxu0 }
 0x141   : > { %v1277_v42 = vpop.f32.mrf.mxu1  ;;  %v1160_v59 = vadd.f32 %v1147_v39, %v983_v55  ;;  %v1292_v2 = vadd.f32 %v2693_v40, %v1162_v56 }
 0x143   : > { %v1290_v5 = vadd.f32 %v1277_v42, %v1160_v59 }
 0x15a   : > { %v2712_v41 = vpop.f32.mrf.mxu0 }
 0x15b   : > { %v2732_v44 = vpop.f32.mrf.mxu1  ;;  %v1421_v4 = vadd.f32 %v2712_v41, %v1291_v60 }
 0x15c   : > { %v1404_v43 = vpop.f32.mrf.mxu0 }
 0x15d   : > { %v1578_v46 = vpop.f32.mrf.mxu1  ;;  %v1419_v3 = vadd.f32 %v1404_v43, %v1289_v58  ;;  %v1595_v0 = vadd.f32 %v2732_v44, %v1421_v4 }
 0x15e   : > { %v2713_v45 = vpop.f32.mrf.mxu0 }
 0x15f   : > { %v2733_v50 = vpop.f32.mrf.mxu1  ;;  %v1422_v13 = vadd.f32 %v2713_v45, %v1292_v2  ;;  %v1593_v8 = vadd.f32 %v1578_v46, %v1419_v3 }
 0x160   : > { %v1407_v49 = vpop.f32.mrf.mxu0 }
 0x161   : > { %v1581_v57 = vpop.f32.mrf.mxu1  ;;  %v1420_v9 = vadd.f32 %v1407_v49, %v1290_v5  ;;  %v1596_v1 = vadd.f32 %v2733_v50, %v1422_v13 }
 0x163   : > { %v1594_v15 = vadd.f32 %v1581_v57, %v1420_v9 }
 0x17a   : > { %v2752_v54 = vpop.f32.mrf.mxu0 }
 0x17b   : > { %v2772_v62 = vpop.f32.mrf.mxu1  ;;  %v1719_v11 = vadd.f32 %v2752_v54, %v1595_v0 }
 0x17c   : > { %v1702_v61 = vpop.f32.mrf.mxu0 }
 0x17d   : > { %v1826_v7 = vpop.f32.mrf.mxu1  ;;  %v1717_v10 = vadd.f32 %v1702_v61, %v1593_v8  ;;  %v1843_v20 = vadd.f32 %v2772_v62, %v1719_v11 }
 0x17e   : > { %v2753_v6 = vpop.f32.mrf.mxu0 }
 0x17f   : > { %v2773_v14 = vpop.f32.mrf.mxu1  ;;  %v1720_v16 = vadd.f32 %v2753_v6, %v1596_v1  ;;  %v1841_v18 = vadd.f32 %v1826_v7, %v1717_v10 }
 0x180   : > { %v1705_v12 = vpop.f32.mrf.mxu0 }
 0x181   : > { %v1718_v19 = vadd.f32 %v1705_v12, %v1594_v15  ;;  %v1829_v21 = vpop.f32.mrf.mxu1  ;;  %v1844_v23 = vadd.f32 %v2773_v14, %v1720_v16 }
 0x183   : > { %v1842_v26 = vadd.f32 %v1829_v21, %v1718_v19 }
 0x19a   : > { %v2792_v17 = vpop.f32.mrf.mxu0 }
 0x19b   : > { %v1989_v63 = vadd.f32 %v2792_v17, %v1843_v20 }
 0x19c   : > { %v1972_v22 = vpop.f32.mrf.mxu0 }
 0x19d   : > { %v1987_v24 = vadd.f32 %v1972_v22, %v1841_v18  ;;  %v2007_v33 = vadd.f32 %v2502_v27, %v1989_v63 }
 0x19e   : > { %v2793_v25 = vpop.f32.mrf.mxu0 }
 0x19f   : > { %v1990_v28 = vadd.f32 %v2793_v25, %v1844_v23  ;;  %v2005_v30 = vadd.f32 %v2502_v27, %v1987_v24  ;;  %v2011_v38 = vmax.f32 %v2007_v33, 0.0 }
 0x1a0   : > { %v1975_v29 = vpop.f32.mrf.mxu0 }
 0x1a1   : > { %v2008_v31 = vadd.f32 %v2502_v27, %v1990_v28  ;;  %v1988_v32 = vadd.f32 %v1975_v29, %v1842_v26  ;;  %v2009_v36 = vmax.f32 %v2005_v30, 0.0 }
 0x1a3   : > { %v2006_v34 = vadd.f32 %v2502_v27, %v1988_v32  ;;  %v2012_v35 = vmax.f32 %v2008_v31, 0.0 }
 0x1a5   : > { %v2010_v37 = vmax.f32 %v2006_v34, 0.0  ;;  %v2521_v40 = vpack.c.bf16 %v2012_v35, %v2011_v38 }
 0x1a7   : > { %v2516_v39 = vpack.c.bf16 %v2010_v37, %v2009_v36  ;;  %2523 = vst [vmem:[%s682_s28 + $0x8] sm:$0xff] %v2521_v40  }
 0x1a9   : > { %2517 = vst [vmem:[%s682_s28] sm:$0xff] %v2516_v39  }
 0x1aa PF: > { %s14_s19 = sadd.s32 1, %s3007_s19   ;;  %s3480_s15 = smov %s2995_s16 }
 0x1ab   : > { %p11_p11 = scmp.ge.s32.totalorder %s14_s19, 4   ;;  %s3481_s16 = smov %s3077_s24 }
 0x1ac   : > { %s3482_s17 = smov %s3003_s18  ;;  %s3483_s18 = smov %s3485_s20 }
 0x1ad   :  { %13 = sbr.rel (!%p11_p11) target bundleno = 3 (0x3), region = 244 }

// kernel: backbone_base_forward.5
= control target key start
LH: loop header
LB: loop body
LE: loop exit
PB: predicated region body
PF: predicated region fallthrough
CT: control target
= control target key end

     0   :  { %s3658_s15 = smov 0   ;;  %s3660_s16 = smov 0   ;;  %s4310_s0 = inlined_call_operand.vmem [shape: bf16[8,5,17,128], index: 0, kind: input, shape index: {}, may-alias: {0,1}]   ;;  %s4311_s1 = inlined_call_operand.vmem [shape: bf16[8,5,17,128], index: 1, kind: input, shape index: {}, may-alias: {0,1}]   ;;  %s4312_s2 = inlined_call_operand.vmem [shape: bf16[3,3,128,128], index: 2, kind: input, shape index: {}]   ;;  %s4313_s3 = inlined_call_operand.vmem [shape: f32[1,128], index: 3, kind: input, shape index: {}]   ;;  %s4314_s4 = inlined_call_operand.vmem [shape: bf16[128,128], index: 4, kind: output, shape index: {}]  }
   0x1   :  { %s3662_s17 = smov 0   ;;  %s3664_s18 = smov 0  }
   0x2   :  { %s3666_s19 = smov 0  }
   0x3 LB: > { %s36_s20 = sadd.s32 1, %s3623_s18  ;;  %p58_p1 = scmp.ne.s32.totalorder %s3615_s16, %s3611_s15  ;;  %s3627_s19 = sphi %s3666_s19, %s14_s19   ;;  %s3623_s18 = sphi %s3664_s18, %s4332_s18   ;;  %s3619_s17 = sphi %s3662_s17, %s4331_s17   ;;  %s3615_s16 = sphi %s3660_s16, %s4330_s16   ;;  %s3611_s15 = sphi %s3658_s15, %s4329_s15  }
   0x4   : > { %p38_p0 = scmp.ge.s32.totalorder %s36_s20, 2  ;;  %p59_p2 = scmp.eq.s32.totalorder %s3627_s19, 0 }
   0x5   : > { %s51_s23 = sadd.s32 1, %s3615_s16  ;;  %p2741_p5 = scmp.ge.s32.totalorder %s3627_s19, 2 }
   0x6   : > { %s4334_s20 = smov (%p38_p0, %s36_s20), 0  ;;  %p3689_p3 = por %p59_p2, %p58_p1 }
   0x7   : > { %s44_s22 = ssub.s32 %s3623_s18, %s4334_s20  ;;  %220 = sbr.rel (%p2741_p5) target bundleno = 64 (0x40), region = 24 }
   0x8   : > { %p49_p4 = scmp.eq.s32.totalorder %s44_s22, 0 }
   0xa   : > { %s3697_s24 = scalar_select %p49_p4, %s3615_s16, %s51_s23  }
   0xc   : > { %223 = sbr.rel (!%p3689_p3) target bundleno = 55 (0x37), region = 28  ;;  %s225_s25 = sand.u32 (%p3689_p3), 1, %s3615_s16  }
   0xd   : > { %s3407_s26 = smul.u32 (%p3689_p3), 240, %s3623_s18  ;;  %s3711_s6 = smov (%p3689_p3), 0  }
   0xe   : > { %s3406_s27 = smul.u32 (%p3689_p3), 192, %s225_s25 }
   0xf   : > { %s3707_s30 = scalar_lea.vmem (%p3689_p3), %s4310_s0, %s3407_s26  }
  0x10   : > { %s3709_s5 = scalar_lea.vmem (%p3689_p3), [#allocation3], %s3406_s27  }
  0x11 LB: >> { %v263_v0 = vld [vmem:[%s3707_s30] sm:$0xf]  ;;  %v265_v1 = vld [vmem:[%s3707_s30 + $0x4] sm:$0xf]  ;;  %v267_v2 = vld [vmem:[%s3707_s30 + $0x8] sm:$0xf]  ;;  %s3631_s6 = sphi %s3711_s6, %s257_s6  }
  0x12   : >> { %264 = vst [vmem:[%s3709_s5] sm:$0xf] %v263_v0  ;;  %266 = vst [vmem:[%s3709_s5 + $0x4] sm:$0xf] %v265_v1  ;;  %v269_v3 = vld [vmem:[%s3707_s30 + $0xc] sm:$0xf]  ;;  %s257_s6 = sadd.s32 1, %s3631_s6  }
  0x13   : >> { %268 = vst [vmem:[%s3709_s5 + $0x8] sm:$0xf] %v267_v2  ;;  %v271_v4 = vld [vmem:[%s3707_s30 + $0x10] sm:$0xf]  ;;  %v273_v5 = vld [vmem:[%s3707_s30 + $0x14] sm:$0xf] }
  0x14   : >> { %270 = vst [vmem:[%s3709_s5 + $0xc] sm:$0xf] %v269_v3  ;;  %272 = vst [vmem:[%s3709_s5 + $0x10] sm:$0xf] %v271_v4  ;;  %v275_v6 = vld [vmem:[%s3707_s30 + $0x18] sm:$0xf] }
  0x15   : >> { %274 = vst [vmem:[%s3709_s5 + $0x14] sm:$0xf] %v273_v5  ;;  %v277_v7 = vld [vmem:[%s3707_s30 + $0x1c] sm:$0xf]  ;;  %v279_v8 = vld [vmem:[%s3707_s30 + $0x20] sm:$0xf] }
  0x16   : >> { %276 = vst [vmem:[%s3709_s5 + $0x18] sm:$0xf] %v275_v6  ;;  %278 = vst [vmem:[%s3709_s5 + $0x1c] sm:$0xf] %v277_v7  ;;  %v281_v9 = vld [vmem:[%s3707_s30 + $0x24] sm:$0xf] }
  0x17   : >> { %280 = vst [vmem:[%s3709_s5 + $0x20] sm:$0xf] %v279_v8  ;;  %v283_v10 = vld [vmem:[%s3707_s30 + $0x28] sm:$0xf]  ;;  %v285_v11 = vld [vmem:[%s3707_s30 + $0x2c] sm:$0xf] }
  0x18   : >> { %282 = vst [vmem:[%s3709_s5 + $0x24] sm:$0xf] %v281_v9  ;;  %284 = vst [vmem:[%s3709_s5 + $0x28] sm:$0xf] %v283_v10  ;;  %v287_v12 = vld [vmem:[%s3707_s30 + $0x3c] sm:$0xf] }
  0x19   : >> { %286 = vst [vmem:[%s3709_s5 + $0x2c] sm:$0xf] %v285_v11  ;;  %v289_v13 = vld [vmem:[%s3707_s30 + $0x40] sm:$0xf]  ;;  %v291_v14 = vld [vmem:[%s3707_s30 + $0x44] sm:$0xf] }
  0x1a   : >> { %288 = vst [vmem:[%s3709_s5 + $0x30] sm:$0xf] %v287_v12  ;;  %290 = vst [vmem:[%s3709_s5 + $0x34] sm:$0xf] %v289_v13  ;;  %v293_v15 = vld [vmem:[%s3707_s30 + $0x48] sm:$0xf] }
  0x1b   : >> { %292 = vst [vmem:[%s3709_s5 + $0x38] sm:$0xf] %v291_v14  ;;  %v295_v16 = vld [vmem:[%s3707_s30 + $0x4c] sm:$0xf]  ;;  %v297_v17 = vld [vmem:[%s3707_s30 + $0x50] sm:$0xf] }
  0x1c   : >> { %294 = vst [vmem:[%s3709_s5 + $0x3c] sm:$0xf] %v293_v15  ;;  %296 = vst [vmem:[%s3709_s5 + $0x40] sm:$0xf] %v295_v16  ;;  %v299_v18 = vld [vmem:[%s3707_s30 + $0x54] sm:$0xf] }
  0x1d   : >> { %298 = vst [vmem:[%s3709_s5 + $0x44] sm:$0xf] %v297_v17  ;;  %v301_v19 = vld [vmem:[%s3707_s30 + $0x58] sm:$0xf]  ;;  %v303_v20 = vld [vmem:[%s3707_s30 + $0x5c] sm:$0xf] }
  0x1e   : >> { %300 = vst [vmem:[%s3709_s5 + $0x48] sm:$0xf] %v299_v18  ;;  %302 = vst [vmem:[%s3709_s5 + $0x4c] sm:$0xf] %v301_v19  ;;  %v305_v21 = vld [vmem:[%s3707_s30 + $0x60] sm:$0xf] }
  0x1f   : >> { %304 = vst [vmem:[%s3709_s5 + $0x50] sm:$0xf] %v303_v20  ;;  %v307_v22 = vld [vmem:[%s3707_s30 + $0x64] sm:$0xf]  ;;  %v309_v23 = vld [vmem:[%s3707_s30 + $0x68] sm:$0xf] }
  0x20   : >> { %306 = vst [vmem:[%s3709_s5 + $0x54] sm:$0xf] %v305_v21  ;;  %308 = vst [vmem:[%s3709_s5 + $0x58] sm:$0xf] %v307_v22  ;;  %v311_v24 = vld [vmem:[%s3707_s30 + $0x78] sm:$0xf] }
  0x21   : >> { %310 = vst [vmem:[%s3709_s5 + $0x5c] sm:$0xf] %v309_v23  ;;  %v313_v25 = vld [vmem:[%s3707_s30 + $0x7c] sm:$0xf]  ;;  %v315_v26 = vld [vmem:[%s3707_s30 + $0x80] sm:$0xf] }
  0x22   : >> { %312 = vst [vmem:[%s3709_s5 + $0x60] sm:$0xf] %v311_v24  ;;  %314 = vst [vmem:[%s3709_s5 + $0x64] sm:$0xf] %v313_v25  ;;  %v317_v27 = vld [vmem:[%s3707_s30 + $0x84] sm:$0xf] }
  0x23   : >> { %316 = vst [vmem:[%s3709_s5 + $0x68] sm:$0xf] %v315_v26  ;;  %v319_v28 = vld [vmem:[%s3707_s30 + $0x88] sm:$0xf]  ;;  %v321_v29 = vld [vmem:[%s3707_s30 + $0x8c] sm:$0xf] }
  0x24   : >> { %318 = vst [vmem:[%s3709_s5 + $0x6c] sm:$0xf] %v317_v27  ;;  %320 = vst [vmem:[%s3709_s5 + $0x70] sm:$0xf] %v319_v28  ;;  %v323_v30 = vld [vmem:[%s3707_s30 + $0x90] sm:$0xf] }
  0x25   : >> { %322 = vst [vmem:[%s3709_s5 + $0x74] sm:$0xf] %v321_v29  ;;  %v325_v31 = vld [vmem:[%s3707_s30 + $0x94] sm:$0xf]  ;;  %v327_v32 = vld [vmem:[%s3707_s30 + $0x98] sm:$0xf] }
  0x26   : >> { %324 = vst [vmem:[%s3709_s5 + $0x78] sm:$0xf] %v323_v30  ;;  %326 = vst [vmem:[%s3709_s5 + $0x7c] sm:$0xf] %v325_v31  ;;  %v329_v33 = vld [vmem:[%s3707_s30 + $0x9c] sm:$0xf] }
  0x27   : >> { %328 = vst [vmem:[%s3709_s5 + $0x80] sm:$0xf] %v327_v32  ;;  %v331_v34 = vld [vmem:[%s3707_s30 + $0xa0] sm:$0xf]  ;;  %v333_v35 = vld [vmem:[%s3707_s30 + $0xa4] sm:$0xf] }
  0x28   : >> { %330 = vst [vmem:[%s3709_s5 + $0x84] sm:$0xf] %v329_v33  ;;  %332 = vst [vmem:[%s3709_s5 + $0x88] sm:$0xf] %v331_v34  ;;  %v335_v36 = vld [vmem:[%s3707_s30 + $0xb4] sm:$0xf] }
  0x29   : >> { %334 = vst [vmem:[%s3709_s5 + $0x8c] sm:$0xf] %v333_v35  ;;  %v337_v37 = vld [vmem:[%s3707_s30 + $0xb8] sm:$0xf]  ;;  %v339_v38 = vld [vmem:[%s3707_s30 + $0xbc] sm:$0xf] }
  0x2a   : >> { %336 = vst [vmem:[%s3709_s5 + $0x90] sm:$0xf] %v335_v36  ;;  %338 = vst [vmem:[%s3709_s5 + $0x94] sm:$0xf] %v337_v37  ;;  %v341_v39 = vld [vmem:[%s3707_s30 + $0xc0] sm:$0xf] }
  0x2b   : >> { %340 = vst [vmem:[%s3709_s5 + $0x98] sm:$0xf] %v339_v38  ;;  %v343_v40 = vld [vmem:[%s3707_s30 + $0xc4] sm:$0xf]  ;;  %v345_v41 = vld [vmem:[%s3707_s30 + $0xc8] sm:$0xf] }
  0x2c   : >> { %342 = vst [vmem:[%s3709_s5 + $0x9c] sm:$0xf] %v341_v39  ;;  %344 = vst [vmem:[%s3709_s5 + $0xa0] sm:$0xf] %v343_v40  ;;  %v347_v42 = vld [vmem:[%s3707_s30 + $0xcc] sm:$0xf] }
  0x2d   : >> { %346 = vst [vmem:[%s3709_s5 + $0xa4] sm:$0xf] %v345_v41  ;;  %v349_v43 = vld [vmem:[%s3707_s30 + $0xd0] sm:$0xf]  ;;  %v351_v44 = vld [vmem:[%s3707_s30 + $0xd4] sm:$0xf] }
  0x2e   : >> { %348 = vst [vmem:[%s3709_s5 + $0xa8] sm:$0xf] %v347_v42  ;;  %350 = vst [vmem:[%s3709_s5 + $0xac] sm:$0xf] %v349_v43  ;;  %v353_v45 = vld [vmem:[%s3707_s30 + $0xd8] sm:$0xf] }
  0x2f   : >> { %352 = vst [vmem:[%s3709_s5 + $0xb0] sm:$0xf] %v351_v44  ;;  %v355_v46 = vld [vmem:[%s3707_s30 + $0xdc] sm:$0xf]  ;;  %v357_v47 = vld [vmem:[%s3707_s30 + $0xe0] sm:$0xf] }
  0x30   : >> { %354 = vst [vmem:[%s3709_s5 + $0xb4] sm:$0xf] %v353_v45  ;;  %356 = vst [vmem:[%s3709_s5 + $0xb8] sm:$0xf] %v355_v46  ;;  %p256_p6 = scmp.ge.s32.totalorder %s257_s6, 1 }
  0x31   : >> { %358 = vst [vmem:[%s3709_s5 + $0xbc] sm:$0xf] %v357_v47 }
  0x32   : > { %259 = sbr.rel (!%p256_p6) target bundleno = 17 (0x11), region = 222 }
  0x37 PF: > { %590 = sbr.rel (!%p3689_p3) target bundleno = 64 (0x40), region = 90  ;;  %s592_s7 = sand.u32 (%p3689_p3), 1, %s3615_s16  }
  0x38   : > { %s2751_s8 = smul.u32 (%p3689_p3), 240, %s3623_s18 }
  0x39   : > { %s3408_s9 = smul.u32 (%p3689_p3), 48, %s592_s7 }
  0x3a   : > { %s2615_s12 = scalar_lea.vmem (%p3689_p3), %s4311_s1, %s2751_s8 }
  0x3b   : > { %v2752_v48 = vld [vmem:[%s2615_s12 + $0x30] sm:$0xff] (%p3689_p3)   ;;  %v2754_v49 = vld [vmem:[%s2615_s12 + $0x38] sm:$0xf] (%p3689_p3)  ;;  %s594_s13 = scalar_lea.vmem (%p3689_p3), [#allocation4], %s3408_s9  ;;  %v2758_v52 = vld [vmem:[%s2615_s12 + $0xa8] sm:$0xff] (%p3689_p3)  }
  0x3c   : > { %v2755_v50 = vld [vmem:[%s2615_s12 + $0x6c] sm:$0xff]   ;;  %621 = vst [vmem:[%s594_s13] sm:$0xff] %v2752_v48   ;;  %625 = vst [vmem:[%s594_s13 + $0x8] sm:$0xf] %v2754_v49  ;;  %v2757_v51 = vld [vmem:[%s2615_s12 + $0x74] sm:$0xf] }
  0x3d   : > { %627 = vst [vmem:[%s594_s13 + $0xc] sm:$0xff] %v2755_v50   ;;  %v2760_v53 = vld [vmem:[%s2615_s12 + $0xb0] sm:$0xf]  ;;  %631 = vst [vmem:[%s594_s13 + $0x14] sm:$0xf] %v2757_v51  ;;  %v2761_v54 = vld [vmem:[%s2615_s12 + $0xe4] sm:$0xff]  }
  0x3e   : > { %633 = vst [vmem:[%s594_s13 + $0x18] sm:$0xff] %v2758_v52   ;;  %637 = vst [vmem:[%s594_s13 + $0x20] sm:$0xf] %v2760_v53  ;;  %v2763_v55 = vld [vmem:[%s2615_s12 + $0xec] sm:$0xf] }
  0x3f   : > { %639 = vst [vmem:[%s594_s13 + $0x24] sm:$0xff] %v2761_v54   ;;  %643 = vst [vmem:[%s594_s13 + $0x2c] sm:$0xf] %v2763_v55 }
  0x40 PF: > { %p2764_p7 = scmp.ge.s32.totalorder %s3627_s19, 1  ;;  %p690_p8 = scmp.lt.s32.totalorder %s3627_s19, 3 }
  0x42   : > { %p691_p9 = pnand %p2764_p7, %p690_p8 }
  0x44   : > { %694 = sbr.rel (%p691_p9) target bundleno = 443 (0x1bb), region = 131 }
  0x49   : > { %v3483_v56 = vld [vmem:[%s4312_s2 + $0x38] sm:$0xff]   ;;  %v3485_v58 = vld [vmem:[%s4312_s2 + $0x30] sm:$0xff]   ;;  %v3487_v60 = vld [vmem:[%s4312_s2 + $0x28] sm:$0xff]   ;;  %s697_s7 = sand.u32 1, %s3611_s15   ;;  %vm1174_vm0 = vsmask.f32 3328 }
  0x4a   : > { %v3484_v57 = vld [vmem:[%s4312_s2 + $0x78] sm:$0xff]   ;;  %3174 = vmatprep.subr.bf16.mxu0 %v3483_v56  ;;  %v3486_v59 = vld [vmem:[%s4312_s2 + $0x70] sm:$0xff]   ;;  %v3488_v61 = vld [vmem:[%s4312_s2 + $0x68] sm:$0xff]   ;;  %s3409_s12 = smul.u32 192, %s697_s7  ;;  %vm1175_vm1 = vsmask.f32 7440 }
  0x4b   : > { %3198 = vmatprep.subr.bf16.mxu1 %v3484_v57  ;;  %3175 = vmatpush3.bf16.msra.mxu0 %v3483_v56  ;;  %v3489_v62 = vld [vmem:[%s4312_s2 + $0x20] sm:$0xff]   ;;  %v3491_v0 = vld [vmem:[%s4312_s2 + $0x18] sm:$0xff]   ;;  %v3493_v2 = vld [vmem:[%s4312_s2 + $0x10] sm:$0xff]   ;;  %s4020_s8 = smul.u32 48, %s697_s7  ;;  %s2765_s14 = sshll.u32 %s3619_s17, 3 }
  0x4c   : > { %3199 = vmatpush3.bf16.msra.mxu1 %v3484_v57  ;;  %3176 = vmatprep.subr.bf16.mxu0 %v3485_v58  ;;  %v3490_v63 = vld [vmem:[%s4312_s2 + $0x60] sm:$0xff]   ;;  %v3492_v1 = vld [vmem:[%s4312_s2 + $0x58] sm:$0xff]   ;;  %s3860_s26 = scalar_lea.vmem [#allocation3], %s3409_s12  ;;  %v3494_v5 = vld [vmem:[%s4312_s2 + $0x50] sm:$0xff]   ;;  %p4279_p10 = scmp.lt.s32.totalorder %s2765_s14, 15 }
  0x4d   : > { %3200 = vmatprep.subr.bf16.mxu1 %v3486_v59  ;;  %v794_v3 = vld [vmem:[%s3860_s26] sm:$0xf]  ;;  %v795_v4 = vld [vmem:[%s3860_s26 + $0x4] sm:$0xf]  ;;  %v3500_v7 = vld [vmem:[%s3860_s26 + $0x30] sm:$0xff]   ;;  %s4151_s9 = scalar_lea.vmem [#allocation4], %s4020_s8 }
  0x4e   : > { %v2797_v6 = vcombine.low %v794_v3, %v795_v4  ;;  %v3495_v8 = vld [vmem:[%s4312_s2 + $0x8] sm:$0xff]   ;;  %3214 = vmatprep.mubr.bf16.mxu1 %v3500_v7  ;;  %v3497_v10 = vld [vmem:[%s4312_s2] sm:$0xff]   ;;  %v1178_v12 = vshrl.u32 %v794_v3, 16  ;;  %v1181_v13 = vshll.u32 %v794_v3, 16  ;;  %v1187_v14 = vshll.u32 %v795_v4, 16  ;;  %v3503_v18 = vld [vmem:[%s4312_s2 + $0xb8] sm:$0xff]  }
  0x4f   : > { %3177 = vmatpush3.bf16.msra.mxu0 %v3485_v58  ;;  %v3496_v9 = vld [vmem:[%s4312_s2 + $0x48] sm:$0xff]   ;;  %v3498_v11 = vld [vmem:[%s4312_s2 + $0x40] sm:$0xff]   ;;  %v798_v16 = vld [vmem:[%s3860_s26 + $0x10] sm:$0xf]  ;;  %v1191_v17 = vshrl.u32 %v795_v4, 16  ;;  %s4336_s14 = smov (!%p4279_p10, %s2765_s14), 15 }
  0x50   : > { %3201 = vmatpush3.bf16.msra.mxu1 %v3486_v59  ;;  %3178 = vmatprep.subr.bf16.mxu0 %v3487_v60  ;;  %v797_v15 = vld [vmem:[%s3860_s26 + $0xc] sm:$0xf]  ;;  %v1180_v19 = vrot.slane %v1178_v12, 4  ;;  %v3504_v20 = vld [vmem:[%s4312_s2 + $0xf8] sm:$0xff]   ;;  %v1183_v21 = vrot.slane %v1181_v13, 5  ;;  %v3899_v27 = vrot.slane %v1187_v14, 5  ;;  %vm3965_vm2 = vmor %vm1174_vm0, %vm1175_vm1 }
  0x51   : > { %3202 = vmatprep.subr.bf16.mxu1 %v3488_v61  ;;  %3190 = vmatprep.mubr.bf16.mxu0 %v2797_v6  ;;  %v3888_v22 = vcombine.low %v797_v15, %v798_v16  ;;  %v1202_v23 = vshrl.u32 %v797_v15, 16  ;;  %v3891_v24 = vld [vmem:[%s3860_s26 + $0x3c] sm:$0xff]   ;;  %v3894_v25 = vld [vmem:[%s3860_s26 + $0x18] sm:$0xf]  ;;  %v1193_v28 = vrot.slane %v1191_v17, 4  ;;  %v1205_v29 = vshll.u32 %v797_v15, 16 }
  0x52   : > { %v3897_v26 = vld [vmem:[%s3860_s26 + $0x1c] sm:$0xf]  ;;  %v3505_v30 = vld [vmem:[%s4312_s2 + $0xb0] sm:$0xff]   ;;  %v1211_v31 = vshll.u32 %v798_v16, 16  ;;  %v1184_v34 = vor.u32 %v1183_v21, %v1180_v19  ;;  %v1215_v36 = vshrl.u32 %v798_v16, 16  ;;  %v3915_v37 = vld [vmem:[%s3860_s26 + $0x48] sm:$0xff]  }
  0x53   : > { %3179 = vmatpush3.bf16.msra.mxu0 %v3487_v60  ;;  %v3506_v32 = vld [vmem:[%s4312_s2 + $0xf0] sm:$0xff]   ;;  %v3909_v33 = vcombine.low %v3894_v25, %v3897_v26  ;;  %v3912_v35 = vrot.slane %v1202_v23, 4  ;;  %v3919_v38 = vld [vmem:[%s3860_s26 + $0x24] sm:$0xf]  ;;  %v3922_v39 = vld [vmem:[%s3860_s26 + $0x28] sm:$0xf]  ;;  %v1194_v40 = vor.u32 %v1193_v28, %v3899_v27 }
  0x54   : > { %3203 = vmatpush3.bf16.msra.mxu1 %v3488_v61  ;;  %3180 = vmatprep.subr.bf16.mxu0 %v3489_v62  ;;  %v3925_v41 = vrot.slane %v1205_v29, 5  ;;  %v3507_v42 = vld [vmem:[%s4312_s2 + $0xa8] sm:$0xff]   ;;  %v3930_v43 = vrot.slane %v1211_v31, 5  ;;  %v1185_v45 = vrot.slane %v1184_v34, 4  ;;  %v3509_v46 = vld [vmem:[%s4312_s2 + $0xa0] sm:$0xff]   ;;  %v3942_v47 = vcombine.low %v3919_v38, %v3922_v39  ;;  %v3947_v49 = vld [vmem:[%s3860_s26 + $0x54] sm:$0xff]  }
  0x55   : > { %3204 = vmatprep.subr.bf16.mxu1 %v3490_v63  ;;  %v3508_v44 = vld [vmem:[%s4312_s2 + $0xe8] sm:$0xff]   ;;  %v3944_v48 = vrot.slane %v1215_v36, 4  ;;  %v1195_v50 = vrot.slane %v1194_v40, 4  ;;  %v3510_v51 = vld [vmem:[%s4312_s2 + $0xe0] sm:$0xff]   ;;  %v1226_v52 = vshrl.u32 %v3894_v25, 16  ;;  %v1229_v53 = vshll.u32 %v3894_v25, 16 }
  0x56   : > { %v3511_v54 = vld [vmem:[%s4312_s2 + $0x98] sm:$0xff]   ;;  %v1235_v55 = vshll.u32 %v3897_v26, 16  ;;  %v1239_v56 = vshrl.u32 %v3897_v26, 16  ;;  %v796_v57 = vld [vmem:[%s3860_s26 + $0x8] sm:$0x1]  ;;  %v1250_v58 = vshrl.u32 %v3919_v38, 16  ;;  %v1190_v3 = vsel %vm3965_vm2, %v1185_v45, %v3899_v27 }
  0x57   : > { %3181 = vmatpush3.bf16.msra.mxu0 %v3489_v62  ;;  %v1197_v59 = vshll.u32 %v796_v57, 16  ;;  %v1253_v60 = vshll.u32 %v3919_v38, 16  ;;  %v1259_v61 = vshll.u32 %v3922_v39, 16  ;;  %v1228_v6 = vrot.slane %v1226_v52, 4  ;;  %v3517_v13 = vld [vmem:[%s4312_s2 + $0x90] sm:$0xff]   ;;  %v3519_v25 = vld [vmem:[%s4312_s2 + $0x88] sm:$0xff]  }
  0x58   : > { %3205 = vmatpush3.bf16.msra.mxu1 %v3490_v63  ;;  %3182 = vmatprep.subr.bf16.mxu0 %v3491_v0  ;;  %v3970_v63 = vld [vmem:[%s3860_s26 + $0x60] sm:$0xf]  ;;  %v1231_v7 = vrot.slane %v1229_v53, 5  ;;  %v1252_v12 = vrot.slane %v1250_v58, 4  ;;  %v799_v15 = vld [vmem:[%s3860_s26 + $0x14] sm:$0x1]  ;;  %v1218_v16 = vor.u32 %v3944_v48, %v3930_v43 }
  0x59   : > { %3206 = vmatprep.subr.bf16.mxu1 %v3492_v1  ;;  %v1199_v4 = vrot.slane %v1197_v59, 5  ;;  %v1255_v17 = vrot.slane %v1253_v60, 5  ;;  %v1221_v21 = vshll.u32 %v799_v15, 16  ;;  %v802_v26 = vld [vmem:[%s3860_s26 + $0x20] sm:$0x1]  ;;  %v3520_v29 = vld [vmem:[%s4312_s2 + $0xc8] sm:$0xff]  }
  0x5a   : > { %v1232_v27 = vor.u32 %v1231_v7, %v1228_v6  ;;  %v1219_v28 = vrot.slane %v1218_v16, 4  ;;  %v1752_v34 = vshrl.u32 %v3970_v63, 16  ;;  %v1755_v36 = vshll.u32 %v3970_v63, 16  ;;  %v3521_v40 = vld [vmem:[%s4312_s2 + $0x80] sm:$0xff]   ;;  %v2779_v52 = vld [vmem:[%s3860_s26 + $0x70] sm:$0xf] }
  0x5b   : > { %3183 = vmatpush3.bf16.msra.mxu0 %v3491_v0  ;;  %v3973_v0 = vld [vmem:[%s3860_s26 + $0x64] sm:$0xf]  ;;  %v1256_v31 = vor.u32 %v1255_v17, %v1252_v12  ;;  %v1223_v38 = vrot.slane %v1221_v21, 5  ;;  %v3525_v53 = vld [vmem:[%s4312_s2 + $0x138] sm:$0xff]   ;;  %v2785_v21 = vld [vmem:[%s3860_s26 + $0x88] sm:$0xf] }
  0x5c   : > { %3207 = vmatpush3.bf16.msra.mxu1 %v3492_v1  ;;  %3184 = vmatprep.subr.bf16.mxu0 %v3493_v2  ;;  %v3512_v1 = vld [vmem:[%s4312_s2 + $0xd8] sm:$0xff]   ;;  %v3522_v45 = vld [vmem:[%s4312_s2 + $0xc0] sm:$0xff]   ;;  %v1757_v57 = vrot.slane %v1755_v36, 5  ;;  %v3557_v62 = vld [vmem:[%s4312_s2 + $0x190] sm:$0xff]   ;;  %s2766_s23 = sshll.u32 %s4336_s14, 2 }
  0x5d   : > { %3208 = vmatprep.subr.bf16.mxu1 %v3494_v5  ;;  %v1224_v59 = vsel %vm3965_vm2, %v1219_v28, %v1223_v38  ;;  %v3526_v60 = vld [vmem:[%s4312_s2 + $0x178] sm:$0xff]   ;;  %v2784_v16 = vld [vmem:[%s3860_s26 + $0x84] sm:$0xf]  ;;  %v3543_v38 = vld [vmem:[%s3860_s26 + $0x90] sm:$0xff]   ;;  %s778_s28 = scalar_lea.vmem %s4314_s4, %s2766_s23 }
  0x5e   : > { %v4051_v6 = vld [vmem:[%s3860_s26 + $0x78] sm:$0xf]  ;;  %v3534_v36 = vld [vmem:[%s4312_s2 + $0x160] sm:$0xff]  }
  0x5f   : > { %3185 = vmatpush3.bf16.msra.mxu0 %v3493_v2  ;;  %v1263_v2 = vshrl.u32 %v3922_v39, 16  ;;  %v805_v39 = vld [vmem:[%s3860_s26 + $0x2c] sm:$0x1] }
  0x60   : > { %3209 = vmatpush3.bf16.msra.mxu1 %v3494_v5  ;;  %3186 = vmatprep.subr.bf16.mxu0 %v3495_v8  ;;  %v2881_v5 = vcombine.low %v3970_v63, %v3973_v0 }
  0x61   : > { %3210 = vmatprep.subr.bf16.mxu1 %v3496_v9  ;;  %v1265_v19 = vrot.slane %v1263_v2, 4 }
  0x63   : > { %3187 = vmatpush3.bf16.msra.mxu0 %v3495_v8  ;;  %v3984_v8 = vrot.slane %v1235_v55, 5  ;;  %v1269_v55 = vshll.u32 %v805_v39, 16 }
  0x64   : > { %3211 = vmatpush3.bf16.msra.mxu1 %v3496_v9  ;;  %3188 = vmatprep.subr.bf16.mxu0 %v3497_v10  ;;  %v1241_v9 = vrot.slane %v1239_v56, 4  ;;  %v1754_v56 = vrot.slane %v1752_v34, 4  ;;  %v3533_v34 = vld [vmem:[%s4312_s2 + $0x120] sm:$0xff]  }
  0x65   : > { %3212 = vmatprep.subr.bf16.mxu1 %v3498_v11 }
  0x66   : > { %v1758_v12 = vor.u32 %v1757_v57, %v1754_v56 }
  0x67   : > { %3189 = vmatpush3.bf16.msra.mxu0 %v3497_v10  ;;  %v1200_v10 = vsel %vm3965_vm2, %v1195_v50, %v1199_v4  ;;  %v1257_v50 = vrot.slane %v1256_v31, 4 }
  0x68   : > { %3213 = vmatpush3.bf16.msra.mxu1 %v3498_v11  ;;  %3222 = vmatprep.subr.bf16.mxu0 %v3503_v18  ;;  %v1208_v11 = vor.u32 %v3925_v41, %v3912_v35  ;;  %v2853_v14 = vcombine.low %v1190_v3, %v1200_v10  ;;  %v1245_v35 = vshll.u32 %v802_v26, 16  ;;  %v1761_v41 = vshll.u32 %v3973_v0, 16 }
  0x69   : > { %3246 = vmatprep.subr.bf16.mxu1 %v3504_v20  ;;  %v1785_v10 = vshll.u32 %v2779_v52, 16 }
  0x6a   : > { %3191 = vmatmul.mubr.bf16.vlgmr.msra.gmra.mxu0 %v3888_v22  ;;  %v1209_v23 = vrot.slane %v1208_v11, 4  ;;  %v1789_v11 = vshrl.u32 %v2779_v52, 16 }
  0x6b   : > { %3215 = vmatmul.mubr.bf16.vlgmr.msra.gmra.mxu1 %v3891_v24  ;;  %3223 = vmatpush3.bf16.msra.mxu0 %v3503_v18  ;;  %v3996_v18 = vrot.slane %v1259_v61, 5  ;;  %v4038_v61 = vrot.slane %v1761_v41, 5  ;;  %v4086_v31 = vrot.slane %v1785_v10, 5  ;;  %v1800_v41 = vshrl.u32 %v4051_v6, 16  ;;  %v3540_v10 = vld [vmem:[%s4312_s2 + $0x148] sm:$0xff]  }
  0x6c   : > { %3247 = vmatpush3.bf16.msra.mxu1 %v3504_v20  ;;  %3224 = vmatprep.subr.bf16.mxu0 %v3505_v30  ;;  %v3518_v20 = vld [vmem:[%s4312_s2 + $0xd0] sm:$0xff]   ;;  %v1214_v58 = vsel %vm3965_vm2, %v1209_v23, %v3930_v43  ;;  %v3529_v23 = vld [vmem:[%s4312_s2 + $0x128] sm:$0xff]  }
  0x6d   : > { %3248 = vmatprep.subr.bf16.mxu1 %v3506_v32  ;;  %3194 = vmatprep.mubr.bf16.mxu0 %v3909_v33  ;;  %v4040_v2 = vcombine.low %v1214_v58, %v1224_v59  ;;  %v3527_v43 = vld [vmem:[%s4312_s2 + $0x130] sm:$0xff]   ;;  %v1802_v56 = vrot.slane %v1800_v41, 4 }
  0x6e   : > { %3218 = vmatprep.mubr.bf16.mxu1 %v3915_v37 }
  0x6f   : > { %3225 = vmatpush3.bf16.msra.mxu0 %v3505_v30  ;;  %v1242_v30 = vor.u32 %v1241_v9, %v3984_v8  ;;  %v4054_v9 = vld [vmem:[%s3860_s26 + $0x7c] sm:$0xf] }
  0x70   : > { %3249 = vmatpush3.bf16.msra.mxu1 %v3506_v32  ;;  %3226 = vmatprep.subr.bf16.mxu0 %v3507_v42  ;;  %v1266_v32 = vor.u32 %v1265_v19, %v3996_v18  ;;  %v2883_v15 = vcombine.low %v4051_v6, %v4054_v9  ;;  %v1262_v19 = vsel %vm3965_vm2, %v1257_v50, %v3996_v18  ;;  %v3530_v18 = vld [vmem:[%s4312_s2 + $0x168] sm:$0xff]   ;;  %v1824_v50 = vshrl.u32 %v2784_v16, 16 }
  0x71   : > { %3250 = vmatprep.subr.bf16.mxu1 %v3508_v44  ;;  %v1243_v48 = vrot.slane %v1242_v30, 4 }
  0x72   : > { %3195 = vmatmul.mubr.bf16.gmra.mxu0 %v3942_v47 }
  0x73   : > { %3227 = vmatpush3.bf16.msra.mxu0 %v3507_v42  ;;  %3219 = vmatmul.mubr.bf16.gmra.mxu1 %v3947_v49  ;;  %v1765_v42 = vshrl.u32 %v3973_v0, 16 }
  0x74   : > { %3251 = vmatpush3.bf16.msra.mxu1 %v3508_v44  ;;  %3228 = vmatprep.subr.bf16.mxu0 %v3509_v46  ;;  %v1233_v44 = vrot.slane %v1232_v27, 4  ;;  %v2777_v27 = vld [vmem:[%s3860_s26 + $0x68] sm:$0x1] }
  0x75   : > { %3252 = vmatprep.subr.bf16.mxu1 %v3510_v51  ;;  %3262 = vmatprep.mubr.bf16.mxu1 %v2881_v5  ;;  %v1767_v63 = vrot.slane %v1765_v42, 4  ;;  %v1271_v5 = vrot.slane %v1269_v55, 5  ;;  %v1771_v30 = vshll.u32 %v2777_v27, 16  ;;  %v1803_v42 = vshll.u32 %v4051_v6, 16 }
  0x76   : > { %3238 = vmatprep.mubr.bf16.mxu0 %v2853_v14  ;;  %v1238_v3 = vsel %vm3965_vm2, %v1233_v44, %v3984_v8  ;;  %v3528_v8 = vld [vmem:[%s4312_s2 + $0x170] sm:$0xff]   ;;  %v1837_v55 = vshrl.u32 %v2785_v21, 16 }
  0x77   : > { %3229 = vmatpush3.bf16.msra.mxu0 %v3509_v46  ;;  %v2778_v46 = vld [vmem:[%s3860_s26 + $0x6c] sm:$0xf]  ;;  %v1768_v17 = vor.u32 %v1767_v63, %v4038_v61  ;;  %v1805_v57 = vrot.slane %v1803_v42, 5  ;;  %v3537_v63 = vld [vmem:[%s4312_s2 + $0x110] sm:$0xff]  }
  0x78   : > { %3253 = vmatpush3.bf16.msra.mxu1 %v3510_v51  ;;  %3230 = vmatprep.subr.bf16.mxu0 %v3511_v54  ;;  %v1267_v51 = vrot.slane %v1266_v32, 4  ;;  %v1776_v0 = vshrl.u32 %v2778_v46, 16  ;;  %v2882_v7 = vcombine.low %v2778_v46, %v2779_v52  ;;  %v2884_v32 = vcombine.low %v2784_v16, %v2785_v21 }
  0x79   : > { %3254 = vmatprep.subr.bf16.mxu1 %v3512_v1  ;;  %v1827_v52 = vshll.u32 %v2784_v16, 16 }
  0x7b   : > { %3231 = vmatpush3.bf16.msra.mxu0 %v3511_v54  ;;  %v1247_v54 = vrot.slane %v1245_v35, 5  ;;  %v1791_v35 = vrot.slane %v1789_v11, 4 }
  0x7c   : > { %3255 = vmatpush3.bf16.msra.mxu1 %v3512_v1  ;;  %3232 = vmatprep.subr.bf16.mxu0 %v3517_v13  ;;  %v1779_v1 = vshll.u32 %v2778_v46, 16  ;;  %v1813_v46 = vshrl.u32 %v4054_v9, 16 }
  0x7d   : > { %3256 = vmatprep.subr.bf16.mxu1 %v3518_v20  ;;  %v1248_v4 = vsel %vm3965_vm2, %v1243_v48, %v1247_v54  ;;  %v1833_v54 = vshll.u32 %v2785_v21, 16  ;;  %v1792_v6 = vor.u32 %v1791_v35, %v4086_v31  ;;  %v2786_v21 = vld [vmem:[%s3860_s26 + $0x8c] sm:$0x1] }
  0x7e   : > { %v4061_v14 = vcombine.low %v1238_v3, %v1248_v4  ;;  %v4077_v26 = vrot.slane %v1779_v1, 5  ;;  %v1815_v59 = vrot.slane %v1813_v46, 4  ;;  %v3538_v1 = vld [vmem:[%s4312_s2 + $0x150] sm:$0xff]   ;;  %v1839_v4 = vrot.slane %v1837_v55, 4 }
  0x7f   : > { %3233 = vmatpush3.bf16.msra.mxu0 %v3517_v13  ;;  %v4056_v13 = vrot.slane %v1776_v0, 4  ;;  %v1829_v0 = vrot.slane %v1827_v52, 5  ;;  %v4122_v3 = vrot.slane %v1833_v54, 5  ;;  %v1843_v35 = vshll.u32 %v2786_v21, 16  ;;  %v3563_v21 = vld [vmem:[%s4312_s2 + $0x238] sm:$0xff]  }
  0x80   : > { %3257 = vmatpush3.bf16.msra.mxu1 %v3518_v20  ;;  %3234 = vmatprep.subr.bf16.mxu0 %v3519_v25  ;;  %v1272_v20 = vsel %vm3965_vm2, %v1267_v51, %v1271_v5  ;;  %v3535_v51 = vld [vmem:[%s4312_s2 + $0x118] sm:$0xff]   ;;  %v3539_v5 = vld [vmem:[%s4312_s2 + $0x108] sm:$0xff]  }
  0x81   : > { %3258 = vmatprep.subr.bf16.mxu1 %v3520_v29  ;;  %v4084_v28 = vcombine.low %v1262_v19, %v1272_v20  ;;  %v3542_v20 = vld [vmem:[%s4312_s2 + $0x140] sm:$0xff]  }
  0x83   : > { %3235 = vmatpush3.bf16.msra.mxu0 %v3519_v25  ;;  %v1759_v25 = vrot.slane %v1758_v12, 4  ;;  %v3541_v12 = vld [vmem:[%s4312_s2 + $0x100] sm:$0xff]  }
  0x84   : > { %3259 = vmatpush3.bf16.msra.mxu1 %v3520_v29  ;;  %3236 = vmatprep.subr.bf16.mxu0 %v3521_v40  ;;  %v1769_v29 = vrot.slane %v1768_v17, 4 }
  0x85   : > { %3260 = vmatprep.subr.bf16.mxu1 %v3522_v45  ;;  %v1764_v39 = vsel %vm3965_vm2, %v1759_v25, %v4038_v61  ;;  %v1826_v61 = vrot.slane %v1824_v50, 4  ;;  %v3548_v50 = vld [vmem:[%s4312_s2 + $0x1f0] sm:$0xff]  }
  0x87   : > { %3237 = vmatpush3.bf16.msra.mxu0 %v3521_v40  ;;  %v1773_v40 = vrot.slane %v1771_v30, 5  ;;  %v1830_v19 = vor.u32 %v1829_v0, %v1826_v61 }
  0x88   : > { %3261 = vmatpush3.bf16.msra.mxu1 %v3522_v45  ;;  %3270 = vmatprep.subr.bf16.mxu0 %v3525_v53  ;;  %v1809_v45 = vshll.u32 %v4054_v9, 16  ;;  %v2783_v9 = vld [vmem:[%s3860_s26 + $0x80] sm:$0x1] }
  0x89   : > { %3294 = vmatprep.subr.bf16.mxu1 %v3526_v60  ;;  %v1774_v44 = vsel %vm3965_vm2, %v1769_v29, %v1773_v40  ;;  %v1819_v17 = vshll.u32 %v2783_v9, 16  ;;  %v1831_v30 = vrot.slane %v1830_v19, 4  ;;  %v3550_v9 = vld [vmem:[%s3860_s26 + $0xb4] sm:$0xff]   ;;  %v3561_v19 = vld [vmem:[%s4312_s2 + $0x180] sm:$0xff]  }
  0x8a   : > { %3239 = vmatmul.mubr.bf16.vlgmr.msra.gmra.mxu0 %v4040_v2  ;;  %v2937_v48 = vcombine.low %v1764_v39, %v1774_v44  ;;  %v4111_v58 = vrot.slane %v1809_v45, 5  ;;  %v3547_v44 = vld [vmem:[%s4312_s2 + $0x1b0] sm:$0xff]  }
  0x8b   : > { %3263 = vmatmul.mubr.bf16.vlgmr.msra.gmra.mxu1 %v2882_v7  ;;  %3271 = vmatpush3.bf16.msra.mxu0 %v3525_v53  ;;  %v3536_v53 = vld [vmem:[%s4312_s2 + $0x158] sm:$0xff]   ;;  %v1821_v29 = vrot.slane %v1819_v17, 5  ;;  %v1836_v0 = vsel %vm3965_vm2, %v1831_v30, %v4122_v3  ;;  %v3558_v17 = vld [vmem:[%s4312_s2 + $0x1d0] sm:$0xff]  }
  0x8c   : > { %3295 = vmatpush3.bf16.msra.mxu1 %v3526_v60  ;;  %3272 = vmatprep.subr.bf16.mxu0 %v3527_v43  ;;  %v2780_v60 = vld [vmem:[%s3860_s26 + $0x74] sm:$0x1] }
  0x8d   : > { %3296 = vmatprep.subr.bf16.mxu1 %v3528_v8  ;;  %3242 = vmatprep.mubr.bf16.mxu0 %v4061_v14  ;;  %v1795_v7 = vshll.u32 %v2780_v60, 16 }
  0x8e   : > { %3266 = vmatprep.mubr.bf16.mxu1 %v2883_v15  ;;  %v1816_v15 = vor.u32 %v1815_v59, %v4111_v58 }
  0x8f   : > { %3273 = vmatpush3.bf16.msra.mxu0 %v3527_v43  ;;  %v1782_v43 = vor.u32 %v4077_v26, %v4056_v13  ;;  %v1793_v13 = vrot.slane %v1792_v6, 4  ;;  %v1797_v16 = vrot.slane %v1795_v7, 5  ;;  %v1840_v26 = vor.u32 %v1839_v4, %v4122_v3  ;;  %v3552_v4 = vld [vmem:[%s4312_s2 + $0x1e8] sm:$0xff]  }
  0x90   : > { %3297 = vmatpush3.bf16.msra.mxu1 %v3528_v8  ;;  %3274 = vmatprep.subr.bf16.mxu0 %v3529_v23  ;;  %v1806_v8 = vor.u32 %v1805_v57, %v1802_v56  ;;  %v1817_v25 = vrot.slane %v1816_v15, 4  ;;  %v1845_v56 = vrot.slane %v1843_v35, 5  ;;  %v3555_v15 = vld [vmem:[%s4312_s2 + $0x198] sm:$0xff]  }
  0x91   : > { %3298 = vmatprep.subr.bf16.mxu1 %v3530_v18  ;;  %v1783_v11 = vrot.slane %v1782_v43, 4  ;;  %v1798_v27 = vsel %vm3965_vm2, %v1793_v13, %v1797_v16  ;;  %v1841_v46 = vrot.slane %v1840_v26, 4  ;;  %v839_v43 = vld [vmem:[%s4151_s9 + $0x8] sm:$0x1] }
  0x92   : > { %3243 = vmatmul.mubr.bf16.gmra.mxu0 %v4084_v28  ;;  %v1822_v52 = vsel %vm3965_vm2, %v1817_v25, %v1821_v29  ;;  %v2309_v7 = vshll.u32 %v839_v43, 16  ;;  %v3556_v16 = vld [vmem:[%s4312_s2 + $0x1d8] sm:$0xff]   ;;  %v3566_v25 = vld [vmem:[%s4312_s2 + $0x228] sm:$0xff]  }
  0x93   : > { %3275 = vmatpush3.bf16.msra.mxu0 %v3529_v23  ;;  %3267 = vmatmul.mubr.bf16.gmra.mxu1 %v2884_v32  ;;  %v1807_v23 = vrot.slane %v1806_v8, 4  ;;  %v3544_v32 = vld [vmem:[%s3860_s26 + $0x9c] sm:$0xff]  }
  0x94   : > { %3299 = vmatpush3.bf16.msra.mxu1 %v3530_v18  ;;  %3276 = vmatprep.subr.bf16.mxu0 %v3533_v34  ;;  %v1788_v18 = vsel %vm3965_vm2, %v1783_v11, %v4086_v31  ;;  %v4157_v31 = vld [vmem:[%s4151_s9 + $0x4] sm:$0xf]  ;;  %v2311_v3 = vrot.slane %v2309_v7, 5 }
  0x95   : > { %3300 = vmatprep.subr.bf16.mxu1 %v3534_v36  ;;  %3286 = vmatprep.mubr.bf16.mxu0 %v3543_v38  ;;  %v3546_v38 = vld [vmem:[%s4312_s2 + $0x1f8] sm:$0xff]   ;;  %v2299_v41 = vshll.u32 %v4157_v31, 16  ;;  %v2938_v42 = vcombine.low %v1788_v18, %v1798_v27  ;;  %v1812_v45 = vsel %vm3965_vm2, %v1807_v23, %v4111_v58  ;;  %v3553_v11 = vld [vmem:[%s4312_s2 + $0x1a0] sm:$0xff]   ;;  %v3564_v23 = vld [vmem:[%s4312_s2 + $0x230] sm:$0xff]  }
  0x96   : > { %3310 = vmatprep.mubr.bf16.mxu1 %v2937_v48  ;;  %v2303_v48 = vshrl.u32 %v4157_v31, 16  ;;  %v2939_v59 = vcombine.low %v1812_v45, %v1822_v52  ;;  %v3567_v18 = vld [vmem:[%s4151_s9 + $0xc] sm:$0xff]  }
  0x97   : > { %3277 = vmatpush3.bf16.msra.mxu0 %v3533_v34  ;;  %v3545_v34 = vld [vmem:[%s4312_s2 + $0x1b8] sm:$0xff]   ;;  %v2301_v55 = vrot.slane %v2299_v41, 5 }
  0x98   : > { %3301 = vmatpush3.bf16.msra.mxu1 %v3534_v36  ;;  %3278 = vmatprep.subr.bf16.mxu0 %v3535_v51  ;;  %v4154_v36 = vld [vmem:[%s4151_s9] sm:$0xf]  ;;  %v2305_v57 = vrot.slane %v2303_v48, 4 }
  0x99   : > { %3302 = vmatprep.subr.bf16.mxu1 %v3536_v53  ;;  %v2290_v39 = vshrl.u32 %v4154_v36, 16  ;;  %v2293_v40 = vshll.u32 %v4154_v36, 16  ;;  %v2965_v26 = vcombine.low %v4154_v36, %v4157_v31 }
  0x9a   : > { %v2306_v60 = vor.u32 %v2305_v57, %v2301_v55 }
  0x9b   : > { %3279 = vmatpush3.bf16.msra.mxu0 %v3535_v51  ;;  %v3549_v51 = vld [vmem:[%s3860_s26 + $0xa8] sm:$0xff]   ;;  %v2295_v54 = vrot.slane %v2293_v40, 5 }
  0x9c   : > { %3303 = vmatpush3.bf16.msra.mxu1 %v3536_v53  ;;  %3280 = vmatprep.subr.bf16.mxu0 %v3537_v63  ;;  %v2292_v53 = vrot.slane %v2290_v39, 4 }
  0x9d   : > { %3304 = vmatprep.subr.bf16.mxu1 %v3538_v1 }
  0x9e   : > { %v2296_v58 = vor.u32 %v2295_v54, %v2292_v53 }
  0x9f   : > { %3281 = vmatpush3.bf16.msra.mxu0 %v3537_v63  ;;  %v3551_v63 = vld [vmem:[%s4312_s2 + $0x1a8] sm:$0xff]  }
  0xa0   : > { %3305 = vmatpush3.bf16.msra.mxu1 %v3538_v1  ;;  %3282 = vmatprep.subr.bf16.mxu0 %v3539_v5  ;;  %v2297_v61 = vrot.slane %v2296_v58, 4  ;;  %v1846_v1 = vsel %vm3965_vm2, %v1841_v46, %v1845_v56 }
  0xa1   : > { %3306 = vmatprep.subr.bf16.mxu1 %v3540_v10 }
  0xa2   : > { %v2302_v6 = vsel %vm3965_vm2, %v2297_v61, %v2301_v55 }
  0xa3   : > { %3283 = vmatpush3.bf16.msra.mxu0 %v3539_v5  ;;  %v2307_v5 = vrot.slane %v2306_v60, 4 }
  0xa4   : > { %3307 = vmatpush3.bf16.msra.mxu1 %v3540_v10  ;;  %3284 = vmatprep.subr.bf16.mxu0 %v3541_v12  ;;  %v2940_v10 = vcombine.low %v1836_v0, %v1846_v1 }
  0xa5   : > { %3308 = vmatprep.subr.bf16.mxu1 %v3542_v20  ;;  %v2312_v13 = vsel %vm3965_vm2, %v2307_v5, %v2311_v3 }
  0xa6   : > { %v4201_v8 = vcombine.low %v2302_v6, %v2312_v13 }
  0xa7   : > { %3285 = vmatpush3.bf16.msra.mxu0 %v3541_v12  ;;  %v3554_v12 = vld [vmem:[%s4312_s2 + $0x1e0] sm:$0xff]  }
  0xa8   : > { %3309 = vmatpush3.bf16.msra.mxu1 %v3542_v20  ;;  %3318 = vmatprep.subr.bf16.mxu0 %v3545_v34  ;;  %v3562_v20 = vld [vmem:[%s4312_s2 + $0x1c0] sm:$0xff]  }
  0xa9   : > { %3342 = vmatprep.subr.bf16.mxu1 %v3546_v38 }
  0xaa   : > { %3287 = vmatmul.mubr.bf16.vlgmr.msra.gmra.mxu0 %v3544_v32 }
  0xab   : > { %3311 = vmatmul.mubr.bf16.vlgmr.msra.gmra.mxu1 %v2938_v42  ;;  %3319 = vmatpush3.bf16.msra.mxu0 %v3545_v34 }
  0xac   : > { %3343 = vmatpush3.bf16.msra.mxu1 %v3546_v38  ;;  %3320 = vmatprep.subr.bf16.mxu0 %v3547_v44 }
  0xad   : > { %3344 = vmatprep.subr.bf16.mxu1 %v3548_v50  ;;  %3290 = vmatprep.mubr.bf16.mxu0 %v3549_v51 }
  0xae   : > { %3314 = vmatprep.mubr.bf16.mxu1 %v2939_v59 }
  0xaf   : > { %3321 = vmatpush3.bf16.msra.mxu0 %v3547_v44 }
  0xb0   : > { %3345 = vmatpush3.bf16.msra.mxu1 %v3548_v50  ;;  %3322 = vmatprep.subr.bf16.mxu0 %v3551_v63 }
  0xb1   : > { %3346 = vmatprep.subr.bf16.mxu1 %v3552_v4 }
  0xb2   : > { %3291 = vmatmul.mubr.bf16.gmra.mxu0 %v3550_v9 }
  0xb3   : > { %3323 = vmatpush3.bf16.msra.mxu0 %v3551_v63  ;;  %3315 = vmatmul.mubr.bf16.gmra.mxu1 %v2940_v10 }
  0xb4   : > { %3347 = vmatpush3.bf16.msra.mxu1 %v3552_v4  ;;  %3324 = vmatprep.subr.bf16.mxu0 %v3553_v11 }
  0xb5   : > { %3348 = vmatprep.subr.bf16.mxu1 %v3554_v12  ;;  %3334 = vmatprep.mubr.bf16.mxu0 %v3888_v22  ;;  %v3559_v22 = vld [vmem:[%s4312_s2 + $0x188] sm:$0xff]  }
  0xb6   : > { %3358 = vmatprep.mubr.bf16.mxu1 %v3891_v24  ;;  %v3560_v24 = vld [vmem:[%s4312_s2 + $0x1c8] sm:$0xff]  }
  0xb7   : > { %3325 = vmatpush3.bf16.msra.mxu0 %v3553_v11 }
  0xb8   : > { %3349 = vmatpush3.bf16.msra.mxu1 %v3554_v12  ;;  %3326 = vmatprep.subr.bf16.mxu0 %v3555_v15 }
  0xb9   : > { %3350 = vmatprep.subr.bf16.mxu1 %v3556_v16 }
  0xbb   : > { %3327 = vmatpush3.bf16.msra.mxu0 %v3555_v15 }
  0xbc   : > { %3351 = vmatpush3.bf16.msra.mxu1 %v3556_v16  ;;  %3328 = vmatprep.subr.bf16.mxu0 %v3557_v62 }
  0xbd   : > { %3352 = vmatprep.subr.bf16.mxu1 %v3558_v17 }
  0xbf   : > { %3329 = vmatpush3.bf16.msra.mxu0 %v3557_v62 }
  0xc0   : > { %3353 = vmatpush3.bf16.msra.mxu1 %v3558_v17  ;;  %3330 = vmatprep.subr.bf16.mxu0 %v3559_v22 }
  0xc1   : > { %3354 = vmatprep.subr.bf16.mxu1 %v3560_v24 }
  0xc3   : > { %3331 = vmatpush3.bf16.msra.mxu0 %v3559_v22 }
  0xc4   : > { %3355 = vmatpush3.bf16.msra.mxu1 %v3560_v24  ;;  %3332 = vmatprep.subr.bf16.mxu0 %v3561_v19 }
  0xc5   : > { %3356 = vmatprep.subr.bf16.mxu1 %v3562_v20 }
  0xc7   : > { %3333 = vmatpush3.bf16.msra.mxu0 %v3561_v19 }
  0xc8   : > { %3357 = vmatpush3.bf16.msra.mxu1 %v3562_v20  ;;  %3366 = vmatprep.subr.bf16.mxu0 %v3563_v21 }
  0xc9   : > { %3390 = vmatprep.subr.bf16.mxu1 %v3563_v21 }
  0xca   : > { %3335 = vmatmul.mubr.bf16.vlgmr.msra.gmra.mxu0 %v3909_v33  ;;  %v3568_v33 = vld [vmem:[%s4312_s2 + $0x220] sm:$0xff]  }
  0xcb   : > { %3359 = vmatmul.mubr.bf16.vlgmr.msra.gmra.mxu1 %v3915_v37  ;;  %3367 = vmatpush3.bf16.msra.mxu0 %v3563_v21  ;;  %v3569_v37 = vld [vmem:[%s4312_s2 + $0x218] sm:$0xff]  }
  0xcc   : > { %3398 = vmatpush3.bf16.msra.mxu1 %v3563_v21  ;;  %3368 = vmatprep.subr.bf16.mxu0 %v3564_v23 }
  0xcd   : > { %3391 = vmatprep.subr.bf16.mxu1 %v3564_v23  ;;  %3338 = vmatprep.mubr.bf16.mxu0 %v3942_v47  ;;  %v3570_v47 = vld [vmem:[%s4312_s2 + $0x210] sm:$0xff]  }
  0xce   : > { %3362 = vmatprep.mubr.bf16.mxu1 %v3947_v49  ;;  %v3571_v49 = vld [vmem:[%s4312_s2 + $0x208] sm:$0xff]  }
  0xcf   : > { %3369 = vmatpush3.bf16.msra.mxu0 %v3564_v23 }
  0xd0   : > { %3399 = vmatpush3.bf16.msra.mxu1 %v3564_v23  ;;  %3370 = vmatprep.subr.bf16.mxu0 %v3566_v25 }
  0xd1   : > { %3392 = vmatprep.subr.bf16.mxu1 %v3566_v25 }
  0xd2   : > { %3339 = vmatmul.mubr.bf16.gmra.mxu0 %v2965_v26 }
  0xd3   : > { %3371 = vmatpush3.bf16.msra.mxu0 %v3566_v25  ;;  %3363 = vmatmul.mubr.bf16.gmra.mxu1 %v3567_v18 }
  0xd4   : > { %3400 = vmatpush3.bf16.msra.mxu1 %v3566_v25  ;;  %3372 = vmatprep.subr.bf16.mxu0 %v3568_v33 }
  0xd5   : > { %3393 = vmatprep.subr.bf16.mxu1 %v3568_v33  ;;  %3382 = vmatprep.mubr.bf16.mxu0 %v4040_v2  ;;  %v3572_v2 = vld [vmem:[%s4312_s2 + $0x200] sm:$0xff]  }
  0xd6   : > { %3386 = vmatprep.mubr.bf16.mxu1 %v4084_v28 }
  0xd7   : > { %3373 = vmatpush3.bf16.msra.mxu0 %v3568_v33 }
  0xd8   : > { %3401 = vmatpush3.bf16.msra.mxu1 %v3568_v33  ;;  %3374 = vmatprep.subr.bf16.mxu0 %v3569_v37 }
  0xd9   : > { %3394 = vmatprep.subr.bf16.mxu1 %v3569_v37 }
  0xdb   : > { %3375 = vmatpush3.bf16.msra.mxu0 %v3569_v37 }
  0xdc   : > { %3402 = vmatpush3.bf16.msra.mxu1 %v3569_v37  ;;  %3376 = vmatprep.subr.bf16.mxu0 %v3570_v47 }
  0xdd   : > { %3395 = vmatprep.subr.bf16.mxu1 %v3570_v47 }
  0xdf   : > { %3377 = vmatpush3.bf16.msra.mxu0 %v3570_v47 }
  0xe0   : > { %3403 = vmatpush3.bf16.msra.mxu1 %v3570_v47  ;;  %3378 = vmatprep.subr.bf16.mxu0 %v3571_v49 }
  0xe1   : > { %3396 = vmatprep.subr.bf16.mxu1 %v3571_v49 }
  0xe3   : > { %3379 = vmatpush3.bf16.msra.mxu0 %v3571_v49 }
  0xe4   : > { %3404 = vmatpush3.bf16.msra.mxu1 %v3571_v49  ;;  %3380 = vmatprep.subr.bf16.mxu0 %v3572_v2 }
  0xe5   : > { %3397 = vmatprep.subr.bf16.mxu1 %v3572_v2 }
  0xe7   : > { %3381 = vmatpush3.bf16.msra.mxu0 %v3572_v2 }
  0xe8   : > { %3405 = vmatpush3.bf16.msra.mxu1 %v3572_v2 }
  0xea   : > { %3383 = vmatmul.mubr.bf16.vlgmr.msra.gmra.mxu0 %v4061_v14 }
  0xeb   : > { %3387 = vmatmul.mubr.bf16.vlgmr.msra.gmra.mxu1 %v4201_v8 }
 0x12a   : > { %v3192_v28 = vpop.f32.mrf.mxu0 }
 0x12b   : > { %v3216_v29 = vpop.f32.mrf.mxu1 }
 0x12c   : > { %v973_v27 = vpop.f32.mrf.mxu0  ;;  %v1168_v20 = vadd.f32 %v3216_v29, %v3192_v28 }
 0x12d   : > { %v1135_v32 = vpop.f32.mrf.mxu1 }
 0x12e   : > { %v3193_v30 = vpop.f32.mrf.mxu0  ;;  %v1166_v26 = vadd.f32 %v1135_v32, %v973_v27 }
 0x12f   : > { %v3217_v36 = vpop.f32.mrf.mxu1 }
 0x130   : > { %v976_v34 = vpop.f32.mrf.mxu0  ;;  %v1169_v47 = vadd.f32 %v3217_v36, %v3193_v30 }
 0x131   : > { %v1138_v38 = vpop.f32.mrf.mxu1 }
 0x132   : > { %v3196_v35 = vpop.f32.mrf.mxu0 }
 0x133   : > { %v3220_v39 = vpop.f32.mrf.mxu1 }
 0x134   : > { %v989_v31 = vpop.f32.mrf.mxu0  ;;  %v1172_v23 = vadd.f32 %v3220_v39, %v3196_v35 }
 0x135   : > { %v1151_v41 = vpop.f32.mrf.mxu1 }
 0x136   : > { %v3197_v40 = vpop.f32.mrf.mxu0  ;;  %v1170_v33 = vadd.f32 %v1151_v41, %v989_v31 }
 0x137   : > { %v3221_v45 = vpop.f32.mrf.mxu1 }
 0x138   : > { %v992_v42 = vpop.f32.mrf.mxu0 }
 0x139   : > { %v1154_v14 = vpop.f32.mrf.mxu1 }
 0x13a   : > { %v1171_v35 = vadd.f32 %v1154_v14, %v992_v42 }
 0x14a   : > { %v3240_v44 = vpop.f32.mrf.mxu0 }
 0x14b   : > { %v3264_v48 = vpop.f32.mrf.mxu1  ;;  %v1421_v18 = vadd.f32 %v3240_v44, %v1168_v20 }
 0x14c   : > { %v1388_v46 = vpop.f32.mrf.mxu0 }
 0x14d   : > { %v1550_v51 = vpop.f32.mrf.mxu1  ;;  %v1419_v49 = vadd.f32 %v1388_v46, %v1166_v26  ;;  %v1583_v28 = vadd.f32 %v3264_v48, %v1421_v18 }
 0x14e   : > { %v3241_v50 = vpop.f32.mrf.mxu0 }
 0x14f   : > { %v3265_v53 = vpop.f32.mrf.mxu1  ;;  %v1422_v29 = vadd.f32 %v3241_v50, %v1169_v47  ;;  %v1581_v32 = vadd.f32 %v1550_v51, %v1419_v49 }
 0x150   : > { %v1391_v52 = vpop.f32.mrf.mxu0 }
 0x151   : > { %v1553_v55 = vpop.f32.mrf.mxu1  ;;  %v1584_v36 = vadd.f32 %v3265_v53, %v1422_v29 }
 0x152   : > { %v3244_v54 = vpop.f32.mrf.mxu0 }
 0x153   : > { %v3268_v57 = vpop.f32.mrf.mxu1  ;;  %v1425_v37 = vadd.f32 %v3244_v54, %v1172_v23 }
 0x154   : > { %v1404_v56 = vpop.f32.mrf.mxu0 }
 0x155   : > { %v1566_v59 = vpop.f32.mrf.mxu1  ;;  %v1587_v39 = vadd.f32 %v3268_v57, %v1425_v37 }
 0x156   : > { %v3245_v58 = vpop.f32.mrf.mxu0 }
 0x157   : > { %v3269_v61 = vpop.f32.mrf.mxu1 }
 0x158   : > { %v1407_v60 = vpop.f32.mrf.mxu0 }
 0x159   : > { %v1569_v0 = vpop.f32.mrf.mxu1  ;;  %v1424_v41 = vadd.f32 %v1407_v60, %v1171_v35 }
 0x15b   : > { %v1586_v50 = vadd.f32 %v1569_v0, %v1424_v41 }
 0x16a   : > { %v3288_v63 = vpop.f32.mrf.mxu0 }
 0x16b   : > { %v3312_v43 = vpop.f32.mrf.mxu1  ;;  %v1745_v44 = vadd.f32 %v3288_v63, %v1583_v28 }
 0x16c   : > { %v1712_v1 = vpop.f32.mrf.mxu0 }
 0x16d   : > { %v1962_v5 = vpop.f32.mrf.mxu1  ;;  %v1743_v46 = vadd.f32 %v1712_v1, %v1581_v32 }
 0x16e   : > { %v3289_v4 = vpop.f32.mrf.mxu0 }
 0x16f   : > { %v4264_v7 = vpop.f32.mrf.mxu1  ;;  %v1746_v48 = vadd.f32 %v3289_v4, %v1584_v36  ;;  %v1993_v51 = vadd.f32 %v1962_v5, %v1743_v46 }
 0x170   : > { %v1715_v6 = vpop.f32.mrf.mxu0  ;;  %4318 = vst [vmem:[#allocation5_spill] sm:$0xff] %v4264_v7 }
 0x171   : > { %v4266_v10 = vpop.f32.mrf.mxu1 }
 0x172   : > { %v3292_v9 = vpop.f32.mrf.mxu0  ;;  %4319 = vst [vmem:[#allocation6_spill] sm:$0xff] %v4266_v10  ;;  %v1173_v10 = vadd.f32 %v3221_v45, %v3197_v40 }
 0x173   : > { %v3316_v3 = vpop.f32.mrf.mxu1  ;;  %v1749_v54 = vadd.f32 %v3292_v9, %v1587_v39 }
 0x174   : > { %v1728_v11 = vpop.f32.mrf.mxu0  ;;  %v1426_v27 = vadd.f32 %v3245_v58, %v1173_v10 }
 0x175   : > { %v1978_v12 = vpop.f32.mrf.mxu1  ;;  %v1999_v42 = vadd.f32 %v3316_v3, %v1749_v54 }
 0x176   : > { %v3293_v13 = vpop.f32.mrf.mxu0  ;;  %v1588_v40 = vadd.f32 %v3269_v61, %v1426_v27 }
 0x177   : > { %v3317_v8 = vpop.f32.mrf.mxu1  ;;  %v4323_v53 = vld [vmem:[#allocation5_spill] sm:$0xff] }
 0x178   : > { %v1731_v15 = vpop.f32.mrf.mxu0  ;;  %v1750_v14 = vadd.f32 %v3293_v13, %v1588_v40  ;;  %v1996_v1 = vadd.f32 %v4323_v53, %v1746_v48 }
 0x179   : > { %v4268_v62 = vpop.f32.mrf.mxu1  ;;  %v1748_v60 = vadd.f32 %v1731_v15, %v1586_v50 }
 0x17a   : > { %4320 = vst [vmem:[#allocation7_spill] sm:$0xff] %v4268_v62  ;;  %v1423_v62 = vadd.f32 %v1404_v56, %v1170_v33  ;;  %v2000_v9 = vadd.f32 %v3317_v8, %v1750_v14 }
 0x17c   : > { %v1585_v31 = vadd.f32 %v1566_v59, %v1423_v62 }
 0x17e   : > { %v1747_v45 = vadd.f32 %v1728_v11, %v1585_v31 }
 0x180   : > { %v1997_v59 = vadd.f32 %v1978_v12, %v1747_v45 }
 0x181   : > { %v4326_v5 = vld [vmem:[#allocation7_spill] sm:$0xff] }
 0x18a   : > { %v3336_v16 = vpop.f32.mrf.mxu0 }
 0x18b   : > { %v3360_v17 = vpop.f32.mrf.mxu1 }
 0x18c   : > { %v2106_v22 = vpop.f32.mrf.mxu0 }
 0x18d   : > { %v4270_v24 = vpop.f32.mrf.mxu1  ;;  %v2137_v61 = vadd.f32 %v2106_v22, %v1993_v51 }
 0x18e   : > { %4321 = vst [vmem:[#allocation8_spill] sm:$0xff] %v4270_v24  ;;  %v3337_v19 = vpop.f32.mrf.mxu0  ;;  %v1167_v24 = vadd.f32 %v1138_v38, %v976_v34  ;;  %v1995_v38 = vadd.f32 %v3312_v43, %v1745_v44  ;;  %v4324_v43 = vld [vmem:[#allocation6_spill] sm:$0xff] }
 0x18f   : > { %v4272_v21 = vpop.f32.mrf.mxu1  ;;  %v2140_v3 = vadd.f32 %v3337_v19, %v1996_v1 }
 0x190   : > { %4322 = vst [vmem:[#allocation9_spill] sm:$0xff] %v4272_v21  ;;  %v2109_v25 = vpop.f32.mrf.mxu0  ;;  %v1420_v20 = vadd.f32 %v1391_v52, %v1167_v24  ;;  %v2139_v57 = vadd.f32 %v3336_v16, %v1995_v38 }
 0x191   : > { %v4274_v2 = vpop.f32.mrf.mxu1 }
 0x192   : > { %v3340_v7 = vpop.f32.mrf.mxu0  ;;  %v1582_v34 = vadd.f32 %v1553_v55, %v1420_v20  ;;  %v2283_v0 = vadd.f32 %v3360_v17, %v2139_v57  ;;  %v3024_v17 = vld [vmem:[%s4313_s3] ss:$0 sm:$0xff] }
 0x193   : > { %v3364_v21 = vpop.f32.mrf.mxu1  ;;  %v2143_v63 = vadd.f32 %v3340_v7, %v1999_v42 }
 0x194   : > { %v2122_v30 = vpop.f32.mrf.mxu0  ;;  %v1744_v52 = vadd.f32 %v1715_v6, %v1582_v34  ;;  %v1998_v6 = vadd.f32 %v4326_v5, %v1748_v60 }
 0x195   : > { %v2266_v23 = vpop.f32.mrf.mxu1  ;;  %v2141_v10 = vadd.f32 %v2122_v30, %v1997_v59  ;;  %v2287_v7 = vadd.f32 %v3364_v21, %v2143_v63  ;;  %v4327_v15 = vld [vmem:[#allocation8_spill] sm:$0xff] }
 0x196   : > { %v3341_v56 = vpop.f32.mrf.mxu0  ;;  %v1994_v4 = vadd.f32 %v4324_v43, %v1744_v52  ;;  %v2281_v16 = vadd.f32 %v4327_v15, %v2137_v61 }
 0x197   : > { %v3365_v58 = vpop.f32.mrf.mxu1  ;;  %v2144_v12 = vadd.f32 %v3341_v56, %v2000_v9  ;;  %v2285_v24 = vadd.f32 %v2266_v23, %v2141_v10  ;;  %v4328_v33 = vld [vmem:[#allocation9_spill] sm:$0xff] }
 0x198   : > { %v2125_v55 = vpop.f32.mrf.mxu0  ;;  %v2138_v8 = vadd.f32 %v2109_v25, %v1994_v4  ;;  %v2284_v37 = vadd.f32 %v4328_v33, %v2140_v3 }
 0x199   : > { %v2269_v11 = vpop.f32.mrf.mxu1  ;;  %v2142_v26 = vadd.f32 %v2125_v55, %v1998_v6  ;;  %v2288_v21 = vadd.f32 %v3365_v58, %v2144_v12 }
 0x19a   : > { %v2282_v25 = vadd.f32 %v4274_v2, %v2138_v8 }
 0x19b   : > { %v2286_v32 = vadd.f32 %v2269_v11, %v2142_v26 }
 0x1aa   : > { %v3384_v13 = vpop.f32.mrf.mxu0 }
 0x1ab   : > { %v2449_v62 = vadd.f32 %v3384_v13, %v2283_v0  ;;  %v3388_v22 = vpop.f32.mrf.mxu1 }
 0x1ac   : > { %v2453_v19 = vadd.f32 %v3388_v22, %v2287_v7  ;;  %v2416_v18 = vpop.f32.mrf.mxu0 }
 0x1ad   : > { %v2447_v47 = vadd.f32 %v2416_v18, %v2281_v16  ;;  %v2432_v49 = vpop.f32.mrf.mxu1  ;;  %v2475_v35 = vadd.f32 %v3024_v17, %v2449_v62 }
 0x1ae   : > { %v2451_v28 = vadd.f32 %v2432_v49, %v2285_v24  ;;  %v3385_v29 = vpop.f32.mrf.mxu0  ;;  %v2479_v20 = vadd.f32 %v3024_v17, %v2453_v19 }
 0x1af   : > { %v2450_v39 = vadd.f32 %v3385_v29, %v2284_v37  ;;  %v3389_v27 = vpop.f32.mrf.mxu1  ;;  %v2473_v41 = vadd.f32 %v3024_v17, %v2447_v47  ;;  %v2483_v45 = vmax.f32 %v2475_v35, 0.0 }
 0x1b0   : > { %v2454_v44 = vadd.f32 %v3389_v27, %v2288_v21  ;;  %v2419_v31 = vpop.f32.mrf.mxu0  ;;  %v2477_v46 = vadd.f32 %v3024_v17, %v2451_v28  ;;  %v2487_v48 = vmax.f32 %v2479_v20, 0.0 }
 0x1b1   : > { %v2476_v54 = vadd.f32 %v3024_v17, %v2450_v39  ;;  %v2448_v30 = vadd.f32 %v2419_v31, %v2282_v25  ;;  %v2435_v36 = vpop.f32.mrf.mxu1  ;;  %v2481_v42 = vmax.f32 %v2473_v41, 0.0 }
 0x1b2   : > { %v2480_v23 = vadd.f32 %v3024_v17, %v2454_v44  ;;  %v2452_v40 = vadd.f32 %v2435_v36, %v2286_v32  ;;  %v2485_v51 = vmax.f32 %v2477_v46, 0.0 }
 0x1b3   : > { %v2484_v34 = vmax.f32 %v2476_v54, 0.0  ;;  %v2474_v38 = vadd.f32 %v3024_v17, %v2448_v30 }
 0x1b4   : > { %v2488_v2 = vmax.f32 %v2480_v23, 0.0  ;;  %v2478_v50 = vadd.f32 %v3024_v17, %v2452_v40 }
 0x1b5   : > { %v3051_v14 = vpack.c.bf16 %v2484_v34, %v2483_v45  ;;  %v2482_v56 = vmax.f32 %v2474_v38, 0.0 }
 0x1b6   : > { %v3061_v52 = vpack.c.bf16 %v2488_v2, %v2487_v48  ;;  %v2486_v57 = vmax.f32 %v2478_v50, 0.0 }
 0x1b7   : > { %3063 = vst [vmem:[%s778_s28 + $0x8] sm:$0xff] %v3051_v14   ;;  %v3046_v58 = vpack.c.bf16 %v2482_v56, %v2481_v42 }
 0x1b8   : > { %3065 = vst [vmem:[%s778_s28 + $0x18] sm:$0xff] %v3061_v52   ;;  %v3056_v59 = vpack.c.bf16 %v2486_v57, %v2485_v51 }
 0x1b9   : > { %3047 = vst [vmem:[%s778_s28] sm:$0xff] %v3046_v58  }
 0x1ba   : > { %3064 = vst [vmem:[%s778_s28 + $0x10] sm:$0xff] %v3056_v59  }
 0x1bb PF: > { %s14_s19 = sadd.s32 1, %s3627_s19   ;;  %s4329_s15 = smov %s3615_s16 }
 0x1bc   : > { %p11_p11 = scmp.ge.s32.totalorder %s14_s19, 4   ;;  %s4330_s16 = smov %s3697_s24 }
 0x1bd   : > { %s4331_s17 = smov %s3623_s18  ;;  %s4332_s18 = smov %s4334_s20 }
 0x1be   :  { %13 = sbr.rel (!%p11_p11) target bundleno = 3 (0x3), region = 244 }

// kernel: backbone_base_forward.7
= control target key start
LH: loop header
LB: loop body
LE: loop exit
PB: predicated region body
PF: predicated region fallthrough
CT: control target
= control target key end

     0   :  { %s2470_s15 = smov 0   ;;  %s2472_s16 = smov 0   ;;  %s2890_s0 = inlined_call_operand.vmem [shape: bf16[8,2,17,128], index: 0, kind: input, shape index: {}, may-alias: {0,1}]   ;;  %s2891_s1 = inlined_call_operand.vmem [shape: bf16[8,2,17,128], index: 1, kind: input, shape index: {}, may-alias: {0,1}]   ;;  %s2892_s2 = inlined_call_operand.vmem [shape: bf16[3,3,128,128], index: 2, kind: input, shape index: {}]   ;;  %s2893_s3 = inlined_call_operand.vmem [shape: f32[1,128], index: 3, kind: input, shape index: {}]   ;;  %s2894_s4 = inlined_call_operand.vmem [shape: bf16[32,128], index: 4, kind: output, shape index: {}]  }
   0x1   :  { %s2474_s17 = smov 0   ;;  %s2476_s18 = smov 0  }
   0x2   :  { %s2478_s19 = smov 0  }
   0x3 LB: > { %s36_s20 = sadd.s32 1, %s2437_s18  ;;  %p58_p1 = scmp.ne.s32.totalorder %s2429_s16, %s2425_s15  ;;  %s2441_s19 = sphi %s2478_s19, %s14_s19   ;;  %s2437_s18 = sphi %s2476_s18, %s2899_s18   ;;  %s2433_s17 = sphi %s2474_s17, %s2898_s17   ;;  %s2429_s16 = sphi %s2472_s16, %s2897_s16   ;;  %s2425_s15 = sphi %s2470_s15, %s2896_s15  }
   0x4   : > { %p38_p0 = scmp.ge.s32.totalorder %s36_s20, 2  ;;  %p59_p2 = scmp.eq.s32.totalorder %s2441_s19, 0 }
   0x5   : > { %s51_s23 = sadd.s32 1, %s2429_s16  ;;  %p1765_p5 = scmp.ge.s32.totalorder %s2441_s19, 2 }
   0x6   : > { %s2901_s20 = smov (%p38_p0, %s36_s20), 0  ;;  %p2501_p3 = por %p59_p2, %p58_p1 }
   0x7   : > { %s44_s22 = ssub.s32 %s2437_s18, %s2901_s20  ;;  %218 = sbr.rel (%p1765_p5) target bundleno = 30 (0x1e), region = 24 }
   0x8   : > { %p49_p4 = scmp.eq.s32.totalorder %s44_s22, 0 }
   0xa   : > { %s2509_s24 = scalar_select %p49_p4, %s2429_s16, %s51_s23  }
   0xc   : > { %221 = sbr.rel (!%p2501_p3) target bundleno = 21 (0x15), region = 28  ;;  %s223_s25 = sand.u32 (%p2501_p3), 1, %s2429_s16  }
   0xd   : > { %s2277_s26 = smul.u32 (%p2501_p3), 96, %s2437_s18 }
   0xe   : > { %s2276_s27 = smul.u32 (%p2501_p3), 48, %s223_s25 }
   0xf   : > { %s232_s30 = scalar_lea.vmem (%p2501_p3), %s2890_s0, %s2277_s26 }
  0x10   : > { %v249_v0 = vld [vmem:[%s232_s30] sm:$0xff] (%p2501_p3)   ;;  %v253_v1 = vld [vmem:[%s232_s30 + $0x8] sm:$0xf] (%p2501_p3)  ;;  %v255_v2 = vld [vmem:[%s232_s30 + $0x18] sm:$0xff] (%p2501_p3)   ;;  %s225_s5 = scalar_lea.vmem (%p2501_p3), [#allocation3], %s2276_s27 }
  0x11   : > { %250 = vst [vmem:[%s225_s5] sm:$0xff] %v249_v0   ;;  %254 = vst [vmem:[%s225_s5 + $0x8] sm:$0xf] %v253_v1  ;;  %v259_v3 = vld [vmem:[%s232_s30 + $0x20] sm:$0xf]  ;;  %v261_v4 = vld [vmem:[%s232_s30 + $0x30] sm:$0xff]  }
  0x12   : > { %256 = vst [vmem:[%s225_s5 + $0xc] sm:$0xff] %v255_v2   ;;  %v265_v5 = vld [vmem:[%s232_s30 + $0x38] sm:$0xf]  ;;  %260 = vst [vmem:[%s225_s5 + $0x14] sm:$0xf] %v259_v3  ;;  %v267_v6 = vld [vmem:[%s232_s30 + $0x48] sm:$0xff]  }
  0x13   : > { %262 = vst [vmem:[%s225_s5 + $0x18] sm:$0xff] %v261_v4   ;;  %266 = vst [vmem:[%s225_s5 + $0x20] sm:$0xf] %v265_v5  ;;  %v271_v7 = vld [vmem:[%s232_s30 + $0x50] sm:$0xf] }
  0x14   : > { %268 = vst [vmem:[%s225_s5 + $0x24] sm:$0xff] %v267_v6   ;;  %272 = vst [vmem:[%s225_s5 + $0x2c] sm:$0xf] %v271_v7 }
  0x15 PF: > { %320 = sbr.rel (!%p2501_p3) target bundleno = 30 (0x1e), region = 69  ;;  %s322_s6 = sand.u32 (%p2501_p3), 1, %s2429_s16  }
  0x16   : > { %s1769_s7 = smul.u32 (%p2501_p3), 96, %s2437_s18 }
  0x17   : > { %s2278_s8 = smul.u32 (%p2501_p3), 48, %s322_s6 }
  0x18   : > { %s1663_s11 = scalar_lea.vmem (%p2501_p3), %s2891_s1, %s1769_s7 }
  0x19   : > { %v1770_v8 = vld [vmem:[%s1663_s11 + $0xc] sm:$0xff] (%p2501_p3)   ;;  %v1772_v9 = vld [vmem:[%s1663_s11 + $0x14] sm:$0xf] (%p2501_p3)  ;;  %v1773_v10 = vld [vmem:[%s1663_s11 + $0x24] sm:$0xff] (%p2501_p3)   ;;  %s324_s12 = scalar_lea.vmem (%p2501_p3), [#allocation4], %s2278_s8 }
  0x1a   : > { %350 = vst [vmem:[%s324_s12] sm:$0xff] %v1770_v8   ;;  %354 = vst [vmem:[%s324_s12 + $0x8] sm:$0xf] %v1772_v9  ;;  %v1775_v11 = vld [vmem:[%s1663_s11 + $0x2c] sm:$0xf]  ;;  %v1776_v12 = vld [vmem:[%s1663_s11 + $0x3c] sm:$0xff]  }
  0x1b   : > { %356 = vst [vmem:[%s324_s12 + $0xc] sm:$0xff] %v1773_v10   ;;  %v1778_v13 = vld [vmem:[%s1663_s11 + $0x44] sm:$0xf]  ;;  %360 = vst [vmem:[%s324_s12 + $0x14] sm:$0xf] %v1775_v11  ;;  %v1779_v14 = vld [vmem:[%s1663_s11 + $0x54] sm:$0xff]  }
  0x1c   : > { %362 = vst [vmem:[%s324_s12 + $0x18] sm:$0xff] %v1776_v12   ;;  %366 = vst [vmem:[%s324_s12 + $0x20] sm:$0xf] %v1778_v13  ;;  %v1781_v15 = vld [vmem:[%s1663_s11 + $0x5c] sm:$0xf] }
  0x1d   : > { %368 = vst [vmem:[%s324_s12 + $0x24] sm:$0xff] %v1779_v14   ;;  %372 = vst [vmem:[%s324_s12 + $0x2c] sm:$0xf] %v1781_v15 }
  0x1e PF: > { %p1782_p6 = scmp.ge.s32.totalorder %s2441_s19, 1  ;;  %p419_p7 = scmp.lt.s32.totalorder %s2441_s19, 3 }
  0x20   : > { %p420_p8 = pnand %p1782_p6, %p419_p7 }
  0x21   : > { %s426_s6 = sand.u32 (!%p420_p8), 1, %s2425_s15   ;;  %s1783_s9 = sshll.u32 (!%p420_p8), %s2433_s17, 1 }
  0x22   : > { %423 = sbr.rel (%p420_p8) target bundleno = 406 (0x196), region = 110  ;;  %p494_p9 = scmp.lt.s32.totalorder (!%p420_p8), %s1783_s9, 3 }
  0x23   : > { %s2564_s11 = smul.u32 (!%p420_p8), 48, %s426_s6 }
  0x25   : > { %s2576_s21 = scalar_lea.vmem (!%p420_p8), [#allocation3], %s2564_s11  ;;  %s2702_s22 = scalar_lea.vmem (!%p420_p8), [#allocation4], %s2564_s11 }
  0x27   : > { %v2322_v16 = vld [vmem:[%s2892_s2 + $0x38] sm:$0xff]   ;;  %v2443_v17 = vmov 0.0   ;;  %v2324_v19 = vld [vmem:[%s2892_s2 + $0x30] sm:$0xff]   ;;  %vm2444_vm0 = vmmov 0   ;;  %v2326_v21 = vld [vmem:[%s2892_s2 + $0x28] sm:$0xff]   ;;  %s2903_s9 = smov (!%p494_p9, %s1783_s9), 3 }
  0x28   : > { %2096 = vmatprep.subr.bf16.mxu0 %v2443_v17  ;;  %2116 = vmatprep.subr.bf16.mxu1 %v2443_v17  ;;  %v2323_v18 = vld [vmem:[%s2892_s2 + $0x78] sm:$0xff]   ;;  %v2325_v20 = vld [vmem:[%s2892_s2 + $0x70] sm:$0xff]   ;;  %v2327_v22 = vld [vmem:[%s2892_s2 + $0x68] sm:$0xff]   ;;  %vm778_vm1 = vsmask.f32 7424  ;;  %s1784_s15 = sshll.u32 %s2903_s9, 2 }
  0x29   : > { %2097 = vmatpush3.bf16.msra.mxu0 %v2322_v16  ;;  %2112 = vmatprep.mubr.msk.bf16.mxu0 %vm2444_vm0, %v2443_v17  ;;  %v2328_v23 = vld [vmem:[%s2892_s2 + $0x20] sm:$0xff]   ;;  %v2330_v25 = vld [vmem:[%s2892_s2 + $0x18] sm:$0xff]   ;;  %v2332_v27 = vld [vmem:[%s2892_s2 + $0x10] sm:$0xff]   ;;  %s500_s14 = scalar_lea.vmem %s2894_s4, %s1784_s15 }
  0x2a   : > { %2117 = vmatpush3.bf16.msra.mxu1 %v2323_v18  ;;  %2098 = vmatprep.subr.bf16.mxu0 %v2443_v17  ;;  %v2329_v24 = vld [vmem:[%s2892_s2 + $0x60] sm:$0xff]   ;;  %v2331_v26 = vld [vmem:[%s2892_s2 + $0x58] sm:$0xff]   ;;  %v2333_v28 = vld [vmem:[%s2892_s2 + $0x50] sm:$0xff]  }
  0x2b   : > { %2118 = vmatprep.subr.bf16.mxu1 %v2443_v17  ;;  %2132 = vmatprep.mubr.msk.bf16.mxu1 %vm2444_vm0, %v2443_v17  ;;  %v2334_v29 = vld [vmem:[%s2892_s2 + $0x8] sm:$0xff]   ;;  %v2336_v31 = vld [vmem:[%s2892_s2] sm:$0xff]   ;;  %v2340_v35 = vld [vmem:[%s2892_s2 + $0xb8] sm:$0xff]  }
  0x2c   : > { %v2335_v30 = vld [vmem:[%s2892_s2 + $0x48] sm:$0xff]   ;;  %v2337_v32 = vld [vmem:[%s2892_s2 + $0x40] sm:$0xff]   ;;  %v2341_v36 = vld [vmem:[%s2892_s2 + $0xf8] sm:$0xff]  }
  0x2d   : > { %2099 = vmatpush3.bf16.msra.mxu0 %v2324_v19  ;;  %v2338_v33 = vld [vmem:[%s2576_s21] sm:$0xff]   ;;  %v2339_v34 = vld [vmem:[%s2576_s21 + $0xc] sm:$0xff]   ;;  %v2356_v45 = vld [vmem:[%s2576_s21 + $0x8] ss:$0 sps:$4 sm:$0x11]  }
  0x2e   : > { %2119 = vmatpush3.bf16.msra.mxu1 %v2325_v20  ;;  %2100 = vmatprep.subr.bf16.mxu0 %v2443_v17  ;;  %v2342_v37 = vld [vmem:[%s2892_s2 + $0xb0] sm:$0xff]   ;;  %v2344_v39 = vld [vmem:[%s2892_s2 + $0xa8] sm:$0xff]   ;;  %v2346_v41 = vld [vmem:[%s2892_s2 + $0xa0] sm:$0xff]   ;;  %v782_v46 = vshll.u32 %v2338_v33, 16  ;;  %v780_v49 = vshrl.u32 %v2338_v33, 16  ;;  %v787_v52 = vshll.u32 %v2356_v45, 16 }
  0x2f   : > { %2120 = vmatprep.subr.bf16.mxu1 %v2443_v17  ;;  %v2343_v38 = vld [vmem:[%s2892_s2 + $0xf0] sm:$0xff]   ;;  %v2345_v40 = vld [vmem:[%s2892_s2 + $0xe8] sm:$0xff]   ;;  %v2347_v42 = vld [vmem:[%s2892_s2 + $0xe0] sm:$0xff]  }
  0x30   : > { %v2348_v43 = vld [vmem:[%s2892_s2 + $0x98] sm:$0xff]   ;;  %v2350_v47 = vld [vmem:[%s2892_s2 + $0x90] sm:$0xff]   ;;  %v784_v50 = vrot.slane %v782_v46, 1  ;;  %v2352_v51 = vld [vmem:[%s2892_s2 + $0x88] sm:$0xff]   ;;  %v789_v57 = vrot.slane %v787_v52, 1 }
  0x31   : > { %2101 = vmatpush3.bf16.msra.mxu0 %v2326_v21  ;;  %v2349_v44 = vld [vmem:[%s2892_s2 + $0xd8] sm:$0xff]   ;;  %v2351_v48 = vld [vmem:[%s2892_s2 + $0xd0] sm:$0xff]   ;;  %v2353_v53 = vld [vmem:[%s2892_s2 + $0xc8] sm:$0xff]  }
  0x32   : > { %2121 = vmatpush3.bf16.msra.mxu1 %v2327_v22  ;;  %2102 = vmatprep.subr.bf16.mxu0 %v2443_v17  ;;  %v2354_v54 = vld [vmem:[%s2892_s2 + $0x80] sm:$0xff]   ;;  %v785_v56 = vor.u32 %v784_v50, %v780_v49  ;;  %v2357_v58 = vld [vmem:[%s2892_s2 + $0x138] sm:$0xff]   ;;  %v2360_v62 = vld [vmem:[%s2892_s2 + $0x130] sm:$0xff]  }
  0x33   : > { %2122 = vmatprep.subr.bf16.mxu1 %v2443_v17  ;;  %v2355_v55 = vld [vmem:[%s2892_s2 + $0xc0] sm:$0xff]   ;;  %v2678_v60 = vld [vmem:[%s2576_s21 + $0x18] sm:$0xff]   ;;  %v2361_v63 = vld [vmem:[%s2892_s2 + $0x170] sm:$0xff]  }
  0x34   : > { %v790_v59 = vsel %vm778_vm1, %v785_v56, %v789_v57  ;;  %v2359_v61 = vld [vmem:[%s2892_s2 + $0x178] sm:$0xff]   ;;  %v2362_v0 = vld [vmem:[%s2892_s2 + $0x128] sm:$0xff]   ;;  %v2710_v2 = vld [vmem:[%s2702_s22] sm:$0xff]   ;;  %v1134_v16 = vshll.u32 %v2678_v60, 16  ;;  %v1132_v22 = vshrl.u32 %v2678_v60, 16 }
  0x35   : > { %2103 = vmatpush3.bf16.msra.mxu0 %v2328_v23  ;;  %v2363_v1 = vld [vmem:[%s2892_s2 + $0x168] sm:$0xff]   ;;  %v2364_v3 = vld [vmem:[%s2892_s2 + $0x120] sm:$0xff]   ;;  %v1486_v4 = vshll.u32 %v2710_v2, 16  ;;  %v2366_v6 = vld [vmem:[%s2892_s2 + $0x118] sm:$0xff]   ;;  %v1484_v7 = vshrl.u32 %v2710_v2, 16 }
  0x36   : > { %2123 = vmatpush3.bf16.msra.mxu1 %v2329_v24  ;;  %2104 = vmatprep.subr.bf16.mxu0 %v2443_v17  ;;  %v2365_v5 = vld [vmem:[%s2892_s2 + $0x160] sm:$0xff]   ;;  %v2367_v9 = vld [vmem:[%s2892_s2 + $0x158] sm:$0xff]   ;;  %v2368_v11 = vld [vmem:[%s2892_s2 + $0x110] sm:$0xff]   ;;  %v1136_v23 = vrot.slane %v1134_v16, 1 }
  0x37   : > { %2124 = vmatprep.subr.bf16.mxu1 %v2443_v17  ;;  %v1488_v8 = vrot.slane %v1486_v4, 1  ;;  %v2402_v10 = vld [vmem:[%s2702_s22 + $0x8] ss:$0 sps:$4 sm:$0x11]   ;;  %v2369_v14 = vld [vmem:[%s2892_s2 + $0x150] sm:$0xff]   ;;  %v2390_v45 = vld [vmem:[%s2892_s2 + $0x180] sm:$0xff]  }
  0x38   : > { %v1491_v13 = vshll.u32 %v2402_v10, 16  ;;  %v2376_v15 = vld [vmem:[%s2576_s21 + $0x20] ss:$0 sps:$4 sm:$0x11]   ;;  %v2370_v19 = vld [vmem:[%s2892_s2 + $0x108] sm:$0xff]   ;;  %v2398_v52 = vld [vmem:[%s2892_s2 + $0x218] sm:$0xff]  }
  0x39   : > { %2105 = vmatpush3.bf16.msra.mxu0 %v2330_v25  ;;  %v1489_v12 = vor.u32 %v1488_v8, %v1484_v7  ;;  %v2371_v21 = vld [vmem:[%s2892_s2 + $0x148] sm:$0xff]   ;;  %v1139_v24 = vshll.u32 %v2376_v15, 16  ;;  %v2372_v25 = vld [vmem:[%s2892_s2 + $0x100] sm:$0xff]   ;;  %v2395_v49 = vld [vmem:[%s2892_s2 + $0x230] sm:$0xff]  }
  0x3a   : > { %2125 = vmatpush3.bf16.msra.mxu1 %v2331_v26  ;;  %2106 = vmatprep.subr.bf16.mxu0 %v2443_v17  ;;  %v1493_v18 = vrot.slane %v1491_v13, 1  ;;  %v2373_v26 = vld [vmem:[%s2892_s2 + $0x140] sm:$0xff]   ;;  %v2396_v50 = vld [vmem:[%s2892_s2 + $0x228] sm:$0xff]  }
  0x3b   : > { %2126 = vmatprep.subr.bf16.mxu1 %v2443_v17  ;;  %v2391_v46 = vld [vmem:[%s2892_s2 + $0x1c0] sm:$0xff]  }
  0x3c   : > { %v2745_v20 = vsel %vm778_vm1, %v1489_v12, %v1493_v18 }
  0x3d   : > { %2107 = vmatpush3.bf16.msra.mxu0 %v2332_v27  ;;  %v1137_v27 = vor.u32 %v1136_v23, %v1132_v22 }
  0x3e   : > { %2127 = vmatpush3.bf16.msra.mxu1 %v2333_v28  ;;  %2108 = vmatprep.subr.bf16.mxu0 %v2443_v17  ;;  %v1141_v28 = vrot.slane %v1139_v24, 1 }
  0x3f   : > { %2128 = vmatprep.subr.bf16.mxu1 %v2443_v17 }
  0x41   : > { %2109 = vmatpush3.bf16.msra.mxu0 %v2334_v29  ;;  %v2374_v29 = vld [vmem:[%s2576_s21 + $0x24] sm:$0xff]  }
  0x42   : > { %2129 = vmatpush3.bf16.msra.mxu1 %v2335_v30  ;;  %2110 = vmatprep.subr.bf16.mxu0 %v2443_v17  ;;  %v2375_v30 = vld [vmem:[%s2892_s2 + $0x1b8] sm:$0xff]  }
  0x43   : > { %2130 = vmatprep.subr.bf16.mxu1 %v2443_v17 }
  0x45   : > { %2111 = vmatpush3.bf16.msra.mxu0 %v2336_v31  ;;  %v1142_v31 = vsel %vm778_vm1, %v1137_v27, %v1141_v28 }
  0x46   : > { %2131 = vmatpush3.bf16.msra.mxu1 %v2337_v32  ;;  %2136 = vmatprep.subr.bf16.mxu0 %v2443_v17  ;;  %v2377_v32 = vld [vmem:[%s2892_s2 + $0x1f8] sm:$0xff]  }
  0x47   : > { %2156 = vmatprep.subr.bf16.mxu1 %v2443_v17 }
  0x48   : > { %2113 = vmatmul.mubr.bf16.vlgmr.msra.gmra.mxu0 %v2338_v33  ;;  %v2378_v33 = vld [vmem:[%s2892_s2 + $0x1b0] sm:$0xff]  }
  0x49   : > { %2133 = vmatmul.mubr.bf16.vlgmr.msra.gmra.mxu1 %v2339_v34  ;;  %2137 = vmatpush3.bf16.msra.mxu0 %v2340_v35  ;;  %v2379_v34 = vld [vmem:[%s2892_s2 + $0x1f0] sm:$0xff]   ;;  %v2380_v35 = vld [vmem:[%s2892_s2 + $0x1a8] sm:$0xff]  }
  0x4a   : > { %2157 = vmatpush3.bf16.msra.mxu1 %v2341_v36  ;;  %2138 = vmatprep.subr.bf16.mxu0 %v2443_v17  ;;  %v2381_v36 = vld [vmem:[%s2892_s2 + $0x1e8] sm:$0xff]  }
  0x4b   : > { %2158 = vmatprep.subr.bf16.mxu1 %v2443_v17  ;;  %2152 = vmatprep.mubr.msk.bf16.mxu0 %vm2444_vm0, %v2443_v17 }
  0x4c   : > { %2172 = vmatprep.mubr.msk.bf16.mxu1 %vm2444_vm0, %v2443_v17 }
  0x4d   : > { %2139 = vmatpush3.bf16.msra.mxu0 %v2342_v37  ;;  %v2382_v37 = vld [vmem:[%s2892_s2 + $0x1a0] sm:$0xff]  }
  0x4e   : > { %2159 = vmatpush3.bf16.msra.mxu1 %v2343_v38  ;;  %2140 = vmatprep.subr.bf16.mxu0 %v2443_v17  ;;  %v2383_v38 = vld [vmem:[%s2892_s2 + $0x1e0] sm:$0xff]  }
  0x4f   : > { %2160 = vmatprep.subr.bf16.mxu1 %v2443_v17 }
  0x51   : > { %2141 = vmatpush3.bf16.msra.mxu0 %v2344_v39  ;;  %v2384_v39 = vld [vmem:[%s2892_s2 + $0x198] sm:$0xff]  }
  0x52   : > { %2161 = vmatpush3.bf16.msra.mxu1 %v2345_v40  ;;  %2142 = vmatprep.subr.bf16.mxu0 %v2443_v17  ;;  %v2385_v40 = vld [vmem:[%s2892_s2 + $0x1d8] sm:$0xff]  }
  0x53   : > { %2162 = vmatprep.subr.bf16.mxu1 %v2443_v17 }
  0x55   : > { %2143 = vmatpush3.bf16.msra.mxu0 %v2346_v41  ;;  %v2386_v41 = vld [vmem:[%s2892_s2 + $0x190] sm:$0xff]  }
  0x56   : > { %2163 = vmatpush3.bf16.msra.mxu1 %v2347_v42  ;;  %2144 = vmatprep.subr.bf16.mxu0 %v2443_v17  ;;  %v2387_v42 = vld [vmem:[%s2892_s2 + $0x1d0] sm:$0xff]  }
  0x57   : > { %2164 = vmatprep.subr.bf16.mxu1 %v2443_v17 }
  0x59   : > { %2145 = vmatpush3.bf16.msra.mxu0 %v2348_v43  ;;  %v2388_v43 = vld [vmem:[%s2892_s2 + $0x188] sm:$0xff]  }
  0x5a   : > { %2165 = vmatpush3.bf16.msra.mxu1 %v2349_v44  ;;  %2146 = vmatprep.subr.bf16.mxu0 %v2443_v17  ;;  %v2389_v44 = vld [vmem:[%s2892_s2 + $0x1c8] sm:$0xff]  }
  0x5b   : > { %2166 = vmatprep.subr.bf16.mxu1 %v2443_v17 }
  0x5d   : > { %2147 = vmatpush3.bf16.msra.mxu0 %v2350_v47  ;;  %v2393_v47 = vld [vmem:[%s2892_s2 + $0x238] sm:$0xff]  }
  0x5e   : > { %2167 = vmatpush3.bf16.msra.mxu1 %v2351_v48  ;;  %2148 = vmatprep.subr.bf16.mxu0 %v2443_v17  ;;  %v2394_v48 = vld [vmem:[%s2702_s22 + $0xc] sm:$0xff]  }
  0x5f   : > { %2168 = vmatprep.subr.bf16.mxu1 %v2443_v17 }
  0x61   : > { %2149 = vmatpush3.bf16.msra.mxu0 %v2352_v51  ;;  %v2397_v51 = vld [vmem:[%s2892_s2 + $0x220] sm:$0xff]  }
  0x62   : > { %2169 = vmatpush3.bf16.msra.mxu1 %v2353_v53  ;;  %2150 = vmatprep.subr.bf16.mxu0 %v2443_v17  ;;  %v2399_v53 = vld [vmem:[%s2892_s2 + $0x210] sm:$0xff]  }
  0x63   : > { %2170 = vmatprep.subr.bf16.mxu1 %v2443_v17 }
  0x65   : > { %2151 = vmatpush3.bf16.msra.mxu0 %v2354_v54  ;;  %v2400_v54 = vld [vmem:[%s2892_s2 + $0x208] sm:$0xff]  }
  0x66   : > { %2171 = vmatpush3.bf16.msra.mxu1 %v2355_v55  ;;  %2176 = vmatprep.subr.bf16.mxu0 %v2443_v17  ;;  %v2401_v55 = vld [vmem:[%s2892_s2 + $0x200] sm:$0xff]  }
  0x67   : > { %2196 = vmatprep.subr.bf16.mxu1 %v2443_v17 }
  0x68   : > { %2153 = vmatmul.mubr.bf16.vlgmr.msra.gmra.mxu0 %v790_v59 }
  0x69   : > { %2177 = vmatpush3.bf16.msra.mxu0 %v2357_v58  ;;  %2173 = vmatmul.mubr.bf16.vlgmr.msra.gmra.mxu1 %v2678_v60 }
  0x6a   : > { %2197 = vmatpush3.bf16.msra.mxu1 %v2359_v61  ;;  %2178 = vmatprep.subr.bf16.mxu0 %v2443_v17 }
  0x6b   : > { %2198 = vmatprep.subr.bf16.mxu1 %v2443_v17  ;;  %2192 = vmatprep.mubr.msk.bf16.mxu0 %vm2444_vm0, %v2443_v17 }
  0x6c   : > { %2212 = vmatprep.mubr.msk.bf16.mxu1 %vm2444_vm0, %v2443_v17 }
  0x6d   : > { %2179 = vmatpush3.bf16.msra.mxu0 %v2360_v62 }
  0x6e   : > { %2199 = vmatpush3.bf16.msra.mxu1 %v2361_v63  ;;  %2180 = vmatprep.subr.bf16.mxu0 %v2443_v17 }
  0x6f   : > { %2200 = vmatprep.subr.bf16.mxu1 %v2443_v17 }
  0x71   : > { %2181 = vmatpush3.bf16.msra.mxu0 %v2362_v0 }
  0x72   : > { %2201 = vmatpush3.bf16.msra.mxu1 %v2363_v1  ;;  %2182 = vmatprep.subr.bf16.mxu0 %v2443_v17 }
  0x73   : > { %2202 = vmatprep.subr.bf16.mxu1 %v2443_v17 }
  0x75   : > { %2183 = vmatpush3.bf16.msra.mxu0 %v2364_v3 }
  0x76   : > { %2203 = vmatpush3.bf16.msra.mxu1 %v2365_v5  ;;  %2184 = vmatprep.subr.bf16.mxu0 %v2443_v17 }
  0x77   : > { %2204 = vmatprep.subr.bf16.mxu1 %v2443_v17 }
  0x79   : > { %2185 = vmatpush3.bf16.msra.mxu0 %v2366_v6 }
  0x7a   : > { %2205 = vmatpush3.bf16.msra.mxu1 %v2367_v9  ;;  %2186 = vmatprep.subr.bf16.mxu0 %v2443_v17 }
  0x7b   : > { %2206 = vmatprep.subr.bf16.mxu1 %v2443_v17 }
  0x7d   : > { %2187 = vmatpush3.bf16.msra.mxu0 %v2368_v11 }
  0x7e   : > { %2207 = vmatpush3.bf16.msra.mxu1 %v2369_v14  ;;  %2188 = vmatprep.subr.bf16.mxu0 %v2443_v17 }
  0x7f   : > { %2208 = vmatprep.subr.bf16.mxu1 %v2443_v17 }
  0x81   : > { %2189 = vmatpush3.bf16.msra.mxu0 %v2370_v19 }
  0x82   : > { %2209 = vmatpush3.bf16.msra.mxu1 %v2371_v21  ;;  %2190 = vmatprep.subr.bf16.mxu0 %v2443_v17 }
  0x83   : > { %2210 = vmatprep.subr.bf16.mxu1 %v2443_v17 }
  0x85   : > { %2191 = vmatpush3.bf16.msra.mxu0 %v2372_v25 }
  0x86   : > { %2211 = vmatpush3.bf16.msra.mxu1 %v2373_v26  ;;  %2216 = vmatprep.subr.bf16.mxu0 %v2443_v17 }
  0x87   : > { %2236 = vmatprep.subr.bf16.mxu1 %v2443_v17 }
  0x88   : > { %2193 = vmatmul.mubr.bf16.vlgmr.msra.gmra.mxu0 %v2374_v29 }
  0x89   : > { %2217 = vmatpush3.bf16.msra.mxu0 %v2375_v30  ;;  %2213 = vmatmul.mubr.bf16.vlgmr.msra.gmra.mxu1 %v1142_v31 }
  0x8a   : > { %2237 = vmatpush3.bf16.msra.mxu1 %v2377_v32  ;;  %2218 = vmatprep.subr.bf16.mxu0 %v2443_v17 }
  0x8b   : > { %2238 = vmatprep.subr.bf16.mxu1 %v2443_v17  ;;  %2232 = vmatprep.mubr.msk.bf16.mxu0 %vm2444_vm0, %v2443_v17 }
  0x8c   : > { %2252 = vmatprep.mubr.msk.bf16.mxu1 %vm2444_vm0, %v2443_v17 }
  0x8d   : > { %2219 = vmatpush3.bf16.msra.mxu0 %v2378_v33 }
  0x8e   : > { %2239 = vmatpush3.bf16.msra.mxu1 %v2379_v34  ;;  %2220 = vmatprep.subr.bf16.mxu0 %v2443_v17 }
  0x8f   : > { %2240 = vmatprep.subr.bf16.mxu1 %v2443_v17 }
  0x91   : > { %2221 = vmatpush3.bf16.msra.mxu0 %v2380_v35 }
  0x92   : > { %2241 = vmatpush3.bf16.msra.mxu1 %v2381_v36  ;;  %2222 = vmatprep.subr.bf16.mxu0 %v2443_v17 }
  0x93   : > { %2242 = vmatprep.subr.bf16.mxu1 %v2443_v17 }
  0x95   : > { %2223 = vmatpush3.bf16.msra.mxu0 %v2382_v37 }
  0x96   : > { %2243 = vmatpush3.bf16.msra.mxu1 %v2383_v38  ;;  %2224 = vmatprep.subr.bf16.mxu0 %v2443_v17 }
  0x97   : > { %2244 = vmatprep.subr.bf16.mxu1 %v2443_v17 }
  0x99   : > { %2225 = vmatpush3.bf16.msra.mxu0 %v2384_v39  ;;  %v2003_v39 = vld [vmem:[%s2893_s3] ss:$0 sm:$0xff] }
  0x9a   : > { %2245 = vmatpush3.bf16.msra.mxu1 %v2385_v40  ;;  %2226 = vmatprep.subr.bf16.mxu0 %v2443_v17 }
  0x9b   : > { %2246 = vmatprep.subr.bf16.mxu1 %v2443_v17 }
  0x9d   : > { %2227 = vmatpush3.bf16.msra.mxu0 %v2386_v41 }
  0x9e   : > { %2247 = vmatpush3.bf16.msra.mxu1 %v2387_v42  ;;  %2228 = vmatprep.subr.bf16.mxu0 %v2443_v17 }
  0x9f   : > { %2248 = vmatprep.subr.bf16.mxu1 %v2443_v17 }
  0xa1   : > { %2229 = vmatpush3.bf16.msra.mxu0 %v2388_v43 }
  0xa2   : > { %2249 = vmatpush3.bf16.msra.mxu1 %v2389_v44  ;;  %2230 = vmatprep.subr.bf16.mxu0 %v2443_v17 }
  0xa3   : > { %2250 = vmatprep.subr.bf16.mxu1 %v2443_v17 }
  0xa5   : > { %2231 = vmatpush3.bf16.msra.mxu0 %v2390_v45 }
  0xa6   : > { %2251 = vmatpush3.bf16.msra.mxu1 %v2391_v46  ;;  %2256 = vmatprep.subr.bf16.mxu0 %v2443_v17 }
  0xa8   : > { %2233 = vmatmul.mubr.bf16.vlgmr.msra.gmra.mxu0 %v2710_v2 }
  0xa9   : > { %2257 = vmatpush3.bf16.msra.mxu0 %v2393_v47  ;;  %2253 = vmatmul.mubr.bf16.vlgmr.msra.gmra.mxu1 %v2394_v48 }
  0xaa   : > { %2258 = vmatprep.subr.bf16.mxu0 %v2443_v17  ;;  %2272 = vmatprep.mubr.msk.bf16.mxu0 %vm2444_vm0, %v2443_v17 }
  0xad   : > { %2259 = vmatpush3.bf16.msra.mxu0 %v2395_v49 }
  0xae   : > { %2260 = vmatprep.subr.bf16.mxu0 %v2443_v17 }
  0xb1   : > { %2261 = vmatpush3.bf16.msra.mxu0 %v2396_v50 }
  0xb2   : > { %2262 = vmatprep.subr.bf16.mxu0 %v2443_v17 }
  0xb5   : > { %2263 = vmatpush3.bf16.msra.mxu0 %v2397_v51 }
  0xb6   : > { %2264 = vmatprep.subr.bf16.mxu0 %v2443_v17 }
  0xb9   : > { %2265 = vmatpush3.bf16.msra.mxu0 %v2398_v52 }
  0xba   : > { %2266 = vmatprep.subr.bf16.mxu0 %v2443_v17 }
  0xbd   : > { %2267 = vmatpush3.bf16.msra.mxu0 %v2399_v53 }
  0xbe   : > { %2268 = vmatprep.subr.bf16.mxu0 %v2443_v17 }
  0xc1   : > { %2269 = vmatpush3.bf16.msra.mxu0 %v2400_v54 }
  0xc2   : > { %2270 = vmatprep.subr.bf16.mxu0 %v2443_v17 }
  0xc5   : > { %2271 = vmatpush3.bf16.msra.mxu0 %v2401_v55 }
  0xc8   : > { %2273 = vmatmul.mubr.bf16.vlgmr.msra.gmra.mxu0 %v2745_v20 }
 0x108   : > { %v635_v56 = vpop.f32.mrf.mxu0 }
 0x109   : > { %v749_v57 = vpop.f32.mrf.mxu1 }
 0x10a   : > { %v756_v58 = vadd.f32 %v749_v57, %v635_v56  ;;  %v2114_v59 = vpop.f32.mrf.mxu0 }
 0x10b   : > { %v2134_v60 = vpop.f32.mrf.mxu1 }
 0x10c   : > { %v638_v61 = vpop.f32.mrf.mxu0 }
 0x10d   : > { %v752_v62 = vpop.f32.mrf.mxu1 }
 0x10e   : > { %v757_v63 = vadd.f32 %v752_v62, %v638_v61  ;;  %v2115_v0 = vpop.f32.mrf.mxu0 }
 0x10f   : > { %v2135_v1 = vpop.f32.mrf.mxu1 }
 0x128   : > { %v874_v2 = vpop.f32.mrf.mxu0 }
 0x129   : > { %v881_v3 = vadd.f32 %v874_v2, %v756_v58  ;;  %v988_v4 = vpop.f32.mrf.mxu1 }
 0x12a   : > { %v2154_v5 = vpop.f32.mrf.mxu0 }
 0x12b   : > { %v995_v6 = vadd.f32 %v988_v4, %v881_v3  ;;  %v2174_v7 = vpop.f32.mrf.mxu1 }
 0x12c   : > { %v877_v17 = vpop.f32.mrf.mxu0 }
 0x12d   : > { %v882_v8 = vadd.f32 %v877_v17, %v757_v63  ;;  %v991_v9 = vpop.f32.mrf.mxu1 }
 0x12e   : > { %v2155_v10 = vpop.f32.mrf.mxu0 }
 0x12f   : > { %v996_v11 = vadd.f32 %v991_v9, %v882_v8  ;;  %v2175_v12 = vpop.f32.mrf.mxu1 }
 0x148   : > { %v1102_v13 = vpop.f32.mrf.mxu0 }
 0x149   : > { %v1226_v14 = vpop.f32.mrf.mxu1  ;;  %v1109_v30 = vadd.f32 %v1102_v13, %v995_v6 }
 0x14a   : > { %v2194_v15 = vpop.f32.mrf.mxu0 }
 0x14b   : > { %v2214_v16 = vpop.f32.mrf.mxu1  ;;  %v1233_v31 = vadd.f32 %v1226_v14, %v1109_v30 }
 0x14c   : > { %v1105_v18 = vpop.f32.mrf.mxu0 }
 0x14d   : > { %v1229_v19 = vpop.f32.mrf.mxu1  ;;  %v1110_v32 = vadd.f32 %v1105_v18, %v996_v11 }
 0x14e   : > { %v2195_v20 = vpop.f32.mrf.mxu0 }
 0x14f   : > { %v2215_v21 = vpop.f32.mrf.mxu1  ;;  %v1234_v34 = vadd.f32 %v1229_v19, %v1110_v32 }
 0x168   : > { %v1340_v22 = vpop.f32.mrf.mxu0 }
 0x169   : > { %v1454_v23 = vpop.f32.mrf.mxu1  ;;  %v1347_v33 = vadd.f32 %v1340_v22, %v1233_v31 }
 0x16a   : > { %v2234_v24 = vpop.f32.mrf.mxu0 }
 0x16b   : > { %v2254_v25 = vpop.f32.mrf.mxu1  ;;  %v1461_v35 = vadd.f32 %v1454_v23, %v1347_v33 }
 0x16c   : > { %v1343_v26 = vpop.f32.mrf.mxu0 }
 0x16d   : > { %v1457_v27 = vpop.f32.mrf.mxu1  ;;  %v1348_v36 = vadd.f32 %v1343_v26, %v1234_v34 }
 0x16e   : > { %v2235_v28 = vpop.f32.mrf.mxu0 }
 0x16f   : > { %v2255_v29 = vpop.f32.mrf.mxu1  ;;  %v1462_v41 = vadd.f32 %v1457_v27, %v1348_v36 }
 0x188   : > { %v1578_v37 = vpop.f32.mrf.mxu0 }
 0x189   : > { %v1585_v38 = vadd.f32 %v1578_v37, %v1461_v35 }
 0x18a   : > { %v2274_v40 = vpop.f32.mrf.mxu0 }
 0x18b   : > { %v1599_v43 = vadd.f32 %v2003_v39, %v1585_v38 }
 0x18c   : > { %v1581_v42 = vpop.f32.mrf.mxu0 }
 0x18d   : > { %v1586_v44 = vadd.f32 %v1581_v42, %v1462_v41  ;;  %v1601_v47 = vmax.f32 %v1599_v43, 0.0 }
 0x18e   : > { %v2275_v45 = vpop.f32.mrf.mxu0 }
 0x18f   : > { %v1600_v46 = vadd.f32 %v2003_v39, %v1586_v44 }
 0x191   : > { %v1602_v48 = vmax.f32 %v1600_v46, 0.0 }
 0x193   : > { %v2013_v49 = vpack.c.bf16 %v1602_v48, %v1601_v47 }
 0x195   : > { %2014 = vst [vmem:[%s500_s14] sm:$0xff] %v2013_v49  }
 0x196 PF: > { %s14_s19 = sadd.s32 1, %s2441_s19   ;;  %s2896_s15 = smov %s2429_s16 }
 0x197   : > { %p11_p10 = scmp.ge.s32.totalorder %s14_s19, 4   ;;  %s2897_s16 = smov %s2509_s24 }
 0x198   : > { %s2898_s17 = smov %s2437_s18  ;;  %s2899_s18 = smov %s2901_s20 }
 0x199   :  { %13 = sbr.rel (!%p11_p10) target bundleno = 3 (0x3), region = 187 }

</bundles_post_ra>
